<compile_context>
chip_gen: v7x
topology: tpu7x:2x2x1
jax: 0.10.0
libtpu: 0.0.40
codegen_flags: <defaults>
</compile_context>

<pallas_src>
import jax
import jax.numpy as jnp
from jax.experimental import pallas as pl
from jax.experimental.pallas import tpu as pltpu


# ----------------------------- helpers --------------------------------------

def _round_up(n, m):
    return ((n + m - 1) // m) * m


def _nbytes(a):
    return int(a.size) * a.dtype.itemsize


def _pick_batch_tile(B, max_tile=512):
    """Batch tile selection.

    Small batches (<=256): one grid step, rounded up to a multiple of 8.
    Large batches: multiples of 256 (fills the 256-wide MXU M dim on
    v6e/v7x), capped at `max_tile`, and sized so the grid has >= 2 parallel
    steps (keeps both v7x TensorCores busy).
    """
    if B <= 256:
        return _round_up(max(B, 1), 8)
    n256 = _round_up(B, 256) // 256          # >= 2 here
    return min(max_tile, 256 * max(1, n256 // 2))


# ----------------------------- fused kernel ---------------------------------

def _make_simvc_kernel(n_views):
    """Kernel computing all encoders + weighted-mean fusion for one batch tile.

    Ref layout (positional):
      refs[0]                      : (V,) softmaxed fusion weights, SMEM
      refs[1 : 1+7V]               : per view (x, w1, b1, w2, b2, w3, b3)
      refs[1+7V : 1+7V+V]          : z_v outputs (bt, F) f32
      refs[1+7V+V]                 : fused output (bt, F) f32
    """

    def kernel(*refs):
        fw_ref = refs[0]
        in_refs = refs[1:1 + 7 * n_views]
        out_refs = refs[1 + 7 * n_views:]
        z_refs, fused_ref = out_refs[:n_views], out_refs[n_views]

        fused = None
        for v in range(n_views):                       # static unroll over views
            (x_ref, w1_ref, b1_ref, w2_ref, b2_ref,
             w3_ref, b3_ref) = in_refs[7 * v:7 * (v + 1)]

            # Layer 1: Linear(D_in -> 512) + ReLU  (bf16 operands, f32 acc).
            h = jnp.dot(x_ref[...], w1_ref[...],
                        preferred_element_type=jnp.float32)
            h = jnp.maximum(h + b1_ref[...], 0.0)
            # Layer 2: Linear(512 -> 512) + ReLU.
            h = jnp.dot(h.astype(jnp.bfloat16), w2_ref[...],
                        preferred_element_type=jnp.float32)
            h = jnp.maximum(h + b2_ref[...], 0.0)
            # Layer 3: Linear(512 -> F) + ReLU.
            h = jnp.dot(h.astype(jnp.bfloat16), w3_ref[...],
                        preferred_element_type=jnp.float32)
            z = jnp.maximum(h + b3_ref[...], 0.0)

            z_refs[v][...] = z.astype(z_refs[v].dtype)

            # Softmax-weighted mean, accumulated on the in-VMEM f32 z.
            wz = fw_ref[v] * z
            fused = wz if fused is None else fused + wz

        fused_ref[...] = fused.astype(fused_ref.dtype)

    return kernel


def simvc_forward(xs, params, *, max_batch_tile=512):
    """xs: list of [B, D_in_v] f32. Returns ([z_v f32], fused f32) like SiMVC."""
    enc_params = params["encoders"]
    V = len(xs)
    B = xs[0].shape[0]
    F = enc_params[0]["w3"].shape[1]

    # Softmax over the tiny length-V fusion weight vector (plain jnp).
    fw = jax.nn.softmax(params["fusion_weights"].astype(jnp.float32), axis=0)

    bt = _pick_batch_tile(B, max_batch_tile)
    B_pad = _round_up(B, bt)
    grid = (B_pad // bt,)

    operands = [fw]
    in_specs = [pl.BlockSpec(memory_space=pltpu.MemorySpace.SMEM)]
    flops = 0
    bytes_acc = _nbytes(fw)

    for v in range(V):
        p = enc_params[v]
        x = xs[v].astype(jnp.bfloat16)                 # bf16 x: halves DMA
        if B_pad != B:
            x = jnp.pad(x, ((0, B_pad - B), (0, 0)))
        D_in = x.shape[1]
        H1, H2 = p["w1"].shape[1], p["w2"].shape[1]

        operands += [x, p["w1"], p["b1"], p["w2"], p["b2"], p["w3"], p["b3"]]
        in_specs += [
            pl.BlockSpec((bt, D_in), lambda i: (i, 0)),   # x tile
            pl.BlockSpec((D_in, H1), lambda i: (0, 0)),   # w1 (grid-invariant)
            pl.BlockSpec((1, H1), lambda i: (0, 0)),      # b1
            pl.BlockSpec((H1, H2), lambda i: (0, 0)),     # w2 (grid-invariant)
            pl.BlockSpec((1, H2), lambda i: (0, 0)),      # b2
            pl.BlockSpec((H2, F), lambda i: (0, 0)),      # w3 (grid-invariant)
            pl.BlockSpec((1, F), lambda i: (0, 0)),       # b3
        ]
        flops += 2 * B_pad * (D_in * H1 + H1 * H2 + H2 * F) + 2 * B_pad * F
        bytes_acc += _nbytes(x) + sum(
            _nbytes(p[k]) for k in ("w1", "b1", "w2", "b2", "w3", "b3"))
    bytes_acc += (V + 1) * B_pad * F * 4                  # z_v outputs + fused

    out_shapes = tuple(jax.ShapeDtypeStruct((B_pad, F), jnp.float32)
                       for _ in range(V + 1))
    out_specs = [pl.BlockSpec((bt, F), lambda i: (i, 0)) for _ in range(V + 1)]

    outs = pl.pallas_call(
        _make_simvc_kernel(V),
        out_shape=out_shapes,
        grid_spec=pltpu.PrefetchScalarGridSpec(
            num_scalar_prefetch=0,
            grid=grid,
            in_specs=in_specs,
            out_specs=out_specs,
        ),
        compiler_params=pltpu.CompilerParams(
            dimension_semantics=("parallel",),
            vmem_limit_bytes=32 * 1024 * 1024,
        ),
        cost_estimate=pl.CostEstimate(
            flops=flops, transcendentals=0, bytes_accessed=bytes_acc),
    )(*operands)

    zs = [outs[v][:B] for v in range(V)]
    fused = outs[V][:B]
    return zs, fused


# ----------------------------- params & reference ---------------------------

def init_encoder_params(key, input_dim, feature_dim, hidden=512):
    ks = jax.random.split(key, 6)

    def linear(kw, kb, d_in, d_out):
        bound = 1.0 / float(jnp.sqrt(d_in))
        # PyTorch Linear weight is (d_out, d_in); store as (d_in, d_out), bf16.
        w = jax.random.uniform(kw, (d_in, d_out), jnp.float32, -bound, bound)
        b = jax.random.uniform(kb, (1, d_out), jnp.float32, -bound, bound)
        return w.astype(jnp.bfloat16), b

    w1, b1 = linear(ks[0], ks[1], input_dim, hidden)
    w2, b2 = linear(ks[2], ks[3], hidden, hidden)
    w3, b3 = linear(ks[4], ks[5], hidden, feature_dim)
    return {"w1": w1, "b1": b1, "w2": w2, "b2": b2, "w3": w3, "b3": b3}


def init_simvc_params(key, view, input_sizes, feature_dim):
    keys = jax.random.split(key, view)
    encoders = [
        init_encoder_params(keys[v], input_sizes[v], feature_dim)
        for v in range(view)
    ]
    fusion_weights = jnp.full((view,), 1.0 / view, jnp.float32)
    return {"encoders": encoders, "fusion_weights": fusion_weights}


def encoder_ref(x, p):
    """Pure-JAX reference using the same bf16 operands / f32 accumulation."""
    h = jnp.dot(x.astype(jnp.bfloat16), p["w1"],
                preferred_element_type=jnp.float32) + p["b1"]
    h = jnp.maximum(h, 0.0)
    h = jnp.dot(h.astype(jnp.bfloat16), p["w2"],
                preferred_element_type=jnp.float32) + p["b2"]
    h = jnp.maximum(h, 0.0)
    h = jnp.dot(h.astype(jnp.bfloat16), p["w3"],
                preferred_element_type=jnp.float32) + p["b3"]
    return jnp.maximum(h, 0.0)


def simvc_ref(xs, params):
    zs = [encoder_ref(x, p) for x, p in zip(xs, params["encoders"])]
    w = jax.nn.softmax(params["fusion_weights"].astype(jnp.float32), axis=0)
    fused = sum(w[v] * zs[v] for v in range(len(zs)))
    return zs, fused


# ----------------------------- main ------------------------------------------

if __name__ == "__main__":
    key = jax.random.PRNGKey(0)

    view = 3
    input_sizes = [32, 48, 64]
    feature_dim = 128

    keys = jax.random.split(key, view + 1)
    params = init_simvc_params(keys[view], view, input_sizes, feature_dim)

    def run_and_check(batch, data_key):
        dkeys = jax.random.split(data_key, view)
        xs = [jax.random.normal(dkeys[v], (batch, input_sizes[v]), jnp.float32)
              for v in range(view)]
        zs, fused = simvc_forward(xs, params)
        fused = jax.block_until_ready(fused)
        zs = [jax.block_until_ready(z) for z in zs]

        zs_ref, fused_ref = simvc_ref(xs, params)
        assert fused.shape == (batch, feature_dim)
        for v in range(view):
            assert zs[v].shape == (batch, feature_dim)
            assert jnp.allclose(zs[v], zs_ref[v], atol=2e-3, rtol=2e-3), \
                f"encoder {v} mismatch vs reference (batch={batch})"
        assert jnp.allclose(fused, fused_ref, atol=2e-3, rtol=2e-3), \
            f"fused output mismatch vs reference (batch={batch})"

    run_and_check(8, keys[0])      # small batch: single 8-row grid step
    run_and_check(384, keys[1])    # padded multi-step grid (bt=256, 2 steps)
    print("KERNEL_OK")
</pallas_src>

<mosaic_0001>
module attributes {stable_mosaic.version = 11 : i64} {
  func.func @kernel(%arg0: i32, %arg1: memref<3xf32, #tpu.memory_space<smem>>, %arg2: memref<8x32xbf16, #tpu.memory_space<vmem>>, %arg3: memref<32x512xbf16, #tpu.memory_space<vmem>>, %arg4: memref<1x512xf32, #tpu.memory_space<vmem>>, %arg5: memref<512x512xbf16, #tpu.memory_space<vmem>>, %arg6: memref<1x512xf32, #tpu.memory_space<vmem>>, %arg7: memref<512x128xbf16, #tpu.memory_space<vmem>>, %arg8: memref<1x128xf32, #tpu.memory_space<vmem>>, %arg9: memref<8x48xbf16, #tpu.memory_space<vmem>>, %arg10: memref<48x512xbf16, #tpu.memory_space<vmem>>, %arg11: memref<1x512xf32, #tpu.memory_space<vmem>>, %arg12: memref<512x512xbf16, #tpu.memory_space<vmem>>, %arg13: memref<1x512xf32, #tpu.memory_space<vmem>>, %arg14: memref<512x128xbf16, #tpu.memory_space<vmem>>, %arg15: memref<1x128xf32, #tpu.memory_space<vmem>>, %arg16: memref<8x64xbf16, #tpu.memory_space<vmem>>, %arg17: memref<64x512xbf16, #tpu.memory_space<vmem>>, %arg18: memref<1x512xf32, #tpu.memory_space<vmem>>, %arg19: memref<512x512xbf16, #tpu.memory_space<vmem>>, %arg20: memref<1x512xf32, #tpu.memory_space<vmem>>, %arg21: memref<512x128xbf16, #tpu.memory_space<vmem>>, %arg22: memref<1x128xf32, #tpu.memory_space<vmem>>, %arg23: memref<8x128xf32, #tpu.memory_space<vmem>>, %arg24: memref<8x128xf32, #tpu.memory_space<vmem>>, %arg25: memref<8x128xf32, #tpu.memory_space<vmem>>, %arg26: memref<8x128xf32, #tpu.memory_space<vmem>>) attributes {dimension_semantics = [#tpu.dimension_semantics<parallel>], iteration_bounds = array<i64: 1>, scalar_prefetch = 0 : i64, scratch_operands = 0 : i64, tpu.core_type = #tpu.core_type<tc>, window_params = [{transform_indices = @transform_0, window_bounds = array<i64: 3>}, {transform_indices = @transform_1, window_bounds = array<i64: 8, 32>}, {pipeline_mode = #tpu.pipeline_mode<synchronous>, transform_indices = @transform_2, window_bounds = array<i64: 32, 512>}, {pipeline_mode = #tpu.pipeline_mode<synchronous>, transform_indices = @transform_3, window_bounds = array<i64: 1, 512>}, {pipeline_mode = #tpu.pipeline_mode<synchronous>, transform_indices = @transform_4, window_bounds = array<i64: 512, 512>}, {pipeline_mode = #tpu.pipeline_mode<synchronous>, transform_indices = @transform_5, window_bounds = array<i64: 1, 512>}, {pipeline_mode = #tpu.pipeline_mode<synchronous>, transform_indices = @transform_6, window_bounds = array<i64: 512, 128>}, {pipeline_mode = #tpu.pipeline_mode<synchronous>, transform_indices = @transform_7, window_bounds = array<i64: 1, 128>}, {transform_indices = @transform_8, window_bounds = array<i64: 8, 48>}, {pipeline_mode = #tpu.pipeline_mode<synchronous>, transform_indices = @transform_9, window_bounds = array<i64: 48, 512>}, {pipeline_mode = #tpu.pipeline_mode<synchronous>, transform_indices = @transform_10, window_bounds = array<i64: 1, 512>}, {pipeline_mode = #tpu.pipeline_mode<synchronous>, transform_indices = @transform_11, window_bounds = array<i64: 512, 512>}, {pipeline_mode = #tpu.pipeline_mode<synchronous>, transform_indices = @transform_12, window_bounds = array<i64: 1, 512>}, {pipeline_mode = #tpu.pipeline_mode<synchronous>, transform_indices = @transform_13, window_bounds = array<i64: 512, 128>}, {pipeline_mode = #tpu.pipeline_mode<synchronous>, transform_indices = @transform_14, window_bounds = array<i64: 1, 128>}, {transform_indices = @transform_15, window_bounds = array<i64: 8, 64>}, {pipeline_mode = #tpu.pipeline_mode<synchronous>, transform_indices = @transform_16, window_bounds = array<i64: 64, 512>}, {pipeline_mode = #tpu.pipeline_mode<synchronous>, transform_indices = @transform_17, window_bounds = array<i64: 1, 512>}, {pipeline_mode = #tpu.pipeline_mode<synchronous>, transform_indices = @transform_18, window_bounds = array<i64: 512, 512>}, {pipeline_mode = #tpu.pipeline_mode<synchronous>, transform_indices = @transform_19, window_bounds = array<i64: 1, 512>}, {pipeline_mode = #tpu.pipeline_mode<synchronous>, transform_indices = @transform_20, window_bounds = array<i64: 512, 128>}, {pipeline_mode = #tpu.pipeline_mode<synchronous>, transform_indices = @transform_21, window_bounds = array<i64: 1, 128>}, {transform_indices = @transform_22, window_bounds = array<i64: 8, 128>}, {transform_indices = @transform_23, window_bounds = array<i64: 8, 128>}, {transform_indices = @transform_24, window_bounds = array<i64: 8, 128>}, {transform_indices = @transform_25, window_bounds = array<i64: 8, 128>}]} {
    %c0 = arith.constant 0 : index
    %c0_0 = arith.constant 0 : index
    %0 = vector.load %arg2[%c0, %c0_0] : memref<8x32xbf16, #tpu.memory_space<vmem>>, vector<8x32xbf16>
    %c0_1 = arith.constant 0 : index
    %c0_2 = arith.constant 0 : index
    %1 = vector.load %arg3[%c0_1, %c0_2] : memref<32x512xbf16, #tpu.memory_space<vmem>>, vector<32x512xbf16>
    %cst = arith.constant dense<0.000000e+00> : vector<8x512xf32>
    %2 = tpu.matmul %0, %1, %cst {dimension_numbers = #tpu.dot_dimension_numbers<[1], [0], [0], [1], [0, 0, 1, 1], [], []>} : vector<8x32xbf16>, vector<32x512xbf16>, vector<8x512xf32> -> vector<8x512xf32>
    %c0_3 = arith.constant 0 : index
    %c0_4 = arith.constant 0 : index
    %3 = vector.load %arg4[%c0_3, %c0_4] : memref<1x512xf32, #tpu.memory_space<vmem>>, vector<1x512xf32>
    %4 = vector.broadcast %3 : vector<1x512xf32> to vector<8x512xf32>
    %5 = arith.addf %2, %4 : vector<8x512xf32>
    %cst_5 = arith.constant 0.000000e+00 : f32
    %6 = vector.broadcast %cst_5 : f32 to vector<8x512xf32>
    %7 = arith.maximumf %5, %6 : vector<8x512xf32>
    %8 = arith.truncf %7 : vector<8x512xf32> to vector<8x512xbf16>
    %c0_6 = arith.constant 0 : index
    %c0_7 = arith.constant 0 : index
    %9 = vector.load %arg5[%c0_6, %c0_7] : memref<512x512xbf16, #tpu.memory_space<vmem>>, vector<512x512xbf16>
    %cst_8 = arith.constant dense<0.000000e+00> : vector<8x512xf32>
    %10 = tpu.matmul %8, %9, %cst_8 {dimension_numbers = #tpu.dot_dimension_numbers<[1], [0], [0], [1], [0, 0, 1, 1], [], []>} : vector<8x512xbf16>, vector<512x512xbf16>, vector<8x512xf32> -> vector<8x512xf32>
    %c0_9 = arith.constant 0 : index
    %c0_10 = arith.constant 0 : index
    %11 = vector.load %arg6[%c0_9, %c0_10] : memref<1x512xf32, #tpu.memory_space<vmem>>, vector<1x512xf32>
    %12 = vector.broadcast %11 : vector<1x512xf32> to vector<8x512xf32>
    %13 = arith.addf %10, %12 : vector<8x512xf32>
    %cst_11 = arith.constant 0.000000e+00 : f32
    %14 = vector.broadcast %cst_11 : f32 to vector<8x512xf32>
    %15 = arith.maximumf %13, %14 : vector<8x512xf32>
    %16 = arith.truncf %15 : vector<8x512xf32> to vector<8x512xbf16>
    %c0_12 = arith.constant 0 : index
    %c0_13 = arith.constant 0 : index
    %17 = vector.load %arg7[%c0_12, %c0_13] : memref<512x128xbf16, #tpu.memory_space<vmem>>, vector<512x128xbf16>
    %cst_14 = arith.constant dense<0.000000e+00> : vector<8x128xf32>
    %18 = tpu.matmul %16, %17, %cst_14 {dimension_numbers = #tpu.dot_dimension_numbers<[1], [0], [0], [1], [0, 0, 1, 1], [], []>} : vector<8x512xbf16>, vector<512x128xbf16>, vector<8x128xf32> -> vector<8x128xf32>
    %c0_15 = arith.constant 0 : index
    %c0_16 = arith.constant 0 : index
    %19 = vector.load %arg8[%c0_15, %c0_16] : memref<1x128xf32, #tpu.memory_space<vmem>>, vector<1x128xf32>
    %20 = vector.broadcast %19 : vector<1x128xf32> to vector<8x128xf32>
    %21 = arith.addf %18, %20 : vector<8x128xf32>
    %cst_17 = arith.constant 0.000000e+00 : f32
    %22 = vector.broadcast %cst_17 : f32 to vector<8x128xf32>
    %23 = arith.maximumf %21, %22 : vector<8x128xf32>
    %c0_18 = arith.constant 0 : index
    %c0_19 = arith.constant 0 : index
    %24 = vector.load %arg23[%c0_18, %c0_19] : memref<8x128xf32, #tpu.memory_space<vmem>>, vector<8x128xf32>
    tpu.vector_store %arg23[%c0_18, %c0_19], %23 {strides = array<i32>} : memref<8x128xf32, #tpu.memory_space<vmem>>, vector<8x128xf32>,
    %c0_20 = arith.constant 0 : index
    %25 = memref.load %arg1[%c0_20] : memref<3xf32, #tpu.memory_space<smem>>
    %26 = vector.broadcast %25 : f32 to vector<8x128xf32>
    %27 = arith.mulf %26, %23 : vector<8x128xf32>
    %c0_21 = arith.constant 0 : index
    %c0_22 = arith.constant 0 : index
    %28 = vector.load %arg9[%c0_21, %c0_22] : memref<8x48xbf16, #tpu.memory_space<vmem>>, vector<8x48xbf16>
    %c0_23 = arith.constant 0 : index
    %c0_24 = arith.constant 0 : index
    %29 = vector.load %arg10[%c0_23, %c0_24] : memref<48x512xbf16, #tpu.memory_space<vmem>>, vector<48x512xbf16>
    %cst_25 = arith.constant dense<0.000000e+00> : vector<8x512xf32>
    %30 = tpu.matmul %28, %29, %cst_25 {dimension_numbers = #tpu.dot_dimension_numbers<[1], [0], [0], [1], [0, 0, 1, 1], [], []>} : vector<8x48xbf16>, vector<48x512xbf16>, vector<8x512xf32> -> vector<8x512xf32>
    %c0_26 = arith.constant 0 : index
    %c0_27 = arith.constant 0 : index
    %31 = vector.load %arg11[%c0_26, %c0_27] : memref<1x512xf32, #tpu.memory_space<vmem>>, vector<1x512xf32>
    %32 = vector.broadcast %31 : vector<1x512xf32> to vector<8x512xf32>
    %33 = arith.addf %30, %32 : vector<8x512xf32>
    %cst_28 = arith.constant 0.000000e+00 : f32
    %34 = vector.broadcast %cst_28 : f32 to vector<8x512xf32>
    %35 = arith.maximumf %33, %34 : vector<8x512xf32>
    %36 = arith.truncf %35 : vector<8x512xf32> to vector<8x512xbf16>
    %c0_29 = arith.constant 0 : index
    %c0_30 = arith.constant 0 : index
    %37 = vector.load %arg12[%c0_29, %c0_30] : memref<512x512xbf16, #tpu.memory_space<vmem>>, vector<512x512xbf16>
    %cst_31 = arith.constant dense<0.000000e+00> : vector<8x512xf32>
    %38 = tpu.matmul %36, %37, %cst_31 {dimension_numbers = #tpu.dot_dimension_numbers<[1], [0], [0], [1], [0, 0, 1, 1], [], []>} : vector<8x512xbf16>, vector<512x512xbf16>, vector<8x512xf32> -> vector<8x512xf32>
    %c0_32 = arith.constant 0 : index
    %c0_33 = arith.constant 0 : index
    %39 = vector.load %arg13[%c0_32, %c0_33] : memref<1x512xf32, #tpu.memory_space<vmem>>, vector<1x512xf32>
    %40 = vector.broadcast %39 : vector<1x512xf32> to vector<8x512xf32>
    %41 = arith.addf %38, %40 : vector<8x512xf32>
    %cst_34 = arith.constant 0.000000e+00 : f32
    %42 = vector.broadcast %cst_34 : f32 to vector<8x512xf32>
    %43 = arith.maximumf %41, %42 : vector<8x512xf32>
    %44 = arith.truncf %43 : vector<8x512xf32> to vector<8x512xbf16>
    %c0_35 = arith.constant 0 : index
    %c0_36 = arith.constant 0 : index
    %45 = vector.load %arg14[%c0_35, %c0_36] : memref<512x128xbf16, #tpu.memory_space<vmem>>, vector<512x128xbf16>
    %cst_37 = arith.constant dense<0.000000e+00> : vector<8x128xf32>
    %46 = tpu.matmul %44, %45, %cst_37 {dimension_numbers = #tpu.dot_dimension_numbers<[1], [0], [0], [1], [0, 0, 1, 1], [], []>} : vector<8x512xbf16>, vector<512x128xbf16>, vector<8x128xf32> -> vector<8x128xf32>
    %c0_38 = arith.constant 0 : index
    %c0_39 = arith.constant 0 : index
    %47 = vector.load %arg15[%c0_38, %c0_39] : memref<1x128xf32, #tpu.memory_space<vmem>>, vector<1x128xf32>
    %48 = vector.broadcast %47 : vector<1x128xf32> to vector<8x128xf32>
    %49 = arith.addf %46, %48 : vector<8x128xf32>
    %cst_40 = arith.constant 0.000000e+00 : f32
    %50 = vector.broadcast %cst_40 : f32 to vector<8x128xf32>
    %51 = arith.maximumf %49, %50 : vector<8x128xf32>
    %c0_41 = arith.constant 0 : index
    %c0_42 = arith.constant 0 : index
    %52 = vector.load %arg24[%c0_41, %c0_42] : memref<8x128xf32, #tpu.memory_space<vmem>>, vector<8x128xf32>
    tpu.vector_store %arg24[%c0_41, %c0_42], %51 {strides = array<i32>} : memref<8x128xf32, #tpu.memory_space<vmem>>, vector<8x128xf32>,
    %c1 = arith.constant 1 : index
    %53 = memref.load %arg1[%c1] : memref<3xf32, #tpu.memory_space<smem>>
    %54 = vector.broadcast %53 : f32 to vector<8x128xf32>
    %55 = arith.mulf %54, %51 : vector<8x128xf32>
    %56 = arith.addf %27, %55 : vector<8x128xf32>
    %c0_43 = arith.constant 0 : index
    %c0_44 = arith.constant 0 : index
    %57 = vector.load %arg16[%c0_43, %c0_44] : memref<8x64xbf16, #tpu.memory_space<vmem>>, vector<8x64xbf16>
    %c0_45 = arith.constant 0 : index
    %c0_46 = arith.constant 0 : index
    %58 = vector.load %arg17[%c0_45, %c0_46] : memref<64x512xbf16, #tpu.memory_space<vmem>>, vector<64x512xbf16>
    %cst_47 = arith.constant dense<0.000000e+00> : vector<8x512xf32>
    %59 = tpu.matmul %57, %58, %cst_47 {dimension_numbers = #tpu.dot_dimension_numbers<[1], [0], [0], [1], [0, 0, 1, 1], [], []>} : vector<8x64xbf16>, vector<64x512xbf16>, vector<8x512xf32> -> vector<8x512xf32>
    %c0_48 = arith.constant 0 : index
    %c0_49 = arith.constant 0 : index
    %60 = vector.load %arg18[%c0_48, %c0_49] : memref<1x512xf32, #tpu.memory_space<vmem>>, vector<1x512xf32>
    %61 = vector.broadcast %60 : vector<1x512xf32> to vector<8x512xf32>
    %62 = arith.addf %59, %61 : vector<8x512xf32>
    %cst_50 = arith.constant 0.000000e+00 : f32
    %63 = vector.broadcast %cst_50 : f32 to vector<8x512xf32>
    %64 = arith.maximumf %62, %63 : vector<8x512xf32>
    %65 = arith.truncf %64 : vector<8x512xf32> to vector<8x512xbf16>
    %c0_51 = arith.constant 0 : index
    %c0_52 = arith.constant 0 : index
    %66 = vector.load %arg19[%c0_51, %c0_52] : memref<512x512xbf16, #tpu.memory_space<vmem>>, vector<512x512xbf16>
    %cst_53 = arith.constant dense<0.000000e+00> : vector<8x512xf32>
    %67 = tpu.matmul %65, %66, %cst_53 {dimension_numbers = #tpu.dot_dimension_numbers<[1], [0], [0], [1], [0, 0, 1, 1], [], []>} : vector<8x512xbf16>, vector<512x512xbf16>, vector<8x512xf32> -> vector<8x512xf32>
    %c0_54 = arith.constant 0 : index
    %c0_55 = arith.constant 0 : index
    %68 = vector.load %arg20[%c0_54, %c0_55] : memref<1x512xf32, #tpu.memory_space<vmem>>, vector<1x512xf32>
    %69 = vector.broadcast %68 : vector<1x512xf32> to vector<8x512xf32>
    %70 = arith.addf %67, %69 : vector<8x512xf32>
    %cst_56 = arith.constant 0.000000e+00 : f32
    %71 = vector.broadcast %cst_56 : f32 to vector<8x512xf32>
    %72 = arith.maximumf %70, %71 : vector<8x512xf32>
    %73 = arith.truncf %72 : vector<8x512xf32> to vector<8x512xbf16>
    %c0_57 = arith.constant 0 : index
    %c0_58 = arith.constant 0 : index
    %74 = vector.load %arg21[%c0_57, %c0_58] : memref<512x128xbf16, #tpu.memory_space<vmem>>, vector<512x128xbf16>
    %cst_59 = arith.constant dense<0.000000e+00> : vector<8x128xf32>
    %75 = tpu.matmul %73, %74, %cst_59 {dimension_numbers = #tpu.dot_dimension_numbers<[1], [0], [0], [1], [0, 0, 1, 1], [], []>} : vector<8x512xbf16>, vector<512x128xbf16>, vector<8x128xf32> -> vector<8x128xf32>
    %c0_60 = arith.constant 0 : index
    %c0_61 = arith.constant 0 : index
    %76 = vector.load %arg22[%c0_60, %c0_61] : memref<1x128xf32, #tpu.memory_space<vmem>>, vector<1x128xf32>
    %77 = vector.broadcast %76 : vector<1x128xf32> to vector<8x128xf32>
    %78 = arith.addf %75, %77 : vector<8x128xf32>
    %cst_62 = arith.constant 0.000000e+00 : f32
    %79 = vector.broadcast %cst_62 : f32 to vector<8x128xf32>
    %80 = arith.maximumf %78, %79 : vector<8x128xf32>
    %c0_63 = arith.constant 0 : index
    %c0_64 = arith.constant 0 : index
    %81 = vector.load %arg25[%c0_63, %c0_64] : memref<8x128xf32, #tpu.memory_space<vmem>>, vector<8x128xf32>
    tpu.vector_store %arg25[%c0_63, %c0_64], %80 {strides = array<i32>} : memref<8x128xf32, #tpu.memory_space<vmem>>, vector<8x128xf32>,
    %c2 = arith.constant 2 : index
    %82 = memref.load %arg1[%c2] : memref<3xf32, #tpu.memory_space<smem>>
    %83 = vector.broadcast %82 : f32 to vector<8x128xf32>
    %84 = arith.mulf %83, %80 : vector<8x128xf32>
    %85 = arith.addf %56, %84 : vector<8x128xf32>
    %c0_65 = arith.constant 0 : index
    %c0_66 = arith.constant 0 : index
    %86 = vector.load %arg26[%c0_65, %c0_66] : memref<8x128xf32, #tpu.memory_space<vmem>>, vector<8x128xf32>
    tpu.vector_store %arg26[%c0_65, %c0_66], %85 {strides = array<i32>} : memref<8x128xf32, #tpu.memory_space<vmem>>, vector<8x128xf32>,
    return
  }
  func.func @transform_0(%arg0: i32) -> i32 {
    %c0_i32 = arith.constant 0 : i32
    %c0_i32_0 = arith.constant 0 : i32
    return %c0_i32 : i32
  }
  func.func @transform_1(%arg0: i32) -> (i32, i32) {
    %c0_i32 = arith.constant 0 : i32
    %c0_i32_0 = arith.constant 0 : i32
    return %arg0, %c0_i32 : i32, i32
  }
  func.func @transform_2(%arg0: i32) -> (i32, i32) {
    %c0_i32 = arith.constant 0 : i32
    %c0_i32_0 = arith.constant 0 : i32
    %c0_i32_1 = arith.constant 0 : i32
    return %c0_i32, %c0_i32_0 : i32, i32
  }
  func.func @transform_3(%arg0: i32) -> (i32, i32) {
    %c0_i32 = arith.constant 0 : i32
    %c0_i32_0 = arith.constant 0 : i32
    %c0_i32_1 = arith.constant 0 : i32
    return %c0_i32, %c0_i32_0 : i32, i32
  }
  func.func @transform_4(%arg0: i32) -> (i32, i32) {
    %c0_i32 = arith.constant 0 : i32
    %c0_i32_0 = arith.constant 0 : i32
    %c0_i32_1 = arith.constant 0 : i32
    return %c0_i32, %c0_i32_0 : i32, i32
  }
  func.func @transform_5(%arg0: i32) -> (i32, i32) {
    %c0_i32 = arith.constant 0 : i32
    %c0_i32_0 = arith.constant 0 : i32
    %c0_i32_1 = arith.constant 0 : i32
    return %c0_i32, %c0_i32_0 : i32, i32
  }
  func.func @transform_6(%arg0: i32) -> (i32, i32) {
    %c0_i32 = arith.constant 0 : i32
    %c0_i32_0 = arith.constant 0 : i32
    %c0_i32_1 = arith.constant 0 : i32
    return %c0_i32, %c0_i32_0 : i32, i32
  }
  func.func @transform_7(%arg0: i32) -> (i32, i32) {
    %c0_i32 = arith.constant 0 : i32
    %c0_i32_0 = arith.constant 0 : i32
    %c0_i32_1 = arith.constant 0 : i32
    return %c0_i32, %c0_i32_0 : i32, i32
  }
  func.func @transform_8(%arg0: i32) -> (i32, i32) {
    %c0_i32 = arith.constant 0 : i32
    %c0_i32_0 = arith.constant 0 : i32
    return %arg0, %c0_i32 : i32, i32
  }
  func.func @transform_9(%arg0: i32) -> (i32, i32) {
    %c0_i32 = arith.constant 0 : i32
    %c0_i32_0 = arith.constant 0 : i32
    %c0_i32_1 = arith.constant 0 : i32
    return %c0_i32, %c0_i32_0 : i32, i32
  }
  func.func @transform_10(%arg0: i32) -> (i32, i32) {
    %c0_i32 = arith.constant 0 : i32
    %c0_i32_0 = arith.constant 0 : i32
    %c0_i32_1 = arith.constant 0 : i32
    return %c0_i32, %c0_i32_0 : i32, i32
  }
  func.func @transform_11(%arg0: i32) -> (i32, i32) {
    %c0_i32 = arith.constant 0 : i32
    %c0_i32_0 = arith.constant 0 : i32
    %c0_i32_1 = arith.constant 0 : i32
    return %c0_i32, %c0_i32_0 : i32, i32
  }
  func.func @transform_12(%arg0: i32) -> (i32, i32) {
    %c0_i32 = arith.constant 0 : i32
    %c0_i32_0 = arith.constant 0 : i32
    %c0_i32_1 = arith.constant 0 : i32
    return %c0_i32, %c0_i32_0 : i32, i32
  }
  func.func @transform_13(%arg0: i32) -> (i32, i32) {
    %c0_i32 = arith.constant 0 : i32
    %c0_i32_0 = arith.constant 0 : i32
    %c0_i32_1 = arith.constant 0 : i32
    return %c0_i32, %c0_i32_0 : i32, i32
  }
  func.func @transform_14(%arg0: i32) -> (i32, i32) {
    %c0_i32 = arith.constant 0 : i32
    %c0_i32_0 = arith.constant 0 : i32
    %c0_i32_1 = arith.constant 0 : i32
    return %c0_i32, %c0_i32_0 : i32, i32
  }
  func.func @transform_15(%arg0: i32) -> (i32, i32) {
    %c0_i32 = arith.constant 0 : i32
    %c0_i32_0 = arith.constant 0 : i32
    return %arg0, %c0_i32 : i32, i32
  }
  func.func @transform_16(%arg0: i32) -> (i32, i32) {
    %c0_i32 = arith.constant 0 : i32
    %c0_i32_0 = arith.constant 0 : i32
    %c0_i32_1 = arith.constant 0 : i32
    return %c0_i32, %c0_i32_0 : i32, i32
  }
  func.func @transform_17(%arg0: i32) -> (i32, i32) {
    %c0_i32 = arith.constant 0 : i32
    %c0_i32_0 = arith.constant 0 : i32
    %c0_i32_1 = arith.constant 0 : i32
    return %c0_i32, %c0_i32_0 : i32, i32
  }
  func.func @transform_18(%arg0: i32) -> (i32, i32) {
    %c0_i32 = arith.constant 0 : i32
    %c0_i32_0 = arith.constant 0 : i32
    %c0_i32_1 = arith.constant 0 : i32
    return %c0_i32, %c0_i32_0 : i32, i32
  }
  func.func @transform_19(%arg0: i32) -> (i32, i32) {
    %c0_i32 = arith.constant 0 : i32
    %c0_i32_0 = arith.constant 0 : i32
    %c0_i32_1 = arith.constant 0 : i32
    return %c0_i32, %c0_i32_0 : i32, i32
  }
  func.func @transform_20(%arg0: i32) -> (i32, i32) {
    %c0_i32 = arith.constant 0 : i32
    %c0_i32_0 = arith.constant 0 : i32
    %c0_i32_1 = arith.constant 0 : i32
    return %c0_i32, %c0_i32_0 : i32, i32
  }
  func.func @transform_21(%arg0: i32) -> (i32, i32) {
    %c0_i32 = arith.constant 0 : i32
    %c0_i32_0 = arith.constant 0 : i32
    %c0_i32_1 = arith.constant 0 : i32
    return %c0_i32, %c0_i32_0 : i32, i32
  }
  func.func @transform_22(%arg0: i32) -> (i32, i32) {
    %c0_i32 = arith.constant 0 : i32
    %c0_i32_0 = arith.constant 0 : i32
    return %arg0, %c0_i32 : i32, i32
  }
  func.func @transform_23(%arg0: i32) -> (i32, i32) {
    %c0_i32 = arith.constant 0 : i32
    %c0_i32_0 = arith.constant 0 : i32
    return %arg0, %c0_i32 : i32, i32
  }
  func.func @transform_24(%arg0: i32) -> (i32, i32) {
    %c0_i32 = arith.constant 0 : i32
    %c0_i32_0 = arith.constant 0 : i32
    return %arg0, %c0_i32 : i32, i32
  }
  func.func @transform_25(%arg0: i32) -> (i32, i32) {
    %c0_i32 = arith.constant 0 : i32
    %c0_i32_0 = arith.constant 0 : i32
    return %arg0, %c0_i32 : i32, i32
  }
}

</mosaic_0001>

<bundles_post_ra>
// kernel: tpu_custom_call.1
= control target key start
LH: loop header
LB: loop body
LE: loop exit
PB: predicated region body
PF: predicated region fallthrough
CT: control target
= control target key end

     0   :  { %s7037_s0 = inlined_call_operand.hbm [shape: f32[3], index: 0, kind: input, shape index: {}]   ;;  %s7038_s1 = inlined_call_operand.hbm [shape: bf16[8,32], index: 1, kind: input, shape index: {}]   ;;  %s7039_s2 = inlined_call_operand.hbm [shape: bf16[32,512], index: 2, kind: input, shape index: {}]   ;;  %s7040_s3 = inlined_call_operand.vmem [shape: f32[1,512], index: 3, kind: input, shape index: {}]   ;;  %s7041_s4 = inlined_call_operand.hbm [shape: bf16[512,512], index: 4, kind: input, shape index: {}]   ;;  %s7042_s5 = inlined_call_operand.vmem [shape: f32[1,512], index: 5, kind: input, shape index: {}]   ;;  %s7043_s6 = inlined_call_operand.hbm [shape: bf16[512,128], index: 6, kind: input, shape index: {}]   ;;  %s7044_s7 = inlined_call_operand.vmem [shape: f32[1,128], index: 7, kind: input, shape index: {}]   ;;  %s7045_s8 = inlined_call_operand.vmem [shape: bf16[8,48], index: 8, kind: input, shape index: {}]   ;;  %s7046_s9 = inlined_call_operand.hbm [shape: bf16[48,512], index: 9, kind: input, shape index: {}]   ;;  %s7047_s10 = inlined_call_operand.vmem [shape: f32[1,512], index: 10, kind: input, shape index: {}]   ;;  %s7048_s11 = inlined_call_operand.hbm [shape: bf16[512,512], index: 11, kind: input, shape index: {}]   ;;  %s7049_s12 = inlined_call_operand.vmem [shape: f32[1,512], index: 12, kind: input, shape index: {}]   ;;  %s7050_s13 = inlined_call_operand.hbm [shape: bf16[512,128], index: 13, kind: input, shape index: {}]   ;;  %s7051_s14 = inlined_call_operand.vmem [shape: f32[1,128], index: 14, kind: input, shape index: {}]   ;;  %s7052_s15 = inlined_call_operand.vmem [shape: bf16[8,64], index: 15, kind: input, shape index: {}]   ;;  %s7053_s16 = inlined_call_operand.hbm [shape: bf16[64,512], index: 16, kind: input, shape index: {}]   ;;  %s7054_s17 = inlined_call_operand.vmem [shape: f32[1,512], index: 17, kind: input, shape index: {}]   ;;  %s7055_s18 = inlined_call_operand.hbm [shape: bf16[512,512], index: 18, kind: input, shape index: {}]   ;;  %s7056_s19 = inlined_call_operand.vmem [shape: f32[1,512], index: 19, kind: input, shape index: {}]   ;;  %s7057_s20 = inlined_call_operand.hbm [shape: bf16[512,128], index: 20, kind: input, shape index: {}]   ;;  %s7058_s21 = inlined_call_operand.vmem [shape: f32[1,128], index: 21, kind: input, shape index: {}]   ;;  %s7059_s22 = inlined_call_operand.hbm [shape: f32[8,128], index: 22, kind: output, shape index: {0}]   ;;  %s7060_s23 = inlined_call_operand.hbm [shape: f32[8,128], index: 23, kind: output, shape index: {1}]   ;;  %s7061_s24 = inlined_call_operand.hbm [shape: f32[8,128], index: 24, kind: output, shape index: {2}]   ;;  %s7062_s25 = inlined_call_operand.hbm [shape: f32[8,128], index: 25, kind: output, shape index: {3}]  }
   0x1   :  { %7079 = sst [smem:[#allocation37_spill]] %s7037_s0 }
   0x2   :  { %7080 = sst [smem:[#allocation38_spill]] %s7038_s1 }
   0x3   :  { %7081 = sst [smem:[#allocation39_spill]] %s7039_s2 }
   0x4   :  { %7082 = sst [smem:[#allocation40_spill]] %s7040_s3 }
   0x5   :  { %7083 = sst [smem:[#allocation41_spill]] %s7041_s4 }
   0x6   :  { %7084 = sst [smem:[#allocation42_spill]] %s7042_s5 }
   0x7   :  { %7085 = sst [smem:[#allocation43_spill]] %s7043_s6 }
   0x8   :  { %7086 = sst [smem:[#allocation44_spill]] %s7044_s7 }
   0x9   :  { %7087 = sst [smem:[#allocation45_spill]] %s7045_s8 }
   0xa   :  { %7088 = sst [smem:[#allocation46_spill]] %s7046_s9 }
   0xb   :  { %7089 = sst [smem:[#allocation47_spill]] %s7061_s24 }
   0xc   :  { %7090 = sst [smem:[#allocation48_spill]] %s7062_s25 }
   0xd   :  { %31 = vsyncpa [#allocation5], 0 }
   0xe   :  { %32 = vsyncpa [#allocation3], 0 }
   0xf   :  { %33 = vsyncpa [#allocation8], 0 }
  0x10   :  { %34 = vsyncpa [#allocation11], 0 }
  0x11   :  { %35 = vsyncpa [#allocation14], 0 }
  0x12   :  { %36 = vsyncpa [#allocation17], 0 }
  0x13   :  { %37 = vsyncpa [#allocation20], 0 }
  0x14   :  { %38 = vsyncpa [#allocation4], 0 }
  0x15   :  { %39 = vsyncpa [#allocation23], 0 }
  0x16   :  { %40 = vsyncpa [#allocation26], 0  ;;  %s6565_s29 = smov [#allocation7]   ;;  %s7091_s7 = sld [smem:[#allocation39_spill]] }
  0x17   :  { %s64_s2 = sshll.u32 %s6565_s29, 4  ;;  %s65_s2 = int_to_ptr.vmem [resolvable:$true] %s64_s2 }
  0x1c   :  { %s6227_s3 = scalar_lea.hbm %s7091_s7, 1024 }
  0x1d   :  { %p6228_p0 = scmp.ne.s32.totalorder %s7091_s7, %s6227_s3  ;;  %p6231_p1 = scmp.lt.u32.totalorder %s6227_s3, %s7091_s7 }
  0x1f   :  { %p6233_p2 = pnand %p6231_p1, %p6228_p0 }
  0x21   :  { %6236 = shalt.err (!%p6233_p2)
}
  0x22   :  { %s6237_s4 = scalar_lea.vmem %s65_s2, 1024  ;;  %p6242_p4 = scmp.lt.s32.totalorder %s65_s2, %s65_s2 }
  0x23   :  { %p6238_p3 = scmp.ne.s32.totalorder %s65_s2, %s6237_s4  ;;  %p6243_p5 = scmp.lt.s32.totalorder %s6237_s4, %s6237_s4 }
  0x25   :  { %p6244_p6 = por %p6243_p5, %p6242_p4 }
  0x27   :  { %p6245_p7 = pnand %p6244_p6, %p6238_p3 }
  0x29   :  { %6248 = shalt.err (!%p6245_p7)
}
  0x2a   :  { %s7071_s28 = smov 256   ;;  %s7073_s9 = smov 16  }
  0x2b   :  { %70 = dma.hbm_to_vmem [thread:$0]  %s7091_s7, 1024, %s65_s2, [#allocation8], %s7071_s28, %s7071_s28, %s7073_s9  }
  0x2c   :  { %s6568_s29 = smov [#allocation10]   ;;  %s7092_s26 = sld [smem:[#allocation43_spill]] }
  0x2d   :  { %s92_s6 = sshll.u32 %s6568_s29, 4  ;;  %s93_s6 = int_to_ptr.vmem [resolvable:$true] %s92_s6 }
  0x32   :  { %s6249_s1 = scalar_lea.hbm %s7092_s26, 4096 }
  0x33   :  { %p6250_p8 = scmp.ne.s32.totalorder %s7092_s26, %s6249_s1  ;;  %p6253_p9 = scmp.lt.u32.totalorder %s6249_s1, %s7092_s26 }
  0x35   :  { %p6255_p10 = pnand %p6253_p9, %p6250_p8 }
  0x37   :  { %6258 = shalt.err (!%p6255_p10)
}
  0x38   :  { %s6259_s24 = scalar_lea.vmem %s93_s6, 4096  ;;  %p6264_p12 = scmp.lt.s32.totalorder %s93_s6, %s93_s6 }
  0x39   :  { %p6260_p11 = scmp.ne.s32.totalorder %s93_s6, %s6259_s24  ;;  %p6265_p13 = scmp.lt.s32.totalorder %s6259_s24, %s6259_s24 }
  0x3b   :  { %p6266_p0 = por %p6265_p13, %p6264_p12 }
  0x3d   :  { %p6267_p1 = pnand %p6266_p0, %p6260_p11 }
  0x3f   :  { %6270 = shalt.err (!%p6267_p1)
}
  0x40   :  { %s7075_s2 = smov 64   ;;  %s7077_s7 = smov 4  }
  0x41   :  { %98 = dma.hbm_to_vmem [thread:$0]  %s7092_s26, 4096, %s93_s6, [#allocation11], %s7075_s2, %s7075_s2, %s7077_s7  }
  0x42   :  { %s6571_s25 = smov [#allocation13]   ;;  %s6572_s30 = smov [#allocation16]  }
  0x43   :  { %s122_s29 = sshll.u32 %s6571_s25, 4  ;;  %s152_s3 = sshll.u32 %s6572_s30, 4  ;;  %s123_s29 = int_to_ptr.vmem [resolvable:$true] %s122_s29  ;;  %s6745_s3 = int_to_ptr.vmem [resolvable:$true] %s152_s3 }
  0x44   :  { %s6271_s8 = scalar_lea.hbm %s7048_s11, 16384 }
  0x45   :  { %p6272_p2 = scmp.ne.s32.totalorder %s7048_s11, %s6271_s8  ;;  %p6275_p3 = scmp.lt.u32.totalorder %s6271_s8, %s7048_s11 }
  0x47   :  { %p6277_p4 = pnand %p6275_p3, %p6272_p2 }
  0x49   :  { %6280 = shalt.err (!%p6277_p4)
}
  0x4a   :  { %s6281_s6 = scalar_lea.vmem %s123_s29, 16384  ;;  %p6286_p6 = scmp.lt.s32.totalorder %s123_s29, %s123_s29 }
  0x4b   :  { %p6282_p5 = scmp.ne.s32.totalorder %s123_s29, %s6281_s6  ;;  %p6287_p7 = scmp.lt.s32.totalorder %s6281_s6, %s6281_s6 }
  0x4d   :  { %p6288_p8 = por %p6287_p7, %p6286_p6 }
  0x4f   :  { %p6289_p9 = pnand %p6288_p8, %p6282_p5 }
  0x51   :  { %6292 = shalt.err (!%p6289_p9)
}
  0x52   :  { %s7093_s26 = smov 16   ;;  %s7094_s5 = smov 256  }
  0x53   :  { %128 = dma.hbm_to_vmem [thread:$0]  %s7048_s11, 16384, %s123_s29, [#allocation14], %s7094_s5, %s7094_s5, %s7093_s26  }
  0x54   :  { %s6293_s28 = scalar_lea.hbm %s7053_s16, 2048 }
  0x55   :  { %p6294_p10 = scmp.ne.s32.totalorder %s7053_s16, %s6293_s28  ;;  %p6297_p11 = scmp.lt.u32.totalorder %s6293_s28, %s7053_s16 }
  0x57   :  { %p6299_p12 = pnand %p6297_p11, %p6294_p10 }
  0x59   :  { %6302 = shalt.err (!%p6299_p12)
}
  0x5a   :  { %s6303_s4 = scalar_lea.vmem %s6745_s3, 2048  ;;  %p6308_p0 = scmp.lt.s32.totalorder %s6745_s3, %s6745_s3 }
  0x5b   :  { %p6304_p13 = scmp.ne.s32.totalorder %s6745_s3, %s6303_s4  ;;  %p6309_p1 = scmp.lt.s32.totalorder %s6303_s4, %s6303_s4 }
  0x5d   :  { %p6310_p2 = por %p6309_p1, %p6308_p0 }
  0x5f   :  { %p6311_p3 = pnand %p6310_p2, %p6304_p13 }
  0x61   :  { %6314 = shalt.err (!%p6311_p3)
}
  0x62   :  { %158 = dma.hbm_to_vmem [thread:$0]  %s7053_s16, 2048, %s6745_s3, [#allocation17], %s7094_s5, %s7094_s5, %s7093_s26  }
  0x63   :  { %s7095_s25 = sld [smem:[#allocation37_spill]] }
  0x69   :  { %s6315_s30 = scalar_lea.hbm %s7095_s25, 16 }
  0x6a   :  { %p6316_p4 = scmp.ne.s32.totalorder %s7095_s25, %s6315_s30  ;;  %p6319_p5 = scmp.lt.u32.totalorder %s6315_s30, %s7095_s25 }
  0x6c   :  { %p6321_p6 = pnand %p6319_p5, %p6316_p4 }
  0x6e   :  { %6324 = shalt.err (!%p6321_p6)
}
  0x6f   :  { %s6573_s8 = smov [#allocation2]   ;;  %s6574_s16 = smov [#allocation6]  }
  0x70   :  { %48 = dma.hbm_to_smem %s7095_s25, 16, %s6573_s8, [#allocation5]  }
  0x71   :  { %s55_s3 = sshll.u32 %s6574_s16, 4  ;;  %s6575_s11 = smov [#allocation9]   ;;  %s56_s3 = int_to_ptr.vmem [resolvable:$true] %s55_s3 }
  0x72   :  { %s78_s29 = sshll.u32 %s6575_s11, 4  ;;  %s7096_s24 = sld [smem:[#allocation38_spill]]  ;;  %s79_s29 = int_to_ptr.vmem [resolvable:$true] %s78_s29 }
  0x78   :  { %s6325_s28 = scalar_lea.hbm %s7096_s24, 64 }
  0x79   :  { %p6326_p7 = scmp.ne.s32.totalorder %s7096_s24, %s6325_s28  ;;  %p6329_p8 = scmp.lt.u32.totalorder %s6325_s28, %s7096_s24 }
  0x7b   :  { %p6331_p9 = pnand %p6329_p8, %p6326_p7 }
  0x7d   :  { %6334 = shalt.err (!%p6331_p9)
}
  0x7e   :  { %s6335_s25 = scalar_lea.vmem %s56_s3, 64  ;;  %p6340_p11 = scmp.lt.s32.totalorder %s56_s3, %s56_s3 }
  0x7f   :  { %p6336_p10 = scmp.ne.s32.totalorder %s56_s3, %s6335_s25  ;;  %p6341_p12 = scmp.lt.s32.totalorder %s6335_s25, %s6335_s25 }
  0x81   :  { %p6342_p13 = por %p6341_p12, %p6340_p11 }
  0x83   :  { %p6343_p0 = pnand %p6342_p13, %p6336_p10 }
  0x85   :  { %6346 = shalt.err (!%p6343_p0)
}
  0x86   :  { %58 = dma.hbm_to_vmem [thread:$0]  %s7096_s24, 64, %s56_s3, [#allocation3]  }
  0x87   :  { %s7097_s27 = sld [smem:[#allocation41_spill]] }
  0x8d   :  { %s6347_s4 = scalar_lea.hbm %s7097_s27, 16384 }
  0x8e   :  { %p6348_p1 = scmp.ne.s32.totalorder %s7097_s27, %s6347_s4  ;;  %p6351_p2 = scmp.lt.u32.totalorder %s6347_s4, %s7097_s27 }
  0x90   :  { %p6353_p3 = pnand %p6351_p2, %p6348_p1 }
  0x92   :  { %6356 = shalt.err (!%p6353_p3)
}
  0x93   :  { %s6357_s28 = scalar_lea.vmem %s79_s29, 16384  ;;  %p6362_p5 = scmp.lt.s32.totalorder %s79_s29, %s79_s29 }
  0x94   :  { %p6358_p4 = scmp.ne.s32.totalorder %s79_s29, %s6357_s28  ;;  %p6363_p6 = scmp.lt.s32.totalorder %s6357_s28, %s6357_s28 }
  0x96   :  { %p6364_p7 = por %p6363_p6, %p6362_p5 }
  0x98   :  { %p6365_p8 = pnand %p6364_p7, %p6358_p4 }
  0x9a   :  { %6368 = shalt.err (!%p6365_p8)
}
  0x9b   :  { %84 = dma.hbm_to_vmem [thread:$0]  %s7097_s27, 16384, %s79_s29, [#allocation8], %s7094_s5, %s7094_s5, %s7093_s26  }
  0x9c   :  { %s6576_s30 = smov [#allocation12]   ;;  %s6577_s25 = smov [#allocation15]  }
  0x9d   :  { %s108_s9 = sshll.u32 %s6576_s30, 4  ;;  %s136_s1 = sshll.u32 %s6577_s25, 4  ;;  %s109_s9 = int_to_ptr.vmem [resolvable:$true] %s108_s9  ;;  %s137_s1 = int_to_ptr.vmem [resolvable:$true] %s136_s1 }
  0x9e   :  { %s7098_s7 = sld [smem:[#allocation46_spill]] }
  0xa4   :  { %s6369_s4 = scalar_lea.hbm %s7098_s7, 1536 }
  0xa5   :  { %p6370_p9 = scmp.ne.s32.totalorder %s7098_s7, %s6369_s4  ;;  %p6373_p10 = scmp.lt.u32.totalorder %s6369_s4, %s7098_s7 }
  0xa7   :  { %p6375_p11 = pnand %p6373_p10, %p6370_p9 }
  0xa9   :  { %6378 = shalt.err (!%p6375_p11)
}
  0xaa   :  { %s6379_s29 = scalar_lea.vmem %s109_s9, 1536  ;;  %p6384_p13 = scmp.lt.s32.totalorder %s109_s9, %s109_s9 }
  0xab   :  { %p6380_p12 = scmp.ne.s32.totalorder %s109_s9, %s6379_s29  ;;  %p6385_p0 = scmp.lt.s32.totalorder %s6379_s29, %s6379_s29 }
  0xad   :  { %p6386_p1 = por %p6385_p0, %p6384_p13 }
  0xaf   :  { %p6387_p2 = pnand %p6386_p1, %p6380_p12 }
  0xb1   :  { %6390 = shalt.err (!%p6387_p2)
}
  0xb2   :  { %114 = dma.hbm_to_vmem [thread:$0]  %s7098_s7, 1536, %s109_s9, [#allocation11], %s7094_s5, %s7094_s5, %s7093_s26  }
  0xb3   :  { %s6391_s30 = scalar_lea.hbm %s7050_s13, 4096 }
  0xb4   :  { %p6392_p3 = scmp.ne.s32.totalorder %s7050_s13, %s6391_s30  ;;  %p6395_p4 = scmp.lt.u32.totalorder %s6391_s30, %s7050_s13 }
  0xb6   :  { %p6397_p5 = pnand %p6395_p4, %p6392_p3 }
  0xb8   :  { %6400 = shalt.err (!%p6397_p5)
}
  0xb9   :  { %s6401_s16 = scalar_lea.vmem %s137_s1, 4096  ;;  %p6406_p7 = scmp.lt.s32.totalorder %s137_s1, %s137_s1 }
  0xba   :  { %p6402_p6 = scmp.ne.s32.totalorder %s137_s1, %s6401_s16  ;;  %p6407_p8 = scmp.lt.s32.totalorder %s6401_s16, %s6401_s16 }
  0xbc   :  { %p6408_p9 = por %p6407_p8, %p6406_p7 }
  0xbe   :  { %p6409_p10 = pnand %p6408_p9, %p6402_p6 }
  0xc0   :  { %6412 = shalt.err (!%p6409_p10)
}
  0xc1   :  { %s7099_s9 = smov 4   ;;  %s7100_s7 = smov 64  }
  0xc2   :  { %142 = dma.hbm_to_vmem [thread:$0]  %s7050_s13, 4096, %s137_s1, [#allocation14], %s7100_s7, %s7100_s7, %s7099_s9  }
  0xc3   :  { %s6578_s0 = smov [#allocation18]   ;;  %s6579_s27 = smov [#allocation19]  }
  0xc4   :  { %s166_s29 = sshll.u32 %s6578_s0, 4  ;;  %s180_s28 = sshll.u32 %s6579_s27, 4  ;;  %s167_s29 = int_to_ptr.vmem [resolvable:$true] %s166_s29  ;;  %s181_s28 = int_to_ptr.vmem [resolvable:$true] %s180_s28 }
  0xc5   :  { %s6413_s30 = scalar_lea.hbm %s7055_s18, 16384 }
  0xc6   :  { %p6414_p11 = scmp.ne.s32.totalorder %s7055_s18, %s6413_s30  ;;  %p6417_p12 = scmp.lt.u32.totalorder %s6413_s30, %s7055_s18 }
  0xc8   :  { %p6419_p13 = pnand %p6417_p12, %p6414_p11 }
  0xca   :  { %6422 = shalt.err (!%p6419_p13)
}
  0xcb   :  { %s6423_s13 = scalar_lea.vmem %s167_s29, 16384  ;;  %p6428_p1 = scmp.lt.s32.totalorder %s167_s29, %s167_s29 }
  0xcc   :  { %p6424_p0 = scmp.ne.s32.totalorder %s167_s29, %s6423_s13  ;;  %p6429_p2 = scmp.lt.s32.totalorder %s6423_s13, %s6423_s13 }
  0xce   :  { %p6430_p3 = por %p6429_p2, %p6428_p1 }
  0xd0   :  { %p6431_p4 = pnand %p6430_p3, %p6424_p0 }
  0xd2   :  { %6434 = shalt.err (!%p6431_p4)
}
  0xd3   :  { %172 = dma.hbm_to_vmem [thread:$0]  %s7055_s18, 16384, %s167_s29, [#allocation17], %s7094_s5, %s7094_s5, %s7093_s26  }
  0xd4   :  { %s6435_s0 = scalar_lea.hbm %s7057_s20, 4096 }
  0xd5   :  { %p6436_p5 = scmp.ne.s32.totalorder %s7057_s20, %s6435_s0  ;;  %p6439_p6 = scmp.lt.u32.totalorder %s6435_s0, %s7057_s20 }
  0xd7   :  { %p6441_p7 = pnand %p6439_p6, %p6436_p5 }
  0xd9   :  { %6444 = shalt.err (!%p6441_p7)
}
  0xda   :  { %s6445_s25 = scalar_lea.vmem %s181_s28, 4096  ;;  %p6450_p9 = scmp.lt.s32.totalorder %s181_s28, %s181_s28 }
  0xdb   :  { %p6446_p8 = scmp.ne.s32.totalorder %s181_s28, %s6445_s25  ;;  %p6451_p10 = scmp.lt.s32.totalorder %s6445_s25, %s6445_s25 }
  0xdd   :  { %p6452_p11 = por %p6451_p10, %p6450_p9 }
  0xdf   :  { %p6453_p12 = pnand %p6452_p11, %p6446_p8 }
  0xe1   :  { %6456 = shalt.err (!%p6453_p12)
}
  0xe2   :  { %186 = dma.hbm_to_vmem [thread:$0]  %s7057_s20, 4096, %s181_s28, [#allocation20], %s7100_s7, %s7100_s7, %s7099_s9  }
  0xe3   :  { %6545 = dma.done.wait [#allocation5], 16  }
  0xe4   :  { %6546 = vsyncadd [#allocation5], 4294967280 }
  0xe5   :  { %6547 = dma.done.wait [#allocation3], 64  }
  0xe6   :  { %6548 = vsyncadd [#allocation3], 4294967232 }
  0xe7   :  { %6549 = dma.done.wait [#allocation8], 17408  }
  0xe8   :  { %6550 = vsyncadd [#allocation8], 4294949888 }
  0xe9   :  { %6551 = dma.done.wait [#allocation11], 5632  }
  0xea   :  { %6552 = vsyncadd [#allocation11], 4294961664 }
  0xeb   :  { %6553 = dma.done.wait [#allocation14], 20480  }
  0xec   :  { %6554 = vsyncadd [#allocation14], 4294946816 }
  0xed   :  { %6555 = dma.done.wait [#allocation17], 18432  }
  0xee   :  { %6556 = vsyncadd [#allocation17], 4294948864 }
  0xef   :  { %6557 = dma.done.wait [#allocation20], 4096  }
  0xf0   :  { %6558 = vsyncadd [#allocation20], 4294963200 }
  0xf1   :  { %222 = sfence }
  0xf2   :  { %v5501_v0 = vld [vmem:[#allocation7 + $0x4] ss:$16 sps:$4 sm:$0xff]   ;;  %v5503_v1 = vld [vmem:[#allocation7] ss:$16 sps:$4 sm:$0xff]   ;;  %v6580_v2 = vmov 0   ;;  %vm295_vm0 = vcmask 261120  }
  0xf3   :  { %331 = vmatprep.mubr.bf16.mxu0 %v6580_v2  ;;  %372 = vmatprep.mubr.bf16.mxu1 %v6580_v2  ;;  %v5504_v3 = vld [vmem:[#allocation7 + $0x24] ss:$16 sps:$4 sm:$0xff]   ;;  %v5506_v4 = vld [vmem:[#allocation7 + $0x20] ss:$16 sps:$4 sm:$0xff]   ;;  %v5507_v5 = vld [vmem:[#allocation7 + $0xc] ss:$16 sps:$4 sm:$0xff]  }
  0xf4   :  { %299 = vmatprep.subr.bf16.mxu0 %v5501_v0  ;;  %v5509_v6 = vld [vmem:[#allocation7 + $0x8] ss:$16 sps:$4 sm:$0xff]   ;;  %v224_v7 = vld [vmem:[#allocation6] sm:$0xf]  ;;  %340 = vmatprep.subr.bf16.mxu1 %v5507_v5  ;;  %v5515_v10 = vld [vmem:[#allocation9 + $0x4] ss:$16 sps:$4 sm:$0xff]  }
  0xf5   :  { %300 = vmatpush1.bf16.msra.mxu0 %v5503_v1  ;;  %v5510_v8 = vld [vmem:[#allocation7 + $0x2c] ss:$16 sps:$4 sm:$0xff]   ;;  %341 = vmatpush1.bf16.msra.mxu1 %v5509_v6  ;;  %v5512_v9 = vld [vmem:[#allocation7 + $0x28] ss:$16 sps:$4 sm:$0xff]   ;;  %v5513_v11 = vld [vmem:[#allocation9] ss:$16 sps:$4 sm:$0xff]  }
  0xf6   :  { %301 = vmatprep.subr.bf16.mxu0 %v5504_v3  ;;  %342 = vmatprep.subr.bf16.mxu1 %v5510_v8  ;;  %v5518_v12 = vld [vmem:[#allocation9 + $0xc] ss:$16 sps:$4 sm:$0xff]   ;;  %v5521_v13 = vld [vmem:[#allocation9 + $0x24] ss:$16 sps:$4 sm:$0xff]   ;;  %v5516_v14 = vld [vmem:[#allocation9 + $0x8] ss:$16 sps:$4 sm:$0xff]  }
  0xf7   :  { %v5519_v15 = vld [vmem:[#allocation9 + $0x20] ss:$16 sps:$4 sm:$0xff]   ;;  %v5524_v16 = vld [vmem:[#allocation9 + $0x2c] ss:$16 sps:$4 sm:$0xff]   ;;  %v5527_v17 = vld [vmem:[#allocation9 + $0x44] ss:$16 sps:$4 sm:$0xff]  }
  0xf8   :  { %v5522_v18 = vld [vmem:[#allocation9 + $0x28] ss:$16 sps:$4 sm:$0xff]   ;;  %v5525_v19 = vld [vmem:[#allocation9 + $0x40] ss:$16 sps:$4 sm:$0xff]   ;;  %v5530_v20 = vld [vmem:[#allocation9 + $0x4c] ss:$16 sps:$4 sm:$0xff]  }
  0xf9   :  { %302 = vmatpush1.bf16.msra.mxu0 %v5506_v4  ;;  %343 = vmatpush1.bf16.msra.mxu1 %v5512_v9  ;;  %v5533_v21 = vld [vmem:[#allocation9 + $0x64] ss:$16 sps:$4 sm:$0xff]   ;;  %v5528_v22 = vld [vmem:[#allocation9 + $0x48] ss:$16 sps:$4 sm:$0xff]   ;;  %v5531_v23 = vld [vmem:[#allocation9 + $0x60] ss:$16 sps:$4 sm:$0xff]  }
  0xfa   :  { %1179 = vmatprep.subr.bf16.mxu0 %v5515_v10  ;;  %1261 = vmatprep.subr.bf16.mxu1 %v5518_v12  ;;  %v5536_v24 = vld [vmem:[#allocation9 + $0x6c] ss:$16 sps:$4 sm:$0xff]   ;;  %v5539_v25 = vld [vmem:[#allocation9 + $0x84] ss:$16 sps:$4 sm:$0xff]   ;;  %v5534_v26 = vld [vmem:[#allocation9 + $0x68] ss:$16 sps:$4 sm:$0xff]  }
  0xfb   :  { %v5537_v27 = vld [vmem:[#allocation9 + $0x80] ss:$16 sps:$4 sm:$0xff]   ;;  %v5542_v28 = vld [vmem:[#allocation9 + $0x8c] ss:$16 sps:$4 sm:$0xff]   ;;  %v5545_v29 = vld [vmem:[#allocation9 + $0xa4] ss:$16 sps:$4 sm:$0xff]  }
  0xfc   :  { %4794 = vmatmul.mubr.msk.bf16.vlgmr.msra.gmra.mrb[0].mxu0 %vm295_vm0, %v224_v7  ;;  %4795 = vmatmul.mubr.msk.bf16.vlgmr.msra.gmra.mrb[0].mxu1 %vm295_vm0, %v224_v7  ;;  %v5540_v30 = vld [vmem:[#allocation9 + $0x88] ss:$16 sps:$4 sm:$0xff]   ;;  %v5543_v31 = vld [vmem:[#allocation9 + $0xa0] ss:$16 sps:$4 sm:$0xff]   ;;  %v5548_v32 = vld [vmem:[#allocation9 + $0xac] ss:$16 sps:$4 sm:$0xff]  }
  0xfd   :  { %1180 = vmatpush1.bf16.msra.mxu0 %v5513_v11  ;;  %1262 = vmatpush1.bf16.msra.mxu1 %v5516_v14  ;;  %v5551_v33 = vld [vmem:[#allocation9 + $0xc4] ss:$16 sps:$4 sm:$0xff]   ;;  %v5546_v34 = vld [vmem:[#allocation9 + $0xa8] ss:$16 sps:$4 sm:$0xff]   ;;  %v5549_v35 = vld [vmem:[#allocation9 + $0xc0] ss:$16 sps:$4 sm:$0xff]  }
  0xfe   :  { %1181 = vmatprep.subr.bf16.mxu0 %v5521_v13  ;;  %1263 = vmatprep.subr.bf16.mxu1 %v5524_v16  ;;  %v5554_v36 = vld [vmem:[#allocation9 + $0xcc] ss:$16 sps:$4 sm:$0xff]   ;;  %v5557_v37 = vld [vmem:[#allocation9 + $0xe4] ss:$16 sps:$4 sm:$0xff]   ;;  %v5552_v38 = vld [vmem:[#allocation9 + $0xc8] ss:$16 sps:$4 sm:$0xff]   ;;  %v235_v13 = vlaneseq }
  0xff   :  { %v5555_v39 = vld [vmem:[#allocation9 + $0xe0] ss:$16 sps:$4 sm:$0xff]   ;;  %v5560_v40 = vld [vmem:[#allocation9 + $0xec] ss:$16 sps:$4 sm:$0xff]   ;;  %v5563_v41 = vld [vmem:[#allocation9 + $0x104] ss:$16 sps:$4 sm:$0xff]  }
 0x100   :  { %v5558_v42 = vld [vmem:[#allocation9 + $0xe8] ss:$16 sps:$4 sm:$0xff]   ;;  %v5561_v43 = vld [vmem:[#allocation9 + $0x100] ss:$16 sps:$4 sm:$0xff]   ;;  %v5566_v44 = vld [vmem:[#allocation9 + $0x10c] ss:$16 sps:$4 sm:$0xff]  }
 0x101   :  { %1182 = vmatpush1.bf16.msra.mxu0 %v5519_v15  ;;  %1264 = vmatpush1.bf16.msra.mxu1 %v5522_v18  ;;  %v5569_v45 = vld [vmem:[#allocation9 + $0x124] ss:$16 sps:$4 sm:$0xff]   ;;  %v5564_v46 = vld [vmem:[#allocation9 + $0x108] ss:$16 sps:$4 sm:$0xff]   ;;  %v5567_v47 = vld [vmem:[#allocation9 + $0x120] ss:$16 sps:$4 sm:$0xff]  }
 0x102   :  { %1183 = vmatprep.subr.bf16.mxu0 %v5527_v17  ;;  %1265 = vmatprep.subr.bf16.mxu1 %v5530_v20  ;;  %v5572_v48 = vld [vmem:[#allocation9 + $0x12c] ss:$16 sps:$4 sm:$0xff]   ;;  %v5575_v49 = vld [vmem:[#allocation9 + $0x144] ss:$16 sps:$4 sm:$0xff]   ;;  %v5570_v50 = vld [vmem:[#allocation9 + $0x128] ss:$16 sps:$4 sm:$0xff]  }
 0x103   :  { %v5573_v51 = vld [vmem:[#allocation9 + $0x140] ss:$16 sps:$4 sm:$0xff]   ;;  %v5578_v52 = vld [vmem:[#allocation9 + $0x14c] ss:$16 sps:$4 sm:$0xff]   ;;  %v5581_v53 = vld [vmem:[#allocation9 + $0x164] ss:$16 sps:$4 sm:$0xff]  }
 0x104   :  { %v5576_v54 = vld [vmem:[#allocation9 + $0x148] ss:$16 sps:$4 sm:$0xff]   ;;  %v5579_v55 = vld [vmem:[#allocation9 + $0x160] ss:$16 sps:$4 sm:$0xff]   ;;  %v5584_v56 = vld [vmem:[#allocation9 + $0x16c] ss:$16 sps:$4 sm:$0xff]  }
 0x105   :  { %1184 = vmatpush1.bf16.msra.mxu0 %v5525_v19  ;;  %1266 = vmatpush1.bf16.msra.mxu1 %v5528_v22  ;;  %v5587_v57 = vld [vmem:[#allocation9 + $0x184] ss:$16 sps:$4 sm:$0xff]   ;;  %v5582_v58 = vld [vmem:[#allocation9 + $0x168] ss:$16 sps:$4 sm:$0xff]   ;;  %v5585_v59 = vld [vmem:[#allocation9 + $0x180] ss:$16 sps:$4 sm:$0xff]  }
 0x106   :  { %1185 = vmatprep.subr.bf16.mxu0 %v5533_v21  ;;  %1267 = vmatprep.subr.bf16.mxu1 %v5536_v24  ;;  %v5590_v60 = vld [vmem:[#allocation9 + $0x18c] ss:$16 sps:$4 sm:$0xff]   ;;  %v5593_v61 = vld [vmem:[#allocation9 + $0x1a4] ss:$16 sps:$4 sm:$0xff]   ;;  %v5588_v62 = vld [vmem:[#allocation9 + $0x188] ss:$16 sps:$4 sm:$0xff]  }
 0x107   :  { %v5591_v63 = vld [vmem:[#allocation9 + $0x1a0] ss:$16 sps:$4 sm:$0xff]   ;;  %v5596_v0 = vld [vmem:[#allocation9 + $0x1ac] ss:$16 sps:$4 sm:$0xff]   ;;  %v5594_v1 = vld [vmem:[#allocation9 + $0x1a8] ss:$16 sps:$4 sm:$0xff]  }
 0x108   :  { %v5599_v3 = vld [vmem:[#allocation9 + $0x1c4] ss:$16 sps:$4 sm:$0xff]   ;;  %v5602_v4 = vld [vmem:[#allocation9 + $0x1cc] ss:$16 sps:$4 sm:$0xff]   ;;  %v5597_v5 = vld [vmem:[#allocation9 + $0x1c0] ss:$16 sps:$4 sm:$0xff]  }
 0x109   :  { %1186 = vmatpush1.bf16.msra.mxu0 %v5531_v23  ;;  %1268 = vmatpush1.bf16.msra.mxu1 %v5534_v26  ;;  %v5600_v6 = vld [vmem:[#allocation9 + $0x1c8] ss:$16 sps:$4 sm:$0xff]   ;;  %v5605_v7 = vld [vmem:[#allocation9 + $0x1e4] ss:$16 sps:$4 sm:$0xff]   ;;  %v5608_v8 = vld [vmem:[#allocation9 + $0x1ec] ss:$16 sps:$4 sm:$0xff]  }
 0x10a   :  { %1187 = vmatprep.subr.bf16.mxu0 %v5539_v25  ;;  %1269 = vmatprep.subr.bf16.mxu1 %v5542_v28  ;;  %v5603_v9 = vld [vmem:[#allocation9 + $0x1e0] ss:$16 sps:$4 sm:$0xff]   ;;  %v5606_v10 = vld [vmem:[#allocation9 + $0x1e8] ss:$16 sps:$4 sm:$0xff]   ;;  %v5611_v11 = vld [vmem:[#allocation9 + $0x204] ss:$16 sps:$4 sm:$0xff]  }
 0x10b   :  { %v5614_v12 = vld [vmem:[#allocation9 + $0x20c] ss:$16 sps:$4 sm:$0xff]   ;;  %v6883_v14 = vshrl.u32 %v235_v13, 7  ;;  %s7101_s9 = sld [smem:[#allocation40_spill]]  ;;  %v5666_v13 = vld [vmem:[#allocation9 + $0x328] ss:$16 sps:$4 sm:$0xff]  }
 0x10c   :  { %s7102_s28 = sld [smem:[#allocation42_spill]]  ;;  %s7103_s4 = sld [smem:[#allocation45_spill]]  ;;  %vm1794_vm1 = vcmask 392192   ;;  %vm3318_vm2 = vcmask 523264  }
 0x10d   :  { %1188 = vmatpush1.bf16.msra.mxu0 %v5537_v27  ;;  %1270 = vmatpush1.bf16.msra.mxu1 %v5540_v30  ;;  %v6891_v16 = vsub.s32 0, %v6883_v14  ;;  %v6894_v17 = vsub.s32 1, %v6883_v14  ;;  %v6899_v19 = vsub.s32 3, %v6883_v14  ;;  %s7104_s16 = sld [smem:[#allocation44_spill]]  ;;  %s1696_s3 = sld [smem:[#allocation2]] }
 0x10e   :  { %1189 = vmatprep.subr.bf16.mxu0 %v5545_v29  ;;  %1271 = vmatprep.subr.bf16.mxu1 %v5548_v32  ;;  %v5612_v32 = vld [vmem:[#allocation9 + $0x208] ss:$16 sps:$4 sm:$0xff]   ;;  %s6582_s20 = smov [#allocation21]  }
 0x10f   :  { %s4730_s5 = sshll.u32 %s6582_s20, 4  ;;  %s4731_s5 = int_to_ptr.vmem [resolvable:$true] %s4730_s5 }
 0x111   :  { %1190 = vmatpush1.bf16.msra.mxu0 %v5543_v31  ;;  %1272 = vmatpush1.bf16.msra.mxu1 %v5546_v34  ;;  %v6888_v15 = vld [vmem:[%s7101_s9] sm:$0xf]  ;;  %v5609_v31 = vld [vmem:[#allocation9 + $0x200] ss:$16 sps:$4 sm:$0xff]   ;;  %v5617_v34 = vld [vmem:[#allocation9 + $0x224] ss:$16 sps:$4 sm:$0xff]  }
 0x112   :  { %1191 = vmatprep.subr.bf16.mxu0 %v5551_v33  ;;  %1273 = vmatprep.subr.bf16.mxu1 %v5554_v36  ;;  %v238_v18 = vrot.slane %v6888_v15, %v6891_v16  ;;  %v242_v20 = vrot.slane %v6888_v15, %v6894_v17  ;;  %v250_v24 = vrot.slane %v6888_v15, %v6899_v19 }
 0x115   :  { %1192 = vmatpush1.bf16.msra.mxu0 %v5549_v35  ;;  %1274 = vmatpush1.bf16.msra.mxu1 %v5552_v38  ;;  %v5620_v35 = vld [vmem:[#allocation9 + $0x22c] ss:$16 sps:$4 sm:$0xff]  }
 0x116   :  { %1193 = vmatprep.subr.bf16.mxu0 %v5557_v37  ;;  %1275 = vmatprep.subr.bf16.mxu1 %v5560_v40 }
 0x119   :  { %1194 = vmatpush1.bf16.msra.mxu0 %v5555_v39  ;;  %1276 = vmatpush1.bf16.msra.mxu1 %v5558_v42  ;;  %v5615_v42 = vld [vmem:[#allocation9 + $0x220] ss:$16 sps:$4 sm:$0xff]  }
 0x11a   :  { %1195 = vmatprep.subr.bf16.mxu0 %v5563_v41  ;;  %1277 = vmatprep.subr.bf16.mxu1 %v5566_v44  ;;  %v5623_v44 = vld [vmem:[#allocation9 + $0x244] ss:$16 sps:$4 sm:$0xff]  }
 0x11d   :  { %1196 = vmatpush1.bf16.msra.mxu0 %v5561_v43  ;;  %1278 = vmatpush1.bf16.msra.mxu1 %v5564_v46  ;;  %v5618_v43 = vld [vmem:[#allocation9 + $0x228] ss:$16 sps:$4 sm:$0xff]  }
 0x11e   :  { %1197 = vmatprep.subr.bf16.mxu0 %v5569_v45  ;;  %1279 = vmatprep.subr.bf16.mxu1 %v5572_v48  ;;  %v5626_v45 = vld [vmem:[#allocation9 + $0x24c] ss:$16 sps:$4 sm:$0xff]   ;;  %v5624_v48 = vld [vmem:[#allocation9 + $0x248] ss:$16 sps:$4 sm:$0xff]  }
 0x121   :  { %1198 = vmatpush1.bf16.msra.mxu0 %v5567_v47  ;;  %1280 = vmatpush1.bf16.msra.mxu1 %v5570_v50  ;;  %v5621_v47 = vld [vmem:[#allocation9 + $0x240] ss:$16 sps:$4 sm:$0xff]   ;;  %v5632_v50 = vld [vmem:[#allocation9 + $0x26c] ss:$16 sps:$4 sm:$0xff]  }
 0x122   :  { %1199 = vmatprep.subr.bf16.mxu0 %v5575_v49  ;;  %1281 = vmatprep.subr.bf16.mxu1 %v5578_v52  ;;  %v5629_v49 = vld [vmem:[#allocation9 + $0x264] ss:$16 sps:$4 sm:$0xff]   ;;  %v5630_v52 = vld [vmem:[#allocation9 + $0x268] ss:$16 sps:$4 sm:$0xff]  }
 0x125   :  { %1200 = vmatpush1.bf16.msra.mxu0 %v5573_v51  ;;  %1282 = vmatpush1.bf16.msra.mxu1 %v5576_v54  ;;  %v5627_v51 = vld [vmem:[#allocation9 + $0x260] ss:$16 sps:$4 sm:$0xff]   ;;  %v5638_v54 = vld [vmem:[#allocation9 + $0x28c] ss:$16 sps:$4 sm:$0xff]  }
 0x126   :  { %1201 = vmatprep.subr.bf16.mxu0 %v5581_v53  ;;  %1283 = vmatprep.subr.bf16.mxu1 %v5584_v56  ;;  %v5635_v53 = vld [vmem:[#allocation9 + $0x284] ss:$16 sps:$4 sm:$0xff]   ;;  %v5636_v56 = vld [vmem:[#allocation9 + $0x288] ss:$16 sps:$4 sm:$0xff]  }
 0x129   :  { %1202 = vmatpush1.bf16.msra.mxu0 %v5579_v55  ;;  %1284 = vmatpush1.bf16.msra.mxu1 %v5582_v58  ;;  %v5633_v55 = vld [vmem:[#allocation9 + $0x280] ss:$16 sps:$4 sm:$0xff]   ;;  %v5644_v58 = vld [vmem:[#allocation9 + $0x2ac] ss:$16 sps:$4 sm:$0xff]  }
 0x12a   :  { %1203 = vmatprep.subr.bf16.mxu0 %v5587_v57  ;;  %1285 = vmatprep.subr.bf16.mxu1 %v5590_v60  ;;  %v5641_v57 = vld [vmem:[#allocation9 + $0x2a4] ss:$16 sps:$4 sm:$0xff]   ;;  %v5642_v60 = vld [vmem:[#allocation9 + $0x2a8] ss:$16 sps:$4 sm:$0xff]  }
 0x12d   :  { %1204 = vmatpush1.bf16.msra.mxu0 %v5585_v59  ;;  %1286 = vmatpush1.bf16.msra.mxu1 %v5588_v62  ;;  %v5639_v59 = vld [vmem:[#allocation9 + $0x2a0] ss:$16 sps:$4 sm:$0xff]   ;;  %v5650_v62 = vld [vmem:[#allocation9 + $0x2cc] ss:$16 sps:$4 sm:$0xff]  }
 0x12e   :  { %1205 = vmatprep.subr.bf16.mxu0 %v5593_v61  ;;  %1287 = vmatprep.subr.bf16.mxu1 %v5596_v0  ;;  %v5647_v61 = vld [vmem:[#allocation9 + $0x2c4] ss:$16 sps:$4 sm:$0xff]   ;;  %v5648_v0 = vld [vmem:[#allocation9 + $0x2c8] ss:$16 sps:$4 sm:$0xff]  }
 0x131   :  { %1206 = vmatpush1.bf16.msra.mxu0 %v5591_v63  ;;  %1288 = vmatpush1.bf16.msra.mxu1 %v5594_v1  ;;  %v5645_v63 = vld [vmem:[#allocation9 + $0x2c0] ss:$16 sps:$4 sm:$0xff]   ;;  %v5653_v1 = vld [vmem:[#allocation9 + $0x2e4] ss:$16 sps:$4 sm:$0xff]  }
 0x132   :  { %1207 = vmatprep.subr.bf16.mxu0 %v5599_v3  ;;  %1289 = vmatprep.subr.bf16.mxu1 %v5602_v4  ;;  %v5656_v3 = vld [vmem:[#allocation9 + $0x2ec] ss:$16 sps:$4 sm:$0xff]   ;;  %v5651_v4 = vld [vmem:[#allocation9 + $0x2e0] ss:$16 sps:$4 sm:$0xff]  }
 0x135   :  { %1208 = vmatpush1.bf16.msra.mxu0 %v5597_v5  ;;  %1290 = vmatpush1.bf16.msra.mxu1 %v5600_v6  ;;  %v5654_v5 = vld [vmem:[#allocation9 + $0x2e8] ss:$16 sps:$4 sm:$0xff]   ;;  %v5659_v6 = vld [vmem:[#allocation9 + $0x304] ss:$16 sps:$4 sm:$0xff]  }
 0x136   :  { %1209 = vmatprep.subr.bf16.mxu0 %v5605_v7  ;;  %1291 = vmatprep.subr.bf16.mxu1 %v5608_v8  ;;  %v5662_v7 = vld [vmem:[#allocation9 + $0x30c] ss:$16 sps:$4 sm:$0xff]   ;;  %v5657_v8 = vld [vmem:[#allocation9 + $0x300] ss:$16 sps:$4 sm:$0xff]  }
 0x139   :  { %1210 = vmatpush1.bf16.msra.mxu0 %v5603_v9  ;;  %1292 = vmatpush1.bf16.msra.mxu1 %v5606_v10  ;;  %v5660_v9 = vld [vmem:[#allocation9 + $0x308] ss:$16 sps:$4 sm:$0xff]   ;;  %v5665_v10 = vld [vmem:[#allocation9 + $0x324] ss:$16 sps:$4 sm:$0xff]  }
 0x13a   :  { %1220 = vmatprep.subr.bf16.mxu0 %v5611_v11  ;;  %1302 = vmatprep.subr.bf16.mxu1 %v5614_v12  ;;  %v5668_v11 = vld [vmem:[#allocation9 + $0x32c] ss:$16 sps:$4 sm:$0xff]   ;;  %v5663_v12 = vld [vmem:[#allocation9 + $0x320] ss:$16 sps:$4 sm:$0xff]  }
 0x1cf   :  { %v333_v21 = vpop.f32.mrb[0].mxu0  ;;  %v6905_v29 = vpop.f32.mrb[0].mxu1 }
 0x1d0   :  { %v334_v22 = vadd.f32 %v333_v21, %v238_v18  ;;  %v335_v23 = vpop.f32.mrb[1].mxu0  ;;  %v376_v33 = vpop.f32.mrb[1].mxu1  ;;  %v5671_v18 = vld [vmem:[#allocation9 + $0x344] ss:$16 sps:$4 sm:$0xff]   ;;  %v5669_v21 = vld [vmem:[#allocation9 + $0x340] ss:$16 sps:$4 sm:$0xff]  }
 0x1d1   :  { %v336_v25 = vadd.f32 %v335_v23, %v242_v20  ;;  %v337_v26 = vpop.f32.mrb[2].mxu0  ;;  %v377_v36 = vadd.f32 %v376_v33, %v250_v24  ;;  %v378_v37 = vpop.f32.mrb[2].mxu1  ;;  %v5674_v20 = vld [vmem:[#allocation9 + $0x34c] ss:$16 sps:$4 sm:$0xff]   ;;  %v5677_v23 = vld [vmem:[#allocation9 + $0x364] ss:$16 sps:$4 sm:$0xff]  }
 0x1d2   :  { %v381_v27 = vmax.f32 %v334_v22, 0.0  ;;  %v338_v28 = vpop.f32.mrb[3].mxu0  ;;  %v379_v39 = vpop.f32.mrb[3].mxu1  ;;  %v5672_v22 = vld [vmem:[#allocation9 + $0x348] ss:$16 sps:$4 sm:$0xff]  }
 0x1d3   :  { %v382_v30 = vmax.f32 %v336_v25, 0.0  ;;  %v384_v41 = vmax.f32 %v377_v36, 0.0  ;;  %v5680_v24 = vld [vmem:[#allocation9 + $0x36c] ss:$16 sps:$4 sm:$0xff]   ;;  %v5675_v25 = vld [vmem:[#allocation9 + $0x360] ss:$16 sps:$4 sm:$0xff]  }
 0x1d4   :  { %v385_v40 = vpack.c.bf16 %v381_v27, %v381_v27  ;;  %v5678_v26 = vld [vmem:[#allocation9 + $0x368] ss:$16 sps:$4 sm:$0xff]   ;;  %v5683_v27 = vld [vmem:[#allocation9 + $0x384] ss:$16 sps:$4 sm:$0xff]   ;;  %v5686_v28 = vld [vmem:[#allocation9 + $0x38c] ss:$16 sps:$4 sm:$0xff]  }
 0x1d5   :  { %v386_v38 = vpack.c.bf16 %v382_v30, %v382_v30  ;;  %v388_v46 = vpack.c.bf16 %v384_v41, %v384_v41  ;;  %v5681_v30 = vld [vmem:[#allocation9 + $0x380] ss:$16 sps:$4 sm:$0xff]   ;;  %v5689_v33 = vld [vmem:[#allocation9 + $0x3a4] ss:$16 sps:$4 sm:$0xff]   ;;  %v5690_v36 = vld [vmem:[#allocation9 + $0x3a8] ss:$16 sps:$4 sm:$0xff]  }
 0x1d6   :  { %v5698_v39 = vld [vmem:[#allocation9 + $0x3cc] ss:$16 sps:$4 sm:$0xff]   ;;  %v5696_v41 = vld [vmem:[#allocation9 + $0x3c8] ss:$16 sps:$4 sm:$0xff]  }
 0x1d7   :  { %1211 = vmatprep.mubr.bf16.mxu0 %v386_v38  ;;  %1293 = vmatprep.mubr.bf16.mxu1 %v386_v38  ;;  %v5695_v38 = vld [vmem:[#allocation9 + $0x3c4] ss:$16 sps:$4 sm:$0xff]  }
 0x1d8   :  { %1212 = vmatmul.mubr.bf16.vlgmr.msra.gmra.mrb[4].mxu0 %v385_v40  ;;  %1294 = vmatmul.mubr.bf16.vlgmr.msra.gmra.mrb[4].mxu1 %v385_v40  ;;  %v5693_v40 = vld [vmem:[#allocation9 + $0x3c0] ss:$16 sps:$4 sm:$0xff]  }
 0x1d9   :  { %1221 = vmatpush1.bf16.msra.mxu0 %v5609_v31  ;;  %1303 = vmatpush1.bf16.msra.mxu1 %v5612_v32  ;;  %v5684_v31 = vld [vmem:[#allocation9 + $0x388] ss:$16 sps:$4 sm:$0xff]   ;;  %v6908_v32 = vsub.s32 2, %v6883_v14 }
 0x1da   :  { %1222 = vmatprep.subr.bf16.mxu0 %v5617_v34  ;;  %1304 = vmatprep.subr.bf16.mxu1 %v5620_v35  ;;  %v5692_v34 = vld [vmem:[#allocation9 + $0x3ac] ss:$16 sps:$4 sm:$0xff]   ;;  %v5687_v35 = vld [vmem:[#allocation9 + $0x3a0] ss:$16 sps:$4 sm:$0xff]  }
 0x1db   :  { %1252 = vmatprep.mubr.bf16.mxu0 %v388_v46  ;;  %1334 = vmatprep.mubr.bf16.mxu1 %v388_v46  ;;  %v246_v37 = vrot.slane %v6888_v15, %v6908_v32  ;;  %v5705_v15 = vld [vmem:[#allocation10 + $0x40] sm:$0xff]  }
 0x1dd   :  { %1223 = vmatpush1.bf16.msra.mxu0 %v5615_v42  ;;  %1305 = vmatpush1.bf16.msra.mxu1 %v5618_v43  ;;  %v375_v14 = vadd.f32 %v6905_v29, %v246_v37  ;;  %v5701_v42 = vld [vmem:[#allocation9 + $0x3e4] ss:$16 sps:$4 sm:$0xff]   ;;  %v5704_v43 = vld [vmem:[#allocation9 + $0x3ec] ss:$16 sps:$4 sm:$0xff]  }
 0x1de   :  { %1224 = vmatprep.subr.bf16.mxu0 %v5623_v44  ;;  %1306 = vmatprep.subr.bf16.mxu1 %v5626_v45  ;;  %v5699_v44 = vld [vmem:[#allocation9 + $0x3e0] ss:$16 sps:$4 sm:$0xff]   ;;  %v5702_v45 = vld [vmem:[#allocation9 + $0x3e8] ss:$16 sps:$4 sm:$0xff]  }
 0x1df   :  { %v383_v46 = vmax.f32 %v375_v14, 0.0  ;;  %v5709_v29 = vld [vmem:[#allocation10 + $0x48] sm:$0xff]  }
 0x1e1   :  { %1225 = vmatpush1.bf16.msra.mxu0 %v5621_v47  ;;  %1307 = vmatpush1.bf16.msra.mxu1 %v5624_v48  ;;  %v5707_v47 = vld [vmem:[#allocation10 + $0xc0] sm:$0xff]  }
 0x1e2   :  { %1226 = vmatprep.subr.bf16.mxu0 %v5629_v49  ;;  %1308 = vmatprep.subr.bf16.mxu1 %v5632_v50  ;;  %v5706_v48 = vld [vmem:[#allocation10] sm:$0xff]   ;;  %v387_v50 = vpack.c.bf16 %v383_v46, %v383_v46 }
 0x1e3   :  { %v5708_v49 = vld [vmem:[#allocation10 + $0x80] sm:$0xff]  }
 0x1e4   :  { %v5737_v46 = vld [vmem:[#allocation12] ss:$16 sps:$4 sm:$0xff]  }
 0x1e5   :  { %1227 = vmatpush1.bf16.msra.mxu0 %v5627_v51  ;;  %1309 = vmatpush1.bf16.msra.mxu1 %v5630_v52  ;;  %v5711_v51 = vld [vmem:[#allocation10 + $0xc8] sm:$0xff]  }
 0x1e6   :  { %1228 = vmatprep.subr.bf16.mxu0 %v5635_v53  ;;  %1310 = vmatprep.subr.bf16.mxu1 %v5638_v54  ;;  %v5710_v52 = vld [vmem:[#allocation10 + $0x8] sm:$0xff]   ;;  %v5713_v54 = vld [vmem:[#allocation10 + $0x50] sm:$0xff]  }
 0x1e7   :  { %v5712_v53 = vld [vmem:[#allocation10 + $0x88] sm:$0xff]  }
 0x1e9   :  { %1229 = vmatpush1.bf16.msra.mxu0 %v5633_v55  ;;  %1311 = vmatpush1.bf16.msra.mxu1 %v5636_v56  ;;  %v5715_v55 = vld [vmem:[#allocation10 + $0xd0] sm:$0xff]  }
 0x1ea   :  { %1230 = vmatprep.subr.bf16.mxu0 %v5641_v57  ;;  %1312 = vmatprep.subr.bf16.mxu1 %v5644_v58  ;;  %v5714_v56 = vld [vmem:[#allocation10 + $0x10] sm:$0xff]   ;;  %v5717_v58 = vld [vmem:[#allocation10 + $0x58] sm:$0xff]  }
 0x1eb   :  { %v5716_v57 = vld [vmem:[#allocation10 + $0x90] sm:$0xff]  }
 0x1ed   :  { %1231 = vmatpush1.bf16.msra.mxu0 %v5639_v59  ;;  %1313 = vmatpush1.bf16.msra.mxu1 %v5642_v60  ;;  %v5719_v59 = vld [vmem:[#allocation10 + $0xd8] sm:$0xff]  }
 0x1ee   :  { %1232 = vmatprep.subr.bf16.mxu0 %v5647_v61  ;;  %1314 = vmatprep.subr.bf16.mxu1 %v5650_v62  ;;  %v5718_v60 = vld [vmem:[#allocation10 + $0x18] sm:$0xff]   ;;  %v5721_v62 = vld [vmem:[#allocation10 + $0x60] sm:$0xff]  }
 0x1ef   :  { %v5720_v61 = vld [vmem:[#allocation10 + $0x98] sm:$0xff]  }
 0x1f1   :  { %1233 = vmatpush1.bf16.msra.mxu0 %v5645_v63  ;;  %1315 = vmatpush1.bf16.msra.mxu1 %v5648_v0  ;;  %v5723_v63 = vld [vmem:[#allocation10 + $0xe0] sm:$0xff]  }
 0x1f2   :  { %1234 = vmatprep.subr.bf16.mxu0 %v5653_v1  ;;  %1316 = vmatprep.subr.bf16.mxu1 %v5656_v3  ;;  %v5722_v0 = vld [vmem:[#allocation10 + $0x20] sm:$0xff]   ;;  %v5725_v3 = vld [vmem:[#allocation10 + $0x68] sm:$0xff]  }
 0x1f3   :  { %v5724_v1 = vld [vmem:[#allocation10 + $0xa0] sm:$0xff]  }
 0x1f5   :  { %1235 = vmatpush1.bf16.msra.mxu0 %v5651_v4  ;;  %1317 = vmatpush1.bf16.msra.mxu1 %v5654_v5  ;;  %v5727_v4 = vld [vmem:[#allocation10 + $0xe8] sm:$0xff]  }
 0x1f6   :  { %1236 = vmatprep.subr.bf16.mxu0 %v5659_v6  ;;  %1318 = vmatprep.subr.bf16.mxu1 %v5662_v7  ;;  %v5726_v5 = vld [vmem:[#allocation10 + $0x28] sm:$0xff]   ;;  %v5729_v7 = vld [vmem:[#allocation10 + $0x70] sm:$0xff]  }
 0x1f7   :  { %v5728_v6 = vld [vmem:[#allocation10 + $0xa8] sm:$0xff]  }
 0x1f9   :  { %1237 = vmatpush1.bf16.msra.mxu0 %v5657_v8  ;;  %1319 = vmatpush1.bf16.msra.mxu1 %v5660_v9  ;;  %v5730_v8 = vld [vmem:[#allocation10 + $0x30] sm:$0xff]  }
 0x1fa   :  { %1238 = vmatprep.subr.bf16.mxu0 %v5665_v10  ;;  %1320 = vmatprep.subr.bf16.mxu1 %v5668_v11  ;;  %v5731_v9 = vld [vmem:[#allocation10 + $0xf0] sm:$0xff]   ;;  %v5733_v11 = vld [vmem:[#allocation10 + $0x78] sm:$0xff]  }
 0x1fb   :  { %v5732_v10 = vld [vmem:[#allocation10 + $0xb0] sm:$0xff]  }
 0x1fd   :  { %1239 = vmatpush1.bf16.msra.mxu0 %v5663_v12  ;;  %1321 = vmatpush1.bf16.msra.mxu1 %v5666_v13  ;;  %v5734_v12 = vld [vmem:[#allocation10 + $0x38] sm:$0xff]  }
 0x1fe   :  { %1240 = vmatprep.subr.bf16.mxu0 %v5671_v18  ;;  %1322 = vmatprep.subr.bf16.mxu1 %v5674_v20  ;;  %v5735_v13 = vld [vmem:[#allocation10 + $0xf8] sm:$0xff]   ;;  %v5739_v20 = vld [vmem:[#allocation12 + $0x4] ss:$16 sps:$4 sm:$0xff]  }
 0x1ff   :  { %v5736_v18 = vld [vmem:[#allocation10 + $0xb8] sm:$0xff]  }
 0x201   :  { %1241 = vmatpush1.bf16.msra.mxu0 %v5669_v21  ;;  %1323 = vmatpush1.bf16.msra.mxu1 %v5672_v22  ;;  %v5748_v21 = vld [vmem:[#allocation12 + $0xc] ss:$16 sps:$4 sm:$0xff]  }
 0x202   :  { %1242 = vmatprep.subr.bf16.mxu0 %v5677_v23  ;;  %1324 = vmatprep.subr.bf16.mxu1 %v5680_v24  ;;  %v517_v22 = vld [vmem:[%s7102_s28] sm:$0xf] }
 0x203   :  { %v522_v23 = vrot.slane %v517_v22, %v6891_v16  ;;  %v530_v24 = vrot.slane %v517_v22, %v6908_v32 }
 0x205   :  { %1243 = vmatpush1.bf16.msra.mxu0 %v5675_v25  ;;  %1325 = vmatpush1.bf16.msra.mxu1 %v5678_v26  ;;  %v526_v25 = vrot.slane %v517_v22, %v6894_v17  ;;  %v534_v26 = vrot.slane %v517_v22, %v6899_v19  ;;  %v5788_v22 = vld [vmem:[#allocation13 + $0xa8] ss:$16 sps:$4 sm:$0xff]  }
 0x206   :  { %1244 = vmatprep.subr.bf16.mxu0 %v5683_v27  ;;  %1326 = vmatprep.subr.bf16.mxu1 %v5686_v28 }
 0x209   :  { %1245 = vmatpush1.bf16.msra.mxu0 %v5681_v30  ;;  %1327 = vmatpush1.bf16.msra.mxu1 %v5684_v31 }
 0x20a   :  { %1246 = vmatprep.subr.bf16.mxu0 %v5689_v33  ;;  %1328 = vmatprep.subr.bf16.mxu1 %v5692_v34 }
 0x20d   :  { %1247 = vmatpush1.bf16.msra.mxu0 %v5687_v35  ;;  %1329 = vmatpush1.bf16.msra.mxu1 %v5690_v36 }
 0x20e   :  { %1248 = vmatprep.subr.bf16.mxu0 %v5695_v38  ;;  %1330 = vmatprep.subr.bf16.mxu1 %v5698_v39 }
 0x211   :  { %1249 = vmatpush1.bf16.msra.mxu0 %v5693_v40  ;;  %1331 = vmatpush1.bf16.msra.mxu1 %v5696_v41 }
 0x212   :  { %1250 = vmatprep.subr.bf16.mxu0 %v5701_v42  ;;  %1332 = vmatprep.subr.bf16.mxu1 %v5704_v43 }
 0x215   :  { %1251 = vmatpush1.bf16.msra.mxu0 %v5699_v44  ;;  %1333 = vmatpush1.bf16.msra.mxu1 %v5702_v45 }
 0x216   :  { %5313 = vmatprep.subr.bf16.mxu0 %v5705_v15  ;;  %5335 = vmatprep.subr.bf16.mxu1 %v5707_v47 }
 0x218   :  { %1253 = vmatmul.mubr.bf16.vlgmr.msra.gmra.mrb[4].mxu0 %v387_v50  ;;  %1335 = vmatmul.mubr.bf16.vlgmr.msra.gmra.mrb[4].mxu1 %v387_v50  ;;  %v5751_v50 = vld [vmem:[#allocation12 + $0x2c] ss:$16 sps:$4 sm:$0xff]  }
 0x219   :  { %5314 = vmatpush3.bf16.msra.mxu0 %v5706_v48  ;;  %5336 = vmatpush3.bf16.msra.mxu1 %v5708_v49  ;;  %v5742_v48 = vld [vmem:[#allocation12 + $0x24] ss:$16 sps:$4 sm:$0xff]   ;;  %v5746_v49 = vld [vmem:[#allocation12 + $0x8] ss:$16 sps:$4 sm:$0xff]  }
 0x21a   :  { %5315 = vmatprep.subr.bf16.mxu0 %v5709_v29  ;;  %5337 = vmatprep.subr.bf16.mxu1 %v5711_v51  ;;  %v5740_v29 = vld [vmem:[#allocation12 + $0x20] ss:$16 sps:$4 sm:$0xff]   ;;  %v5745_v51 = vld [vmem:[#allocation12 + $0x44] ss:$16 sps:$4 sm:$0xff]  }
 0x21d   :  { %5316 = vmatpush3.bf16.msra.mxu0 %v5710_v52  ;;  %5338 = vmatpush3.bf16.msra.mxu1 %v5712_v53  ;;  %v5749_v52 = vld [vmem:[#allocation12 + $0x28] ss:$16 sps:$4 sm:$0xff]   ;;  %v5754_v53 = vld [vmem:[#allocation12 + $0x4c] ss:$16 sps:$4 sm:$0xff]  }
 0x21e   :  { %5317 = vmatprep.subr.bf16.mxu0 %v5713_v54  ;;  %5339 = vmatprep.subr.bf16.mxu1 %v5715_v55  ;;  %v5743_v54 = vld [vmem:[#allocation12 + $0x40] ss:$16 sps:$4 sm:$0xff]   ;;  %v5752_v55 = vld [vmem:[#allocation12 + $0x48] ss:$16 sps:$4 sm:$0xff]  }
 0x221   :  { %5318 = vmatpush3.bf16.msra.mxu0 %v5714_v56  ;;  %5340 = vmatpush3.bf16.msra.mxu1 %v5716_v57  ;;  %v5757_v56 = vld [vmem:[#allocation13 + $0x4] ss:$16 sps:$4 sm:$0xff]   ;;  %v5760_v57 = vld [vmem:[#allocation13 + $0xc] ss:$16 sps:$4 sm:$0xff]  }
 0x222   :  { %5319 = vmatprep.subr.bf16.mxu0 %v5717_v58  ;;  %5341 = vmatprep.subr.bf16.mxu1 %v5719_v59  ;;  %v1699_v58 = vld [vmem:[%s7103_s4] sm:$0xf]  ;;  %v5755_v59 = vld [vmem:[#allocation13] ss:$16 sps:$4 sm:$0xff]  }
 0x225   :  { %5320 = vmatpush3.bf16.msra.mxu0 %v5718_v60  ;;  %5342 = vmatpush3.bf16.msra.mxu1 %v5720_v61  ;;  %v5758_v60 = vld [vmem:[#allocation13 + $0x8] ss:$16 sps:$4 sm:$0xff]   ;;  %v5763_v61 = vld [vmem:[#allocation13 + $0x24] ss:$16 sps:$4 sm:$0xff]  }
 0x226   :  { %5321 = vmatprep.subr.bf16.mxu0 %v5721_v62  ;;  %5343 = vmatprep.subr.bf16.mxu1 %v5723_v63  ;;  %v5766_v62 = vld [vmem:[#allocation13 + $0x2c] ss:$16 sps:$4 sm:$0xff]   ;;  %v5761_v63 = vld [vmem:[#allocation13 + $0x20] ss:$16 sps:$4 sm:$0xff]  }
 0x229   :  { %5322 = vmatpush3.bf16.msra.mxu0 %v5722_v0  ;;  %5344 = vmatpush3.bf16.msra.mxu1 %v5724_v1  ;;  %v5764_v0 = vld [vmem:[#allocation13 + $0x28] ss:$16 sps:$4 sm:$0xff]   ;;  %v5769_v1 = vld [vmem:[#allocation13 + $0x44] ss:$16 sps:$4 sm:$0xff]  }
 0x22a   :  { %5323 = vmatprep.subr.bf16.mxu0 %v5725_v3  ;;  %5345 = vmatprep.subr.bf16.mxu1 %v5727_v4  ;;  %v5772_v3 = vld [vmem:[#allocation13 + $0x4c] ss:$16 sps:$4 sm:$0xff]   ;;  %v5767_v4 = vld [vmem:[#allocation13 + $0x40] ss:$16 sps:$4 sm:$0xff]  }
 0x22d   :  { %5324 = vmatpush3.bf16.msra.mxu0 %v5726_v5  ;;  %5346 = vmatpush3.bf16.msra.mxu1 %v5728_v6  ;;  %v5770_v5 = vld [vmem:[#allocation13 + $0x48] ss:$16 sps:$4 sm:$0xff]   ;;  %v5775_v6 = vld [vmem:[#allocation13 + $0x64] ss:$16 sps:$4 sm:$0xff]  }
 0x22e   :  { %5325 = vmatprep.subr.bf16.mxu0 %v5729_v7  ;;  %5347 = vmatprep.subr.bf16.mxu1 %v5731_v9  ;;  %v5778_v7 = vld [vmem:[#allocation13 + $0x6c] ss:$16 sps:$4 sm:$0xff]   ;;  %v5776_v9 = vld [vmem:[#allocation13 + $0x68] ss:$16 sps:$4 sm:$0xff]  }
 0x231   :  { %5326 = vmatpush3.bf16.msra.mxu0 %v5730_v8  ;;  %5348 = vmatpush3.bf16.msra.mxu1 %v5732_v10  ;;  %v5773_v8 = vld [vmem:[#allocation13 + $0x60] ss:$16 sps:$4 sm:$0xff]   ;;  %v5781_v10 = vld [vmem:[#allocation13 + $0x84] ss:$16 sps:$4 sm:$0xff]  }
 0x232   :  { %5327 = vmatprep.subr.bf16.mxu0 %v5733_v11  ;;  %5349 = vmatprep.subr.bf16.mxu1 %v5735_v13  ;;  %v5784_v11 = vld [vmem:[#allocation13 + $0x8c] ss:$16 sps:$4 sm:$0xff]   ;;  %v5782_v13 = vld [vmem:[#allocation13 + $0x88] ss:$16 sps:$4 sm:$0xff]  }
 0x235   :  { %5328 = vmatpush3.bf16.msra.mxu0 %v5734_v12  ;;  %5350 = vmatpush3.bf16.msra.mxu1 %v5736_v18  ;;  %v5779_v12 = vld [vmem:[#allocation13 + $0x80] ss:$16 sps:$4 sm:$0xff]   ;;  %v5787_v18 = vld [vmem:[#allocation13 + $0xa4] ss:$16 sps:$4 sm:$0xff]  }
 0x236   :  { %1798 = vmatprep.subr.bf16.mxu0 %v5739_v20  ;;  %1839 = vmatprep.subr.bf16.mxu1 %v5748_v21  ;;  %v5790_v20 = vld [vmem:[#allocation13 + $0xac] ss:$16 sps:$4 sm:$0xff]   ;;  %v5785_v21 = vld [vmem:[#allocation13 + $0xa0] ss:$16 sps:$4 sm:$0xff]  }
 0x2eb   :  { %v1254_v27 = vpop.f32.mrb[4].mxu0  ;;  %v1336_v28 = vpop.f32.mrb[4].mxu1 }
 0x2ec   :  { %v5445_v30 = vadd.f32 %v1254_v27, %v522_v23  ;;  %v5447_v31 = vadd.f32 %v1336_v28, %v530_v24  ;;  %v1256_v33 = vpop.f32.mrb[5].mxu0  ;;  %v1338_v34 = vpop.f32.mrb[5].mxu1  ;;  %v5793_v23 = vld [vmem:[#allocation13 + $0xc4] ss:$16 sps:$4 sm:$0xff]   ;;  %v5796_v24 = vld [vmem:[#allocation13 + $0xcc] ss:$16 sps:$4 sm:$0xff]  }
 0x2ed   :  { %v5446_v35 = vadd.f32 %v1256_v33, %v526_v25  ;;  %v5448_v36 = vadd.f32 %v1338_v34, %v534_v26  ;;  %v1258_v37 = vpop.f32.mrb[6].mxu0  ;;  %v1340_v38 = vpop.f32.mrb[6].mxu1  ;;  %v5791_v25 = vld [vmem:[#allocation13 + $0xc0] ss:$16 sps:$4 sm:$0xff]   ;;  %v5794_v26 = vld [vmem:[#allocation13 + $0xc8] ss:$16 sps:$4 sm:$0xff]  }
 0x2ee   :  { %v1343_v39 = vmax.f32 %v5445_v30, 0.0  ;;  %v1345_v40 = vmax.f32 %v5447_v31, 0.0  ;;  %v1259_v41 = vpop.f32.mrb[7].mxu0  ;;  %v1341_v14 = vpop.f32.mrb[7].mxu1  ;;  %v5799_v27 = vld [vmem:[#allocation13 + $0xe4] ss:$16 sps:$4 sm:$0xff]  }
 0x2ef   :  { %v1344_v42 = vmax.f32 %v5446_v35, 0.0  ;;  %v1346_v43 = vmax.f32 %v5448_v36, 0.0  ;;  %v5802_v28 = vld [vmem:[#allocation13 + $0xec] ss:$16 sps:$4 sm:$0xff]   ;;  %v5797_v30 = vld [vmem:[#allocation13 + $0xe0] ss:$16 sps:$4 sm:$0xff]  }
 0x2f0   :  { %v1347_v15 = vpack.c.bf16 %v1343_v39, %v1343_v39  ;;  %v1349_v47 = vpack.c.bf16 %v1345_v40, %v1345_v40  ;;  %v5800_v31 = vld [vmem:[#allocation13 + $0xe8] ss:$16 sps:$4 sm:$0xff]   ;;  %v5805_v33 = vld [vmem:[#allocation13 + $0x104] ss:$16 sps:$4 sm:$0xff]   ;;  %v5808_v34 = vld [vmem:[#allocation13 + $0x10c] ss:$16 sps:$4 sm:$0xff]  }
 0x2f1   :  { %v1348_v44 = vpack.c.bf16 %v1344_v42, %v1344_v42  ;;  %v1350_v45 = vpack.c.bf16 %v1346_v43, %v1346_v43  ;;  %v5803_v35 = vld [vmem:[#allocation13 + $0x100] ss:$16 sps:$4 sm:$0xff]   ;;  %v5806_v36 = vld [vmem:[#allocation13 + $0x108] ss:$16 sps:$4 sm:$0xff]   ;;  %v5811_v37 = vld [vmem:[#allocation13 + $0x124] ss:$16 sps:$4 sm:$0xff]  }
 0x2f2   :  { %v5814_v38 = vld [vmem:[#allocation13 + $0x12c] ss:$16 sps:$4 sm:$0xff]   ;;  %v5809_v39 = vld [vmem:[#allocation13 + $0x120] ss:$16 sps:$4 sm:$0xff]   ;;  %v5812_v40 = vld [vmem:[#allocation13 + $0x128] ss:$16 sps:$4 sm:$0xff]  }
 0x2f3   :  { %1646 = vmatprep.mubr.bf16.mxu0 %v1348_v44  ;;  %1686 = vmatprep.mubr.bf16.mxu1 %v1350_v45  ;;  %v5817_v41 = vld [vmem:[#allocation13 + $0x144] ss:$16 sps:$4 sm:$0xff]   ;;  %v5820_v14 = vld [vmem:[#allocation13 + $0x14c] ss:$16 sps:$4 sm:$0xff]   ;;  %v5815_v42 = vld [vmem:[#allocation13 + $0x140] ss:$16 sps:$4 sm:$0xff]  }
 0x2f4   :  { %1647 = vmatmul.mubr.bf16.vlgmr.msra.gmra.mrb[8].mxu0 %v1347_v15  ;;  %1687 = vmatmul.mubr.bf16.vlgmr.msra.gmra.mrb[8].mxu1 %v1349_v47  ;;  %v5818_v43 = vld [vmem:[#allocation13 + $0x148] ss:$16 sps:$4 sm:$0xff]   ;;  %v5823_v44 = vld [vmem:[#allocation13 + $0x164] ss:$16 sps:$4 sm:$0xff]   ;;  %v5826_v45 = vld [vmem:[#allocation13 + $0x16c] ss:$16 sps:$4 sm:$0xff]  }
 0x2f5   :  { %1799 = vmatpush1.bf16.msra.mxu0 %v5737_v46  ;;  %1830 = vmatprep.mubr.bf16.mxu0 %v6580_v2  ;;  %v5821_v46 = vld [vmem:[#allocation13 + $0x160] ss:$16 sps:$4 sm:$0xff]   ;;  %v5824_v15 = vld [vmem:[#allocation13 + $0x168] ss:$16 sps:$4 sm:$0xff]   ;;  %v5829_v47 = vld [vmem:[#allocation13 + $0x184] ss:$16 sps:$4 sm:$0xff]  }
 0x2f6   :  { %1800 = vmatprep.subr.bf16.mxu0 %v5742_v48  ;;  %1840 = vmatpush1.bf16.msra.mxu1 %v5746_v49  ;;  %v5832_v48 = vld [vmem:[#allocation13 + $0x18c] ss:$16 sps:$4 sm:$0xff]   ;;  %v5827_v49 = vld [vmem:[#allocation13 + $0x180] ss:$16 sps:$4 sm:$0xff]  }
 0x2f7   :  { %1841 = vmatprep.subr.bf16.mxu1 %v5751_v50  ;;  %1871 = vmatprep.mubr.bf16.mxu1 %v6580_v2  ;;  %v5830_v50 = vld [vmem:[#allocation13 + $0x188] ss:$16 sps:$4 sm:$0xff]  }
 0x2f9   :  { %1801 = vmatpush1.bf16.msra.mxu0 %v5740_v29  ;;  %v5833_v29 = vld [vmem:[#allocation13 + $0x1a0] ss:$16 sps:$4 sm:$0xff]  }
 0x2fa   :  { %1802 = vmatprep.subr.bf16.mxu0 %v5745_v51  ;;  %1842 = vmatpush1.bf16.msra.mxu1 %v5749_v52  ;;  %v5835_v51 = vld [vmem:[#allocation13 + $0x1a4] ss:$16 sps:$4 sm:$0xff]   ;;  %v5836_v52 = vld [vmem:[#allocation13 + $0x1a8] ss:$16 sps:$4 sm:$0xff]  }
 0x2fb   :  { %1843 = vmatprep.subr.bf16.mxu1 %v5754_v53  ;;  %v5838_v53 = vld [vmem:[#allocation13 + $0x1ac] ss:$16 sps:$4 sm:$0xff]  }
 0x2fd   :  { %1803 = vmatpush1.bf16.msra.mxu0 %v5743_v54  ;;  %v5841_v54 = vld [vmem:[#allocation13 + $0x1c4] ss:$16 sps:$4 sm:$0xff]  }
 0x2fe   :  { %1844 = vmatpush1.bf16.msra.mxu1 %v5752_v55  ;;  %2678 = vmatprep.subr.bf16.mxu0 %v5757_v56  ;;  %v5844_v55 = vld [vmem:[#allocation13 + $0x1cc] ss:$16 sps:$4 sm:$0xff]   ;;  %v5839_v56 = vld [vmem:[#allocation13 + $0x1c0] ss:$16 sps:$4 sm:$0xff]  }
 0x2ff   :  { %2760 = vmatprep.subr.bf16.mxu1 %v5760_v57  ;;  %v5842_v57 = vld [vmem:[#allocation13 + $0x1c8] ss:$16 sps:$4 sm:$0xff]  }
 0x300   :  { %4969 = vmatmul.mubr.msk.bf16.vlgmr.msra.gmra.mrb[12].mxu0 %vm1794_vm1, %v1699_v58 }
 0x301   :  { %4970 = vmatmul.mubr.msk.bf16.vlgmr.msra.gmra.mrb[12].mxu1 %vm1794_vm1, %v1699_v58  ;;  %2679 = vmatpush1.bf16.msra.mxu0 %v5755_v59  ;;  %v5847_v58 = vld [vmem:[#allocation13 + $0x1e4] ss:$16 sps:$4 sm:$0xff]   ;;  %v5850_v59 = vld [vmem:[#allocation13 + $0x1ec] ss:$16 sps:$4 sm:$0xff]  }
 0x302   :  { %2761 = vmatpush1.bf16.msra.mxu1 %v5758_v60  ;;  %2680 = vmatprep.subr.bf16.mxu0 %v5763_v61  ;;  %v5845_v60 = vld [vmem:[#allocation13 + $0x1e0] ss:$16 sps:$4 sm:$0xff]   ;;  %v5848_v61 = vld [vmem:[#allocation13 + $0x1e8] ss:$16 sps:$4 sm:$0xff]  }
 0x303   :  { %2762 = vmatprep.subr.bf16.mxu1 %v5766_v62  ;;  %v5853_v62 = vld [vmem:[#allocation13 + $0x204] ss:$16 sps:$4 sm:$0xff]  }
 0x305   :  { %2681 = vmatpush1.bf16.msra.mxu0 %v5761_v63  ;;  %v5856_v63 = vld [vmem:[#allocation13 + $0x20c] ss:$16 sps:$4 sm:$0xff]  }
 0x306   :  { %2763 = vmatpush1.bf16.msra.mxu1 %v5764_v0  ;;  %2682 = vmatprep.subr.bf16.mxu0 %v5769_v1 }
 0x307   :  { %2764 = vmatprep.subr.bf16.mxu1 %v5772_v3  ;;  %v4924_v3 = vld [vmem:[%s7104_s16] ss:$0 sm:$0xff] }
 0x309   :  { %2683 = vmatpush1.bf16.msra.mxu0 %v5767_v4 }
 0x30a   :  { %2765 = vmatpush1.bf16.msra.mxu1 %v5770_v5  ;;  %2684 = vmatprep.subr.bf16.mxu0 %v5775_v6 }
 0x30b   :  { %2766 = vmatprep.subr.bf16.mxu1 %v5778_v7 }
 0x30d   :  { %2685 = vmatpush1.bf16.msra.mxu0 %v5773_v8 }
 0x30e   :  { %2767 = vmatpush1.bf16.msra.mxu1 %v5776_v9  ;;  %2686 = vmatprep.subr.bf16.mxu0 %v5781_v10 }
 0x30f   :  { %2768 = vmatprep.subr.bf16.mxu1 %v5784_v11 }
 0x311   :  { %2687 = vmatpush1.bf16.msra.mxu0 %v5779_v12 }
 0x312   :  { %2769 = vmatpush1.bf16.msra.mxu1 %v5782_v13  ;;  %2688 = vmatprep.subr.bf16.mxu0 %v5787_v18  ;;  %v1712_v18 = vld [vmem:[%s7047_s10] sm:$0xf] }
 0x313   :  { %2770 = vmatprep.subr.bf16.mxu1 %v5790_v20 }
 0x315   :  { %2689 = vmatpush1.bf16.msra.mxu0 %v5785_v21  ;;  %v1717_v21 = vrot.slane %v1712_v18, %v6891_v16 }
 0x316   :  { %2771 = vmatpush1.bf16.msra.mxu1 %v5788_v22  ;;  %2690 = vmatprep.subr.bf16.mxu0 %v5793_v23  ;;  %v1721_v22 = vrot.slane %v1712_v18, %v6894_v17  ;;  %v1725_v23 = vrot.slane %v1712_v18, %v6908_v32 }
 0x317   :  { %2772 = vmatprep.subr.bf16.mxu1 %v5796_v24  ;;  %v1729_v24 = vrot.slane %v1712_v18, %v6899_v19  ;;  %v5907_v18 = vld [vmem:[#allocation13 + $0x324] ss:$16 sps:$4 sm:$0xff]  }
 0x319   :  { %2691 = vmatpush1.bf16.msra.mxu0 %v5791_v25 }
 0x31a   :  { %2773 = vmatpush1.bf16.msra.mxu1 %v5794_v26  ;;  %2692 = vmatprep.subr.bf16.mxu0 %v5799_v27 }
 0x31b   :  { %2774 = vmatprep.subr.bf16.mxu1 %v5802_v28 }
 0x31d   :  { %2693 = vmatpush1.bf16.msra.mxu0 %v5797_v30 }
 0x31e   :  { %2775 = vmatpush1.bf16.msra.mxu1 %v5800_v31  ;;  %2694 = vmatprep.subr.bf16.mxu0 %v5805_v33 }
 0x31f   :  { %2776 = vmatprep.subr.bf16.mxu1 %v5808_v34 }
 0x321   :  { %2695 = vmatpush1.bf16.msra.mxu0 %v5803_v35 }
 0x322   :  { %2777 = vmatpush1.bf16.msra.mxu1 %v5806_v36  ;;  %2696 = vmatprep.subr.bf16.mxu0 %v5811_v37 }
 0x323   :  { %2778 = vmatprep.subr.bf16.mxu1 %v5814_v38 }
 0x325   :  { %2697 = vmatpush1.bf16.msra.mxu0 %v5809_v39 }
 0x326   :  { %2779 = vmatpush1.bf16.msra.mxu1 %v5812_v40  ;;  %2698 = vmatprep.subr.bf16.mxu0 %v5817_v41 }
 0x327   :  { %2780 = vmatprep.subr.bf16.mxu1 %v5820_v14 }
 0x329   :  { %2699 = vmatpush1.bf16.msra.mxu0 %v5815_v42  ;;  %v5851_v42 = vld [vmem:[#allocation13 + $0x200] ss:$16 sps:$4 sm:$0xff]  }
 0x32a   :  { %2781 = vmatpush1.bf16.msra.mxu1 %v5818_v43  ;;  %2700 = vmatprep.subr.bf16.mxu0 %v5823_v44  ;;  %v5854_v43 = vld [vmem:[#allocation13 + $0x208] ss:$16 sps:$4 sm:$0xff]  }
 0x32b   :  { %2782 = vmatprep.subr.bf16.mxu1 %v5826_v45  ;;  %v5859_v45 = vld [vmem:[#allocation13 + $0x224] ss:$16 sps:$4 sm:$0xff]  }
 0x32d   :  { %2701 = vmatpush1.bf16.msra.mxu0 %v5821_v46  ;;  %v5862_v46 = vld [vmem:[#allocation13 + $0x22c] ss:$16 sps:$4 sm:$0xff]  }
 0x32e   :  { %2783 = vmatpush1.bf16.msra.mxu1 %v5824_v15  ;;  %2702 = vmatprep.subr.bf16.mxu0 %v5829_v47  ;;  %v5857_v47 = vld [vmem:[#allocation13 + $0x220] ss:$16 sps:$4 sm:$0xff]  }
 0x32f   :  { %2784 = vmatprep.subr.bf16.mxu1 %v5832_v48  ;;  %v5860_v48 = vld [vmem:[#allocation13 + $0x228] ss:$16 sps:$4 sm:$0xff]  }
 0x331   :  { %2703 = vmatpush1.bf16.msra.mxu0 %v5827_v49  ;;  %v5865_v49 = vld [vmem:[#allocation13 + $0x244] ss:$16 sps:$4 sm:$0xff]  }
 0x332   :  { %2785 = vmatpush1.bf16.msra.mxu1 %v5830_v50  ;;  %2704 = vmatprep.subr.bf16.mxu0 %v5835_v51  ;;  %v5868_v50 = vld [vmem:[#allocation13 + $0x24c] ss:$16 sps:$4 sm:$0xff]   ;;  %v5866_v51 = vld [vmem:[#allocation13 + $0x248] ss:$16 sps:$4 sm:$0xff]  }
 0x333   :  { %2786 = vmatprep.subr.bf16.mxu1 %v5838_v53  ;;  %v5874_v53 = vld [vmem:[#allocation13 + $0x26c] ss:$16 sps:$4 sm:$0xff]  }
 0x335   :  { %2705 = vmatpush1.bf16.msra.mxu0 %v5833_v29  ;;  %v5863_v29 = vld [vmem:[#allocation13 + $0x240] ss:$16 sps:$4 sm:$0xff]  }
 0x336   :  { %2787 = vmatpush1.bf16.msra.mxu1 %v5836_v52  ;;  %2706 = vmatprep.subr.bf16.mxu0 %v5841_v54  ;;  %v5871_v52 = vld [vmem:[#allocation13 + $0x264] ss:$16 sps:$4 sm:$0xff]   ;;  %v5869_v54 = vld [vmem:[#allocation13 + $0x260] ss:$16 sps:$4 sm:$0xff]  }
 0x337   :  { %2788 = vmatprep.subr.bf16.mxu1 %v5844_v55  ;;  %v5872_v55 = vld [vmem:[#allocation13 + $0x268] ss:$16 sps:$4 sm:$0xff]  }
 0x339   :  { %2707 = vmatpush1.bf16.msra.mxu0 %v5839_v56  ;;  %v5877_v56 = vld [vmem:[#allocation13 + $0x284] ss:$16 sps:$4 sm:$0xff]  }
 0x33a   :  { %2789 = vmatpush1.bf16.msra.mxu1 %v5842_v57  ;;  %2708 = vmatprep.subr.bf16.mxu0 %v5847_v58  ;;  %v5880_v57 = vld [vmem:[#allocation13 + $0x28c] ss:$16 sps:$4 sm:$0xff]   ;;  %v5875_v58 = vld [vmem:[#allocation13 + $0x280] ss:$16 sps:$4 sm:$0xff]  }
 0x33b   :  { %2790 = vmatprep.subr.bf16.mxu1 %v5850_v59  ;;  %v5878_v59 = vld [vmem:[#allocation13 + $0x288] ss:$16 sps:$4 sm:$0xff]  }
 0x33d   :  { %2709 = vmatpush1.bf16.msra.mxu0 %v5845_v60  ;;  %v5883_v60 = vld [vmem:[#allocation13 + $0x2a4] ss:$16 sps:$4 sm:$0xff]  }
 0x33e   :  { %2791 = vmatpush1.bf16.msra.mxu1 %v5848_v61  ;;  %2719 = vmatprep.subr.bf16.mxu0 %v5853_v62  ;;  %v5886_v61 = vld [vmem:[#allocation13 + $0x2ac] ss:$16 sps:$4 sm:$0xff]   ;;  %v5881_v62 = vld [vmem:[#allocation13 + $0x2a0] ss:$16 sps:$4 sm:$0xff]  }
 0x33f   :  { %2801 = vmatprep.subr.bf16.mxu1 %v5856_v63  ;;  %v5884_v63 = vld [vmem:[#allocation13 + $0x2a8] ss:$16 sps:$4 sm:$0xff]  }
 0x3c7   :  { %v5329_v0 = vpop.f32.mrb[8].mxu0  ;;  %v5351_v1 = vpop.f32.mrb[8].mxu1 }
 0x3c8   :  { %v5330_v4 = vpop.f32.mrb[9].mxu0  ;;  %v5352_v5 = vpop.f32.mrb[9].mxu1 }
 0x3c9   :  { %v5331_v6 = vadd.f32 %v5330_v4, %v5329_v0  ;;  %v5353_v7 = vadd.f32 %v5352_v5, %v5351_v1  ;;  %v5332_v8 = vpop.f32.mrb[10].mxu0  ;;  %v5354_v9 = vpop.f32.mrb[10].mxu1  ;;  %v5889_v0 = vld [vmem:[#allocation13 + $0x2c4] ss:$16 sps:$4 sm:$0xff]   ;;  %v5892_v1 = vld [vmem:[#allocation13 + $0x2cc] ss:$16 sps:$4 sm:$0xff]  }
 0x3ca   :  { %v5333_v10 = vpop.f32.mrb[11].mxu0  ;;  %v5355_v11 = vpop.f32.mrb[11].mxu1  ;;  %v5890_v4 = vld [vmem:[#allocation13 + $0x2c8] ss:$16 sps:$4 sm:$0xff]   ;;  %v5895_v5 = vld [vmem:[#allocation13 + $0x2e4] ss:$16 sps:$4 sm:$0xff]  }
 0x3cb   :  { %v1649_v12 = vadd.f32 %v5331_v6, %v4924_v3  ;;  %v5887_v3 = vld [vmem:[#allocation13 + $0x2c0] ss:$16 sps:$4 sm:$0xff]   ;;  %v5898_v6 = vld [vmem:[#allocation13 + $0x2ec] ss:$16 sps:$4 sm:$0xff]   ;;  %v5896_v8 = vld [vmem:[#allocation13 + $0x2e8] ss:$16 sps:$4 sm:$0xff]  }
 0x3cc   :  { %v5901_v9 = vld [vmem:[#allocation13 + $0x304] ss:$16 sps:$4 sm:$0xff]   ;;  %v5904_v10 = vld [vmem:[#allocation13 + $0x30c] ss:$16 sps:$4 sm:$0xff]   ;;  %v5899_v11 = vld [vmem:[#allocation13 + $0x300] ss:$16 sps:$4 sm:$0xff]  }
 0x3cd   :  { %v6928_v13 = vadd.f32 %v5353_v7, %v1649_v12  ;;  %v5893_v7 = vld [vmem:[#allocation13 + $0x2e0] ss:$16 sps:$4 sm:$0xff]   ;;  %v5902_v12 = vld [vmem:[#allocation13 + $0x308] ss:$16 sps:$4 sm:$0xff]  }
 0x3cf   :  { %v1694_v20 = vmax.f32 %v6928_v13, 0.0 }
 0x3d1   :  { %1695 = vst [vmem:[#allocation21] sm:$0xff] %v1694_v20 }
 0x3d3   :  { %v1832_v25 = vpop.f32.mrb[12].mxu0 }
 0x3d4   :  { %v1833_v26 = vadd.f32 %v1832_v25, %v1717_v21  ;;  %v1834_v27 = vpop.f32.mrb[13].mxu0  ;;  %v1873_v28 = vpop.f32.mrb[12].mxu1  ;;  %v5910_v21 = vld [vmem:[#allocation13 + $0x32c] ss:$16 sps:$4 sm:$0xff]  }
 0x3d5   :  { %v1835_v30 = vadd.f32 %v1834_v27, %v1721_v22  ;;  %v1836_v31 = vpop.f32.mrb[14].mxu0  ;;  %v6940_v33 = vadd.f32 %v1873_v28, %v1725_v23  ;;  %v1875_v34 = vpop.f32.mrb[13].mxu1  ;;  %v5905_v22 = vld [vmem:[#allocation13 + $0x320] ss:$16 sps:$4 sm:$0xff]   ;;  %v5908_v23 = vld [vmem:[#allocation13 + $0x328] ss:$16 sps:$4 sm:$0xff]  }
 0x3d6   :  { %v1880_v35 = vmax.f32 %v1833_v26, 0.0  ;;  %v1837_v36 = vpop.f32.mrb[15].mxu0  ;;  %v1876_v37 = vadd.f32 %v1875_v34, %v1729_v24  ;;  %v1877_v38 = vpop.f32.mrb[14].mxu1  ;;  %v5913_v24 = vld [vmem:[#allocation13 + $0x344] ss:$16 sps:$4 sm:$0xff]  }
 0x3d7   :  { %v1881_v39 = vmax.f32 %v1835_v30, 0.0  ;;  %v1878_v40 = vpop.f32.mrb[15].mxu1  ;;  %v5916_v25 = vld [vmem:[#allocation13 + $0x34c] ss:$16 sps:$4 sm:$0xff]   ;;  %v5911_v26 = vld [vmem:[#allocation13 + $0x340] ss:$16 sps:$4 sm:$0xff]  }
 0x3d8   :  { %v1883_v41 = vmax.f32 %v1876_v37, 0.0  ;;  %v1884_v44 = vpack.c.bf16 %v1880_v35, %v1880_v35  ;;  %v5914_v27 = vld [vmem:[#allocation13 + $0x348] ss:$16 sps:$4 sm:$0xff]   ;;  %v5919_v28 = vld [vmem:[#allocation13 + $0x364] ss:$16 sps:$4 sm:$0xff]  }
 0x3d9   :  { %v1885_v14 = vpack.c.bf16 %v1881_v39, %v1881_v39  ;;  %v5922_v30 = vld [vmem:[#allocation13 + $0x36c] ss:$16 sps:$4 sm:$0xff]   ;;  %v5917_v31 = vld [vmem:[#allocation13 + $0x360] ss:$16 sps:$4 sm:$0xff]   ;;  %v5920_v34 = vld [vmem:[#allocation13 + $0x368] ss:$16 sps:$4 sm:$0xff]  }
 0x3da   :  { %v1887_v15 = vpack.c.bf16 %v1883_v41, %v1883_v41  ;;  %v5925_v35 = vld [vmem:[#allocation13 + $0x384] ss:$16 sps:$4 sm:$0xff]   ;;  %v5928_v36 = vld [vmem:[#allocation13 + $0x38c] ss:$16 sps:$4 sm:$0xff]   ;;  %v5923_v37 = vld [vmem:[#allocation13 + $0x380] ss:$16 sps:$4 sm:$0xff]  }
 0x3db   :  { %2710 = vmatprep.mubr.bf16.mxu0 %v1885_v14  ;;  %2792 = vmatprep.mubr.bf16.mxu1 %v1885_v14  ;;  %v5926_v38 = vld [vmem:[#allocation13 + $0x388] ss:$16 sps:$4 sm:$0xff]   ;;  %v5931_v39 = vld [vmem:[#allocation13 + $0x3a4] ss:$16 sps:$4 sm:$0xff]   ;;  %v5934_v40 = vld [vmem:[#allocation13 + $0x3ac] ss:$16 sps:$4 sm:$0xff]  }
 0x3dc   :  { %2711 = vmatmul.mubr.bf16.vlgmr.msra.gmra.mrb[16].mxu0 %v1884_v44  ;;  %2793 = vmatmul.mubr.bf16.vlgmr.msra.gmra.mrb[16].mxu1 %v1884_v44  ;;  %v5929_v41 = vld [vmem:[#allocation13 + $0x3a0] ss:$16 sps:$4 sm:$0xff]   ;;  %v5932_v14 = vld [vmem:[#allocation13 + $0x3a8] ss:$16 sps:$4 sm:$0xff]  }
 0x3dd   :  { %2720 = vmatpush1.bf16.msra.mxu0 %v5851_v42  ;;  %2802 = vmatpush1.bf16.msra.mxu1 %v5854_v43  ;;  %v5937_v42 = vld [vmem:[#allocation13 + $0x3c4] ss:$16 sps:$4 sm:$0xff]   ;;  %v5940_v43 = vld [vmem:[#allocation13 + $0x3cc] ss:$16 sps:$4 sm:$0xff]   ;;  %v5935_v44 = vld [vmem:[#allocation13 + $0x3c0] ss:$16 sps:$4 sm:$0xff]  }
 0x3de   :  { %2721 = vmatprep.subr.bf16.mxu0 %v5859_v45  ;;  %2803 = vmatprep.subr.bf16.mxu1 %v5862_v46  ;;  %v5938_v45 = vld [vmem:[#allocation13 + $0x3c8] ss:$16 sps:$4 sm:$0xff]   ;;  %v5943_v46 = vld [vmem:[#allocation13 + $0x3e4] ss:$16 sps:$4 sm:$0xff]  }
 0x3df   :  { %2751 = vmatprep.mubr.bf16.mxu0 %v1887_v15  ;;  %2833 = vmatprep.mubr.bf16.mxu1 %v1887_v15  ;;  %v5946_v15 = vld [vmem:[#allocation13 + $0x3ec] ss:$16 sps:$4 sm:$0xff]  }
 0x3e1   :  { %2722 = vmatpush1.bf16.msra.mxu0 %v5857_v47  ;;  %2804 = vmatpush1.bf16.msra.mxu1 %v5860_v48  ;;  %v5941_v47 = vld [vmem:[#allocation13 + $0x3e0] ss:$16 sps:$4 sm:$0xff]   ;;  %v5944_v48 = vld [vmem:[#allocation13 + $0x3e8] ss:$16 sps:$4 sm:$0xff]  }
 0x3e2   :  { %2723 = vmatprep.subr.bf16.mxu0 %v5865_v49  ;;  %2805 = vmatprep.subr.bf16.mxu1 %v5868_v50  ;;  %v1882_v49 = vmax.f32 %v6940_v33, 0.0  ;;  %v5947_v50 = vld [vmem:[#allocation15 + $0x40] sm:$0xff]   ;;  %v5955_v33 = vld [vmem:[#allocation15 + $0x50] sm:$0xff]  }
 0x3e5   :  { %2724 = vmatpush1.bf16.msra.mxu0 %v5863_v29  ;;  %2806 = vmatpush1.bf16.msra.mxu1 %v5866_v51  ;;  %v5949_v29 = vld [vmem:[#allocation15 + $0xc0] sm:$0xff]  }
 0x3e6   :  { %2725 = vmatprep.subr.bf16.mxu0 %v5871_v52  ;;  %2807 = vmatprep.subr.bf16.mxu1 %v5874_v53  ;;  %v5948_v51 = vld [vmem:[#allocation15] sm:$0xff]   ;;  %v1886_v53 = vpack.c.bf16 %v1882_v49, %v1882_v49 }
 0x3e7   :  { %v5950_v52 = vld [vmem:[#allocation15 + $0x80] sm:$0xff]  }
 0x3e9   :  { %2726 = vmatpush1.bf16.msra.mxu0 %v5869_v54  ;;  %2808 = vmatpush1.bf16.msra.mxu1 %v5872_v55  ;;  %v5951_v54 = vld [vmem:[#allocation15 + $0x48] sm:$0xff]  }
 0x3ea   :  { %2727 = vmatprep.subr.bf16.mxu0 %v5877_v56  ;;  %2809 = vmatprep.subr.bf16.mxu1 %v5880_v57  ;;  %v5953_v55 = vld [vmem:[#allocation15 + $0xc8] sm:$0xff]  }
 0x3eb   :  { %v5952_v56 = vld [vmem:[#allocation15 + $0x8] sm:$0xff]  }
 0x3ec   :  { %v5954_v57 = vld [vmem:[#allocation15 + $0x88] sm:$0xff]  }
 0x3ed   :  { %2728 = vmatpush1.bf16.msra.mxu0 %v5875_v58  ;;  %2810 = vmatpush1.bf16.msra.mxu1 %v5878_v59  ;;  %v5957_v58 = vld [vmem:[#allocation15 + $0xd0] sm:$0xff]  }
 0x3ee   :  { %2729 = vmatprep.subr.bf16.mxu0 %v5883_v60  ;;  %2811 = vmatprep.subr.bf16.mxu1 %v5886_v61  ;;  %v5956_v59 = vld [vmem:[#allocation15 + $0x10] sm:$0xff]   ;;  %v5959_v61 = vld [vmem:[#allocation15 + $0x58] sm:$0xff]  }
 0x3ef   :  { %v5958_v60 = vld [vmem:[#allocation15 + $0x90] sm:$0xff]  }
 0x3f1   :  { %2730 = vmatpush1.bf16.msra.mxu0 %v5881_v62  ;;  %2812 = vmatpush1.bf16.msra.mxu1 %v5884_v63  ;;  %v5961_v62 = vld [vmem:[#allocation15 + $0xd8] sm:$0xff]  }
 0x3f2   :  { %2731 = vmatprep.subr.bf16.mxu0 %v5889_v0  ;;  %2813 = vmatprep.subr.bf16.mxu1 %v5892_v1  ;;  %v5960_v63 = vld [vmem:[#allocation15 + $0x18] sm:$0xff]   ;;  %v5963_v1 = vld [vmem:[#allocation15 + $0x60] sm:$0xff]  }
 0x3f3   :  { %v5962_v0 = vld [vmem:[#allocation15 + $0x98] sm:$0xff]  }
 0x3f5   :  { %2732 = vmatpush1.bf16.msra.mxu0 %v5887_v3  ;;  %2814 = vmatpush1.bf16.msra.mxu1 %v5890_v4  ;;  %v5965_v3 = vld [vmem:[#allocation15 + $0xe0] sm:$0xff]  }
 0x3f6   :  { %2733 = vmatprep.subr.bf16.mxu0 %v5895_v5  ;;  %2815 = vmatprep.subr.bf16.mxu1 %v5898_v6  ;;  %v5964_v4 = vld [vmem:[#allocation15 + $0x20] sm:$0xff]   ;;  %v5967_v6 = vld [vmem:[#allocation15 + $0x68] sm:$0xff]  }
 0x3f7   :  { %v5966_v5 = vld [vmem:[#allocation15 + $0xa0] sm:$0xff]  }
 0x3f9   :  { %2734 = vmatpush1.bf16.msra.mxu0 %v5893_v7  ;;  %2816 = vmatpush1.bf16.msra.mxu1 %v5896_v8  ;;  %v5969_v7 = vld [vmem:[#allocation15 + $0xe8] sm:$0xff]  }
 0x3fa   :  { %2735 = vmatprep.subr.bf16.mxu0 %v5901_v9  ;;  %2817 = vmatprep.subr.bf16.mxu1 %v5904_v10  ;;  %v5968_v8 = vld [vmem:[#allocation15 + $0x28] sm:$0xff]   ;;  %v5971_v10 = vld [vmem:[#allocation15 + $0x70] sm:$0xff]  }
 0x3fb   :  { %v5970_v9 = vld [vmem:[#allocation15 + $0xa8] sm:$0xff]  }
 0x3fd   :  { %2736 = vmatpush1.bf16.msra.mxu0 %v5899_v11  ;;  %2818 = vmatpush1.bf16.msra.mxu1 %v5902_v12  ;;  %v5972_v11 = vld [vmem:[#allocation15 + $0x30] sm:$0xff]  }
 0x3fe   :  { %2737 = vmatprep.subr.bf16.mxu0 %v5907_v18  ;;  %2819 = vmatprep.subr.bf16.mxu1 %v5910_v21  ;;  %v5973_v12 = vld [vmem:[#allocation15 + $0xf0] sm:$0xff]   ;;  %v5975_v21 = vld [vmem:[#allocation15 + $0x78] sm:$0xff]  }
 0x3ff   :  { %v5974_v18 = vld [vmem:[#allocation15 + $0xb0] sm:$0xff]  }
 0x401   :  { %2738 = vmatpush1.bf16.msra.mxu0 %v5905_v22  ;;  %2820 = vmatpush1.bf16.msra.mxu1 %v5908_v23  ;;  %v5976_v22 = vld [vmem:[#allocation15 + $0x38] sm:$0xff]  }
 0x402   :  { %2739 = vmatprep.subr.bf16.mxu0 %v5913_v24  ;;  %2821 = vmatprep.subr.bf16.mxu1 %v5916_v25  ;;  %v5977_v23 = vld [vmem:[#allocation15 + $0xf8] sm:$0xff]   ;;  %v5981_v25 = vld [vmem:[#allocation16 + $0x4] ss:$16 sps:$4 sm:$0xff]  }
 0x403   :  { %v5978_v24 = vld [vmem:[#allocation15 + $0xb8] sm:$0xff]  }
 0x405   :  { %2740 = vmatpush1.bf16.msra.mxu0 %v5911_v26  ;;  %2822 = vmatpush1.bf16.msra.mxu1 %v5914_v27  ;;  %v5993_v26 = vld [vmem:[#allocation16 + $0xc] ss:$16 sps:$4 sm:$0xff]  }
 0x406   :  { %2741 = vmatprep.subr.bf16.mxu0 %v5919_v28  ;;  %2823 = vmatprep.subr.bf16.mxu1 %v5922_v30  ;;  %v2016_v27 = vld [vmem:[%s7049_s12] sm:$0xf] }
 0x407   :  { %v2021_v28 = vrot.slane %v2016_v27, %v6891_v16  ;;  %v2029_v30 = vrot.slane %v2016_v27, %v6908_v32 }
 0x409   :  { %2742 = vmatpush1.bf16.msra.mxu0 %v5917_v31  ;;  %2824 = vmatpush1.bf16.msra.mxu1 %v5920_v34  ;;  %v2025_v31 = vrot.slane %v2016_v27, %v6894_v17  ;;  %v2033_v34 = vrot.slane %v2016_v27, %v6899_v19  ;;  %v6027_v27 = vld [vmem:[#allocation18 + $0x80] ss:$16 sps:$4 sm:$0xff]  }
 0x40a   :  { %2743 = vmatprep.subr.bf16.mxu0 %v5925_v35  ;;  %2825 = vmatprep.subr.bf16.mxu1 %v5928_v36 }
 0x40d   :  { %2744 = vmatpush1.bf16.msra.mxu0 %v5923_v37  ;;  %2826 = vmatpush1.bf16.msra.mxu1 %v5926_v38 }
 0x40e   :  { %2745 = vmatprep.subr.bf16.mxu0 %v5931_v39  ;;  %2827 = vmatprep.subr.bf16.mxu1 %v5934_v40 }
 0x411   :  { %2746 = vmatpush1.bf16.msra.mxu0 %v5929_v41  ;;  %2828 = vmatpush1.bf16.msra.mxu1 %v5932_v14 }
 0x412   :  { %2747 = vmatprep.subr.bf16.mxu0 %v5937_v42  ;;  %2829 = vmatprep.subr.bf16.mxu1 %v5940_v43 }
 0x415   :  { %2748 = vmatpush1.bf16.msra.mxu0 %v5935_v44  ;;  %2830 = vmatpush1.bf16.msra.mxu1 %v5938_v45 }
 0x416   :  { %2749 = vmatprep.subr.bf16.mxu0 %v5943_v46  ;;  %2831 = vmatprep.subr.bf16.mxu1 %v5946_v15 }
 0x419   :  { %2750 = vmatpush1.bf16.msra.mxu0 %v5941_v47  ;;  %2832 = vmatpush1.bf16.msra.mxu1 %v5944_v48 }
 0x41a   :  { %5357 = vmatprep.subr.bf16.mxu0 %v5947_v50  ;;  %5379 = vmatprep.subr.bf16.mxu1 %v5949_v29  ;;  %v5979_v29 = vld [vmem:[#allocation16] ss:$16 sps:$4 sm:$0xff]  }
 0x41c   :  { %2752 = vmatmul.mubr.bf16.vlgmr.msra.gmra.mrb[16].mxu0 %v1886_v53  ;;  %2834 = vmatmul.mubr.bf16.vlgmr.msra.gmra.mrb[16].mxu1 %v1886_v53  ;;  %v5984_v53 = vld [vmem:[#allocation16 + $0x24] ss:$16 sps:$4 sm:$0xff]  }
 0x41d   :  { %5358 = vmatpush3.bf16.msra.mxu0 %v5948_v51  ;;  %5380 = vmatpush3.bf16.msra.mxu1 %v5950_v52 }
 0x41e   :  { %5359 = vmatprep.subr.bf16.mxu0 %v5951_v54  ;;  %5381 = vmatprep.subr.bf16.mxu1 %v5953_v55  ;;  %v5991_v54 = vld [vmem:[#allocation16 + $0x8] ss:$16 sps:$4 sm:$0xff]   ;;  %v5996_v55 = vld [vmem:[#allocation16 + $0x2c] ss:$16 sps:$4 sm:$0xff]  }
 0x421   :  { %5360 = vmatpush3.bf16.msra.mxu0 %v5952_v56  ;;  %5382 = vmatpush3.bf16.msra.mxu1 %v5954_v57  ;;  %v5982_v56 = vld [vmem:[#allocation16 + $0x20] ss:$16 sps:$4 sm:$0xff]   ;;  %v5987_v57 = vld [vmem:[#allocation16 + $0x44] ss:$16 sps:$4 sm:$0xff]  }
 0x422   :  { %5361 = vmatprep.subr.bf16.mxu0 %v5955_v33  ;;  %5383 = vmatprep.subr.bf16.mxu1 %v5957_v58  ;;  %v5994_v33 = vld [vmem:[#allocation16 + $0x28] ss:$16 sps:$4 sm:$0xff]   ;;  %v5999_v58 = vld [vmem:[#allocation16 + $0x4c] ss:$16 sps:$4 sm:$0xff]  }
 0x425   :  { %5362 = vmatpush3.bf16.msra.mxu0 %v5956_v59  ;;  %5384 = vmatpush3.bf16.msra.mxu1 %v5958_v60  ;;  %v5985_v59 = vld [vmem:[#allocation16 + $0x40] ss:$16 sps:$4 sm:$0xff]   ;;  %v5990_v60 = vld [vmem:[#allocation16 + $0x64] ss:$16 sps:$4 sm:$0xff]  }
 0x426   :  { %5363 = vmatprep.subr.bf16.mxu0 %v5959_v61  ;;  %5385 = vmatprep.subr.bf16.mxu1 %v5961_v62  ;;  %v5997_v61 = vld [vmem:[#allocation16 + $0x48] ss:$16 sps:$4 sm:$0xff]   ;;  %v6002_v62 = vld [vmem:[#allocation16 + $0x6c] ss:$16 sps:$4 sm:$0xff]  }
 0x429   :  { %5364 = vmatpush3.bf16.msra.mxu0 %v5960_v63  ;;  %5386 = vmatpush3.bf16.msra.mxu1 %v5962_v0  ;;  %v5988_v63 = vld [vmem:[#allocation16 + $0x60] ss:$16 sps:$4 sm:$0xff]   ;;  %v6000_v0 = vld [vmem:[#allocation16 + $0x68] ss:$16 sps:$4 sm:$0xff]  }
 0x42a   :  { %5365 = vmatprep.subr.bf16.mxu0 %v5963_v1  ;;  %5387 = vmatprep.subr.bf16.mxu1 %v5965_v3  ;;  %v6005_v1 = vld [vmem:[#allocation18 + $0x4] ss:$16 sps:$4 sm:$0xff]   ;;  %v6008_v3 = vld [vmem:[#allocation18 + $0xc] ss:$16 sps:$4 sm:$0xff]  }
 0x42d   :  { %5366 = vmatpush3.bf16.msra.mxu0 %v5964_v4  ;;  %5388 = vmatpush3.bf16.msra.mxu1 %v5966_v5  ;;  %v6003_v4 = vld [vmem:[#allocation18] ss:$16 sps:$4 sm:$0xff]   ;;  %v6006_v5 = vld [vmem:[#allocation18 + $0x8] ss:$16 sps:$4 sm:$0xff]  }
 0x42e   :  { %5367 = vmatprep.subr.bf16.mxu0 %v5967_v6  ;;  %5389 = vmatprep.subr.bf16.mxu1 %v5969_v7  ;;  %v6011_v6 = vld [vmem:[#allocation18 + $0x24] ss:$16 sps:$4 sm:$0xff]   ;;  %v6014_v7 = vld [vmem:[#allocation18 + $0x2c] ss:$16 sps:$4 sm:$0xff]  }
 0x431   :  { %5368 = vmatpush3.bf16.msra.mxu0 %v5968_v8  ;;  %5390 = vmatpush3.bf16.msra.mxu1 %v5970_v9  ;;  %v6009_v8 = vld [vmem:[#allocation18 + $0x20] ss:$16 sps:$4 sm:$0xff]   ;;  %v6012_v9 = vld [vmem:[#allocation18 + $0x28] ss:$16 sps:$4 sm:$0xff]  }
 0x432   :  { %5369 = vmatprep.subr.bf16.mxu0 %v5971_v10  ;;  %5391 = vmatprep.subr.bf16.mxu1 %v5973_v12  ;;  %v6017_v10 = vld [vmem:[#allocation18 + $0x44] ss:$16 sps:$4 sm:$0xff]   ;;  %v6015_v12 = vld [vmem:[#allocation18 + $0x40] ss:$16 sps:$4 sm:$0xff]  }
 0x435   :  { %5370 = vmatpush3.bf16.msra.mxu0 %v5972_v11  ;;  %5392 = vmatpush3.bf16.msra.mxu1 %v5974_v18  ;;  %v6020_v11 = vld [vmem:[#allocation18 + $0x4c] ss:$16 sps:$4 sm:$0xff]   ;;  %v6018_v18 = vld [vmem:[#allocation18 + $0x48] ss:$16 sps:$4 sm:$0xff]  }
 0x436   :  { %5371 = vmatprep.subr.bf16.mxu0 %v5975_v21  ;;  %5393 = vmatprep.subr.bf16.mxu1 %v5977_v23  ;;  %v6023_v21 = vld [vmem:[#allocation18 + $0x64] ss:$16 sps:$4 sm:$0xff]   ;;  %v6021_v23 = vld [vmem:[#allocation18 + $0x60] ss:$16 sps:$4 sm:$0xff]  }
 0x439   :  { %5372 = vmatpush3.bf16.msra.mxu0 %v5976_v22  ;;  %5394 = vmatpush3.bf16.msra.mxu1 %v5978_v24  ;;  %v6026_v22 = vld [vmem:[#allocation18 + $0x6c] ss:$16 sps:$4 sm:$0xff]   ;;  %v6024_v24 = vld [vmem:[#allocation18 + $0x68] ss:$16 sps:$4 sm:$0xff]  }
 0x43a   :  { %3322 = vmatprep.subr.bf16.mxu0 %v5981_v25  ;;  %3363 = vmatprep.subr.bf16.mxu1 %v5993_v26  ;;  %v6029_v25 = vld [vmem:[#allocation18 + $0x84] ss:$16 sps:$4 sm:$0xff]   ;;  %v6032_v26 = vld [vmem:[#allocation18 + $0x8c] ss:$16 sps:$4 sm:$0xff]  }
 0x4ef   :  { %v2753_v35 = vpop.f32.mrb[16].mxu0  ;;  %v2835_v36 = vpop.f32.mrb[16].mxu1 }
 0x4f0   :  { %v5449_v37 = vadd.f32 %v2753_v35, %v2021_v28  ;;  %v5451_v38 = vadd.f32 %v2835_v36, %v2029_v30  ;;  %v2755_v39 = vpop.f32.mrb[17].mxu0  ;;  %v2837_v40 = vpop.f32.mrb[17].mxu1  ;;  %v6030_v28 = vld [vmem:[#allocation18 + $0x88] ss:$16 sps:$4 sm:$0xff]   ;;  %v6035_v30 = vld [vmem:[#allocation18 + $0xa4] ss:$16 sps:$4 sm:$0xff]  }
 0x4f1   :  { %v5450_v41 = vadd.f32 %v2755_v39, %v2025_v31  ;;  %v5452_v14 = vadd.f32 %v2837_v40, %v2033_v34  ;;  %v2757_v42 = vpop.f32.mrb[18].mxu0  ;;  %v2839_v43 = vpop.f32.mrb[18].mxu1  ;;  %v6038_v31 = vld [vmem:[#allocation18 + $0xac] ss:$16 sps:$4 sm:$0xff]   ;;  %v6033_v34 = vld [vmem:[#allocation18 + $0xa0] ss:$16 sps:$4 sm:$0xff]  }
 0x4f2   :  { %v2842_v44 = vmax.f32 %v5449_v37, 0.0  ;;  %v2844_v45 = vmax.f32 %v5451_v38, 0.0  ;;  %v2758_v46 = vpop.f32.mrb[19].mxu0  ;;  %v2840_v15 = vpop.f32.mrb[19].mxu1  ;;  %v6036_v35 = vld [vmem:[#allocation18 + $0xa8] ss:$16 sps:$4 sm:$0xff]  }
 0x4f3   :  { %v2843_v47 = vmax.f32 %v5450_v41, 0.0  ;;  %v2845_v48 = vmax.f32 %v5452_v14, 0.0  ;;  %v6041_v36 = vld [vmem:[#allocation18 + $0xc4] ss:$16 sps:$4 sm:$0xff]   ;;  %v6044_v37 = vld [vmem:[#allocation18 + $0xcc] ss:$16 sps:$4 sm:$0xff]  }
 0x4f4   :  { %v2846_v51 = vpack.c.bf16 %v2842_v44, %v2842_v44  ;;  %v2848_v52 = vpack.c.bf16 %v2844_v45, %v2844_v45  ;;  %v6039_v38 = vld [vmem:[#allocation18 + $0xc0] ss:$16 sps:$4 sm:$0xff]   ;;  %v6042_v39 = vld [vmem:[#allocation18 + $0xc8] ss:$16 sps:$4 sm:$0xff]   ;;  %v6047_v40 = vld [vmem:[#allocation18 + $0xe4] ss:$16 sps:$4 sm:$0xff]  }
 0x4f5   :  { %v2847_v49 = vpack.c.bf16 %v2843_v47, %v2843_v47  ;;  %v2849_v50 = vpack.c.bf16 %v2845_v48, %v2845_v48  ;;  %v6050_v41 = vld [vmem:[#allocation18 + $0xec] ss:$16 sps:$4 sm:$0xff]   ;;  %v6045_v14 = vld [vmem:[#allocation18 + $0xe0] ss:$16 sps:$4 sm:$0xff]   ;;  %v6048_v42 = vld [vmem:[#allocation18 + $0xe8] ss:$16 sps:$4 sm:$0xff]  }
 0x4f6   :  { %v6053_v43 = vld [vmem:[#allocation18 + $0x104] ss:$16 sps:$4 sm:$0xff]   ;;  %v6056_v44 = vld [vmem:[#allocation18 + $0x10c] ss:$16 sps:$4 sm:$0xff]   ;;  %v6051_v45 = vld [vmem:[#allocation18 + $0x100] ss:$16 sps:$4 sm:$0xff]  }
 0x4f7   :  { %3145 = vmatprep.mubr.bf16.mxu0 %v2847_v49  ;;  %3185 = vmatprep.mubr.bf16.mxu1 %v2849_v50  ;;  %v6054_v46 = vld [vmem:[#allocation18 + $0x108] ss:$16 sps:$4 sm:$0xff]   ;;  %v6059_v15 = vld [vmem:[#allocation18 + $0x124] ss:$16 sps:$4 sm:$0xff]   ;;  %v6062_v47 = vld [vmem:[#allocation18 + $0x12c] ss:$16 sps:$4 sm:$0xff]  }
 0x4f8   :  { %3146 = vmatmul.mubr.bf16.vlgmr.msra.gmra.mrb[20].mxu0 %v2846_v51  ;;  %3186 = vmatmul.mubr.bf16.vlgmr.msra.gmra.mrb[20].mxu1 %v2848_v52  ;;  %v6057_v48 = vld [vmem:[#allocation18 + $0x120] ss:$16 sps:$4 sm:$0xff]   ;;  %v6060_v49 = vld [vmem:[#allocation18 + $0x128] ss:$16 sps:$4 sm:$0xff]   ;;  %v6065_v50 = vld [vmem:[#allocation18 + $0x144] ss:$16 sps:$4 sm:$0xff]  }
 0x4f9   :  { %3323 = vmatpush1.bf16.msra.mxu0 %v5979_v29  ;;  %3354 = vmatprep.mubr.bf16.mxu0 %v6580_v2  ;;  %v6068_v29 = vld [vmem:[#allocation18 + $0x14c] ss:$16 sps:$4 sm:$0xff]   ;;  %v6063_v51 = vld [vmem:[#allocation18 + $0x140] ss:$16 sps:$4 sm:$0xff]   ;;  %v6066_v52 = vld [vmem:[#allocation18 + $0x148] ss:$16 sps:$4 sm:$0xff]  }
 0x4fa   :  { %3324 = vmatprep.subr.bf16.mxu0 %v5984_v53  ;;  %3364 = vmatpush1.bf16.msra.mxu1 %v5991_v54  ;;  %v6071_v53 = vld [vmem:[#allocation18 + $0x164] ss:$16 sps:$4 sm:$0xff]   ;;  %v6074_v54 = vld [vmem:[#allocation18 + $0x16c] ss:$16 sps:$4 sm:$0xff]  }
 0x4fb   :  { %3365 = vmatprep.subr.bf16.mxu1 %v5996_v55  ;;  %3395 = vmatprep.mubr.bf16.mxu1 %v6580_v2  ;;  %v3199_v2 = vld [vmem:[%s7052_s15] sm:$0xf]  ;;  %v6069_v55 = vld [vmem:[#allocation18 + $0x160] ss:$16 sps:$4 sm:$0xff]   ;;  %s5132_s15 = sld [smem:[#allocation2 + $0x1]] }
 0x4fd   :  { %3325 = vmatpush1.bf16.msra.mxu0 %v5982_v56  ;;  %v6072_v56 = vld [vmem:[#allocation18 + $0x168] ss:$16 sps:$4 sm:$0xff]  }
 0x4fe   :  { %3326 = vmatprep.subr.bf16.mxu0 %v5987_v57  ;;  %3366 = vmatpush1.bf16.msra.mxu1 %v5994_v33  ;;  %v6075_v57 = vld [vmem:[#allocation18 + $0x180] ss:$16 sps:$4 sm:$0xff]   ;;  %v6077_v33 = vld [vmem:[#allocation18 + $0x184] ss:$16 sps:$4 sm:$0xff]  }
 0x4ff   :  { %3367 = vmatprep.subr.bf16.mxu1 %v5999_v58  ;;  %v6078_v58 = vld [vmem:[#allocation18 + $0x188] ss:$16 sps:$4 sm:$0xff]  }
 0x501   :  { %3327 = vmatpush1.bf16.msra.mxu0 %v5985_v59  ;;  %v6080_v59 = vld [vmem:[#allocation18 + $0x18c] ss:$16 sps:$4 sm:$0xff]  }
 0x502   :  { %3328 = vmatprep.subr.bf16.mxu0 %v5990_v60  ;;  %3368 = vmatpush1.bf16.msra.mxu1 %v5997_v61  ;;  %v6083_v60 = vld [vmem:[#allocation18 + $0x1a4] ss:$16 sps:$4 sm:$0xff]   ;;  %v6086_v61 = vld [vmem:[#allocation18 + $0x1ac] ss:$16 sps:$4 sm:$0xff]  }
 0x503   :  { %3369 = vmatprep.subr.bf16.mxu1 %v6002_v62  ;;  %v6081_v62 = vld [vmem:[#allocation18 + $0x1a0] ss:$16 sps:$4 sm:$0xff]  }
 0x505   :  { %3329 = vmatpush1.bf16.msra.mxu0 %v5988_v63  ;;  %v6084_v63 = vld [vmem:[#allocation18 + $0x1a8] ss:$16 sps:$4 sm:$0xff]  }
 0x506   :  { %3370 = vmatpush1.bf16.msra.mxu1 %v6000_v0  ;;  %4202 = vmatprep.subr.bf16.mxu0 %v6005_v1  ;;  %v6089_v0 = vld [vmem:[#allocation18 + $0x1c4] ss:$16 sps:$4 sm:$0xff]   ;;  %v6092_v1 = vld [vmem:[#allocation18 + $0x1cc] ss:$16 sps:$4 sm:$0xff]  }
 0x507   :  { %4284 = vmatprep.subr.bf16.mxu1 %v6008_v3  ;;  %v6087_v3 = vld [vmem:[#allocation18 + $0x1c0] ss:$16 sps:$4 sm:$0xff]  }
 0x508   :  { %5149 = vmatmul.mubr.msk.bf16.vlgmr.msra.gmra.mrb[24].mxu0 %vm3318_vm2, %v3199_v2 }
 0x509   :  { %5150 = vmatmul.mubr.msk.bf16.vlgmr.msra.gmra.mrb[24].mxu1 %vm3318_vm2, %v3199_v2  ;;  %4203 = vmatpush1.bf16.msra.mxu0 %v6003_v4  ;;  %v6090_v2 = vld [vmem:[#allocation18 + $0x1c8] ss:$16 sps:$4 sm:$0xff]   ;;  %v6095_v4 = vld [vmem:[#allocation18 + $0x1e4] ss:$16 sps:$4 sm:$0xff]  }
 0x50a   :  { %4285 = vmatpush1.bf16.msra.mxu1 %v6006_v5  ;;  %4204 = vmatprep.subr.bf16.mxu0 %v6011_v6  ;;  %v6098_v5 = vld [vmem:[#allocation18 + $0x1ec] ss:$16 sps:$4 sm:$0xff]   ;;  %v6093_v6 = vld [vmem:[#allocation18 + $0x1e0] ss:$16 sps:$4 sm:$0xff]  }
 0x50b   :  { %4286 = vmatprep.subr.bf16.mxu1 %v6014_v7  ;;  %v6096_v7 = vld [vmem:[#allocation18 + $0x1e8] ss:$16 sps:$4 sm:$0xff]  }
 0x50d   :  { %4205 = vmatpush1.bf16.msra.mxu0 %v6009_v8  ;;  %v6101_v8 = vld [vmem:[#allocation18 + $0x204] ss:$16 sps:$4 sm:$0xff]  }
 0x50e   :  { %4287 = vmatpush1.bf16.msra.mxu1 %v6012_v9  ;;  %4206 = vmatprep.subr.bf16.mxu0 %v6017_v10  ;;  %v6104_v9 = vld [vmem:[#allocation18 + $0x20c] ss:$16 sps:$4 sm:$0xff]  }
 0x50f   :  { %4288 = vmatprep.subr.bf16.mxu1 %v6020_v11 }
 0x511   :  { %4207 = vmatpush1.bf16.msra.mxu0 %v6015_v12  ;;  %v5099_v12 = vld [vmem:[%s7051_s14] ss:$0 sm:$0xff] }
 0x512   :  { %4289 = vmatpush1.bf16.msra.mxu1 %v6018_v18  ;;  %4208 = vmatprep.subr.bf16.mxu0 %v6023_v21 }
 0x513   :  { %4290 = vmatprep.subr.bf16.mxu1 %v6026_v22 }
 0x515   :  { %4209 = vmatpush1.bf16.msra.mxu0 %v6021_v23 }
 0x516   :  { %4291 = vmatpush1.bf16.msra.mxu1 %v6024_v24  ;;  %4210 = vmatprep.subr.bf16.mxu0 %v6029_v25 }
 0x517   :  { %4292 = vmatprep.subr.bf16.mxu1 %v6032_v26 }
 0x519   :  { %4211 = vmatpush1.bf16.msra.mxu0 %v6027_v27 }
 0x51a   :  { %4293 = vmatpush1.bf16.msra.mxu1 %v6030_v28  ;;  %4212 = vmatprep.subr.bf16.mxu0 %v6035_v30 }
 0x51b   :  { %4294 = vmatprep.subr.bf16.mxu1 %v6038_v31  ;;  %v3196_v31 = vstv %s5132_s15 }
 0x51d   :  { %4213 = vmatpush1.bf16.msra.mxu0 %v6033_v34  ;;  %v1697_v34 = vstv %s1696_s3 }
 0x51e   :  { %4295 = vmatpush1.bf16.msra.mxu1 %v6036_v35  ;;  %4214 = vmatprep.subr.bf16.mxu0 %v6041_v36  ;;  %v6961_v36 = vld [vmem:[%s7054_s17] sm:$0xf] }
 0x51f   :  { %4296 = vmatprep.subr.bf16.mxu1 %v6044_v37 }
 0x521   :  { %4215 = vmatpush1.bf16.msra.mxu0 %v6039_v38  ;;  %v1698_v38 = vmul.f32 %v1697_v34, %v1694_v20  ;;  %v6155_v34 = vld [vmem:[#allocation18 + $0x324] ss:$16 sps:$4 sm:$0xff]  }
 0x522   :  { %4297 = vmatpush1.bf16.msra.mxu1 %v6042_v39  ;;  %4216 = vmatprep.subr.bf16.mxu0 %v6047_v40  ;;  %v3221_v40 = vrot.slane %v6961_v36, %v6891_v16 }
 0x523   :  { %4298 = vmatprep.subr.bf16.mxu1 %v6050_v41  ;;  %v3225_v41 = vrot.slane %v6961_v36, %v6894_v17 }
 0x525   :  { %4217 = vmatpush1.bf16.msra.mxu0 %v6045_v14  ;;  %v3233_v14 = vrot.slane %v6961_v36, %v6899_v19 }
 0x526   :  { %4299 = vmatpush1.bf16.msra.mxu1 %v6048_v42  ;;  %4218 = vmatprep.subr.bf16.mxu0 %v6053_v43 }
 0x527   :  { %4300 = vmatprep.subr.bf16.mxu1 %v6056_v44 }
 0x529   :  { %4219 = vmatpush1.bf16.msra.mxu0 %v6051_v45 }
 0x52a   :  { %4301 = vmatpush1.bf16.msra.mxu1 %v6054_v46  ;;  %4220 = vmatprep.subr.bf16.mxu0 %v6059_v15 }
 0x52b   :  { %4302 = vmatprep.subr.bf16.mxu1 %v6062_v47 }
 0x52d   :  { %4221 = vmatpush1.bf16.msra.mxu0 %v6057_v48 }
 0x52e   :  { %4303 = vmatpush1.bf16.msra.mxu1 %v6060_v49  ;;  %4222 = vmatprep.subr.bf16.mxu0 %v6065_v50 }
 0x52f   :  { %4304 = vmatprep.subr.bf16.mxu1 %v6068_v29 }
 0x531   :  { %4223 = vmatpush1.bf16.msra.mxu0 %v6063_v51 }
 0x532   :  { %4305 = vmatpush1.bf16.msra.mxu1 %v6066_v52  ;;  %4224 = vmatprep.subr.bf16.mxu0 %v6071_v53  ;;  %v6099_v53 = vld [vmem:[#allocation18 + $0x200] ss:$16 sps:$4 sm:$0xff]  }
 0x533   :  { %4306 = vmatprep.subr.bf16.mxu1 %v6074_v54  ;;  %v6102_v54 = vld [vmem:[#allocation18 + $0x208] ss:$16 sps:$4 sm:$0xff]  }
 0x535   :  { %4225 = vmatpush1.bf16.msra.mxu0 %v6069_v55 }
 0x536   :  { %4307 = vmatpush1.bf16.msra.mxu1 %v6072_v56  ;;  %4226 = vmatprep.subr.bf16.mxu0 %v6077_v33  ;;  %v6107_v56 = vld [vmem:[#allocation18 + $0x224] ss:$16 sps:$4 sm:$0xff]  }
 0x537   :  { %4308 = vmatprep.subr.bf16.mxu1 %v6080_v59  ;;  %v6108_v59 = vld [vmem:[#allocation18 + $0x228] ss:$16 sps:$4 sm:$0xff]  }
 0x539   :  { %4227 = vmatpush1.bf16.msra.mxu0 %v6075_v57  ;;  %v6110_v57 = vld [vmem:[#allocation18 + $0x22c] ss:$16 sps:$4 sm:$0xff]  }
 0x53a   :  { %4309 = vmatpush1.bf16.msra.mxu1 %v6078_v58  ;;  %4228 = vmatprep.subr.bf16.mxu0 %v6083_v60  ;;  %v6105_v58 = vld [vmem:[#allocation18 + $0x220] ss:$16 sps:$4 sm:$0xff]   ;;  %v6113_v60 = vld [vmem:[#allocation18 + $0x244] ss:$16 sps:$4 sm:$0xff]  }
 0x53b   :  { %4310 = vmatprep.subr.bf16.mxu1 %v6086_v61  ;;  %v6116_v61 = vld [vmem:[#allocation18 + $0x24c] ss:$16 sps:$4 sm:$0xff]  }
 0x53d   :  { %4229 = vmatpush1.bf16.msra.mxu0 %v6081_v62  ;;  %v6111_v62 = vld [vmem:[#allocation18 + $0x240] ss:$16 sps:$4 sm:$0xff]  }
 0x53e   :  { %4311 = vmatpush1.bf16.msra.mxu1 %v6084_v63  ;;  %4230 = vmatprep.subr.bf16.mxu0 %v6089_v0  ;;  %v6114_v63 = vld [vmem:[#allocation18 + $0x248] ss:$16 sps:$4 sm:$0xff]   ;;  %v6119_v0 = vld [vmem:[#allocation18 + $0x264] ss:$16 sps:$4 sm:$0xff]  }
 0x53f   :  { %4312 = vmatprep.subr.bf16.mxu1 %v6092_v1  ;;  %v6122_v1 = vld [vmem:[#allocation18 + $0x26c] ss:$16 sps:$4 sm:$0xff]  }
 0x541   :  { %4231 = vmatpush1.bf16.msra.mxu0 %v6087_v3  ;;  %v6117_v3 = vld [vmem:[#allocation18 + $0x260] ss:$16 sps:$4 sm:$0xff]  }
 0x542   :  { %4313 = vmatpush1.bf16.msra.mxu1 %v6090_v2  ;;  %4232 = vmatprep.subr.bf16.mxu0 %v6095_v4  ;;  %v6120_v2 = vld [vmem:[#allocation18 + $0x268] ss:$16 sps:$4 sm:$0xff]   ;;  %v6125_v4 = vld [vmem:[#allocation18 + $0x284] ss:$16 sps:$4 sm:$0xff]  }
 0x543   :  { %4314 = vmatprep.subr.bf16.mxu1 %v6098_v5  ;;  %v6128_v5 = vld [vmem:[#allocation18 + $0x28c] ss:$16 sps:$4 sm:$0xff]  }
 0x545   :  { %4233 = vmatpush1.bf16.msra.mxu0 %v6093_v6  ;;  %v6123_v6 = vld [vmem:[#allocation18 + $0x280] ss:$16 sps:$4 sm:$0xff]  }
 0x546   :  { %4315 = vmatpush1.bf16.msra.mxu1 %v6096_v7  ;;  %4243 = vmatprep.subr.bf16.mxu0 %v6101_v8  ;;  %v6126_v7 = vld [vmem:[#allocation18 + $0x288] ss:$16 sps:$4 sm:$0xff]   ;;  %v6131_v8 = vld [vmem:[#allocation18 + $0x2a4] ss:$16 sps:$4 sm:$0xff]  }
 0x547   :  { %4325 = vmatprep.subr.bf16.mxu1 %v6104_v9  ;;  %v6134_v9 = vld [vmem:[#allocation18 + $0x2ac] ss:$16 sps:$4 sm:$0xff]  }
 0x5cb   :  { %v5373_v10 = vpop.f32.mrb[20].mxu0  ;;  %v5395_v11 = vpop.f32.mrb[20].mxu1 }
 0x5cc   :  { %v5374_v18 = vpop.f32.mrb[21].mxu0  ;;  %v5396_v21 = vpop.f32.mrb[21].mxu1 }
 0x5cd   :  { %v5375_v22 = vadd.f32 %v5374_v18, %v5373_v10  ;;  %v5397_v23 = vadd.f32 %v5396_v21, %v5395_v11  ;;  %v5376_v24 = vpop.f32.mrb[22].mxu0  ;;  %v5398_v25 = vpop.f32.mrb[22].mxu1  ;;  %v6129_v10 = vld [vmem:[#allocation18 + $0x2a0] ss:$16 sps:$4 sm:$0xff]   ;;  %v6132_v11 = vld [vmem:[#allocation18 + $0x2a8] ss:$16 sps:$4 sm:$0xff]  }
 0x5ce   :  { %v5377_v26 = vpop.f32.mrb[23].mxu0  ;;  %v5399_v27 = vpop.f32.mrb[23].mxu1  ;;  %v6140_v18 = vld [vmem:[#allocation18 + $0x2cc] ss:$16 sps:$4 sm:$0xff]   ;;  %v6135_v21 = vld [vmem:[#allocation18 + $0x2c0] ss:$16 sps:$4 sm:$0xff]  }
 0x5cf   :  { %v3148_v28 = vadd.f32 %v5375_v22, %v5099_v12  ;;  %v6137_v12 = vld [vmem:[#allocation18 + $0x2c4] ss:$16 sps:$4 sm:$0xff]   ;;  %v6138_v22 = vld [vmem:[#allocation18 + $0x2c8] ss:$16 sps:$4 sm:$0xff]   ;;  %v6146_v24 = vld [vmem:[#allocation18 + $0x2ec] ss:$16 sps:$4 sm:$0xff]  }
 0x5d0   :  { %v6141_v25 = vld [vmem:[#allocation18 + $0x2e0] ss:$16 sps:$4 sm:$0xff]   ;;  %v6144_v26 = vld [vmem:[#allocation18 + $0x2e8] ss:$16 sps:$4 sm:$0xff]   ;;  %v6149_v27 = vld [vmem:[#allocation18 + $0x304] ss:$16 sps:$4 sm:$0xff]  }
 0x5d1   :  { %v3188_v30 = vadd.f32 %v5397_v23, %v3148_v28  ;;  %v6143_v23 = vld [vmem:[#allocation18 + $0x2e4] ss:$16 sps:$4 sm:$0xff]   ;;  %v6152_v28 = vld [vmem:[#allocation18 + $0x30c] ss:$16 sps:$4 sm:$0xff]  }
 0x5d3   :  { %v3193_v35 = vmax.f32 %v3188_v30, 0.0  ;;  %v6147_v30 = vld [vmem:[#allocation18 + $0x300] ss:$16 sps:$4 sm:$0xff]  }
 0x5d5   :  { %3194 = vst [vmem:[#allocation22] sm:$0xff] %v3193_v35  ;;  %v3197_v37 = vmul.f32 %v3196_v31, %v3193_v35  ;;  %v6150_v31 = vld [vmem:[#allocation18 + $0x308] ss:$16 sps:$4 sm:$0xff]   ;;  %v6158_v35 = vld [vmem:[#allocation18 + $0x32c] ss:$16 sps:$4 sm:$0xff]  }
 0x5d7   :  { %v6965_v39 = vadd.f32 %v3197_v37, %v1698_v38  ;;  %v6153_v37 = vld [vmem:[#allocation18 + $0x320] ss:$16 sps:$4 sm:$0xff]   ;;  %v6156_v38 = vld [vmem:[#allocation18 + $0x328] ss:$16 sps:$4 sm:$0xff]  }
 0x5db   :  { %v3356_v42 = vpop.f32.mrb[24].mxu0 }
 0x5dc   :  { %v3357_v43 = vadd.f32 %v3356_v42, %v3221_v40  ;;  %v3358_v44 = vpop.f32.mrb[25].mxu0  ;;  %v6973_v45 = vpop.f32.mrb[24].mxu1  ;;  %v6161_v40 = vld [vmem:[#allocation18 + $0x344] ss:$16 sps:$4 sm:$0xff]   ;;  %v6162_v42 = vld [vmem:[#allocation18 + $0x348] ss:$16 sps:$4 sm:$0xff]  }
 0x5dd   :  { %v3359_v46 = vadd.f32 %v3358_v44, %v3225_v41  ;;  %v3360_v15 = vpop.f32.mrb[26].mxu0  ;;  %v3399_v13 = vpop.f32.mrb[25].mxu1  ;;  %v6164_v41 = vld [vmem:[#allocation18 + $0x34c] ss:$16 sps:$4 sm:$0xff]  }
 0x5de   :  { %v3404_v20 = vmax.f32 %v3357_v43, 0.0  ;;  %v3361_v47 = vpop.f32.mrb[27].mxu0  ;;  %v3400_v48 = vadd.f32 %v3399_v13, %v3233_v14  ;;  %v3401_v49 = vpop.f32.mrb[26].mxu1  ;;  %v6159_v14 = vld [vmem:[#allocation18 + $0x340] ss:$16 sps:$4 sm:$0xff]  }
 0x5df   :  { %v3405_v50 = vmax.f32 %v3359_v46, 0.0  ;;  %v3402_v29 = vpop.f32.mrb[27].mxu1  ;;  %v6167_v43 = vld [vmem:[#allocation18 + $0x364] ss:$16 sps:$4 sm:$0xff]   ;;  %v6170_v44 = vld [vmem:[#allocation18 + $0x36c] ss:$16 sps:$4 sm:$0xff]  }
 0x5e0   :  { %v3407_v51 = vmax.f32 %v3400_v48, 0.0  ;;  %v3408_v55 = vpack.c.bf16 %v3404_v20, %v3404_v20  ;;  %v6165_v46 = vld [vmem:[#allocation18 + $0x360] ss:$16 sps:$4 sm:$0xff]   ;;  %v6168_v15 = vld [vmem:[#allocation18 + $0x368] ss:$16 sps:$4 sm:$0xff]  }
 0x5e1   :  { %v3409_v52 = vpack.c.bf16 %v3405_v50, %v3405_v50  ;;  %v6173_v13 = vld [vmem:[#allocation18 + $0x384] ss:$16 sps:$4 sm:$0xff]   ;;  %v6176_v20 = vld [vmem:[#allocation18 + $0x38c] ss:$16 sps:$4 sm:$0xff]   ;;  %v6171_v47 = vld [vmem:[#allocation18 + $0x380] ss:$16 sps:$4 sm:$0xff]  }
 0x5e2   :  { %v3411_v33 = vpack.c.bf16 %v3407_v51, %v3407_v51  ;;  %v6174_v48 = vld [vmem:[#allocation18 + $0x388] ss:$16 sps:$4 sm:$0xff]   ;;  %v6179_v49 = vld [vmem:[#allocation18 + $0x3a4] ss:$16 sps:$4 sm:$0xff]   ;;  %v6182_v50 = vld [vmem:[#allocation18 + $0x3ac] ss:$16 sps:$4 sm:$0xff]  }
 0x5e3   :  { %4234 = vmatprep.mubr.bf16.mxu0 %v3409_v52  ;;  %4316 = vmatprep.mubr.bf16.mxu1 %v3409_v52  ;;  %v6177_v29 = vld [vmem:[#allocation18 + $0x3a0] ss:$16 sps:$4 sm:$0xff]   ;;  %v6180_v51 = vld [vmem:[#allocation18 + $0x3a8] ss:$16 sps:$4 sm:$0xff]   ;;  %v3229_v52 = vrot.slane %v6961_v36, %v6908_v32 }
 0x5e4   :  { %4235 = vmatmul.mubr.bf16.vlgmr.msra.gmra.mrb[28].mxu0 %v3408_v55  ;;  %4317 = vmatmul.mubr.bf16.vlgmr.msra.gmra.mrb[28].mxu1 %v3408_v55  ;;  %v6183_v55 = vld [vmem:[#allocation18 + $0x3c0] ss:$16 sps:$4 sm:$0xff]  }
 0x5e5   :  { %4244 = vmatpush1.bf16.msra.mxu0 %v6099_v53  ;;  %4326 = vmatpush1.bf16.msra.mxu1 %v6102_v54  ;;  %v6185_v53 = vld [vmem:[#allocation18 + $0x3c4] ss:$16 sps:$4 sm:$0xff]   ;;  %v6188_v54 = vld [vmem:[#allocation18 + $0x3cc] ss:$16 sps:$4 sm:$0xff]  }
 0x5e6   :  { %4245 = vmatprep.subr.bf16.mxu0 %v6107_v56  ;;  %4327 = vmatprep.subr.bf16.mxu1 %v6110_v57  ;;  %v6186_v56 = vld [vmem:[#allocation18 + $0x3c8] ss:$16 sps:$4 sm:$0xff]   ;;  %v3398_v57 = vadd.f32 %v6973_v45, %v3229_v52  ;;  %v6195_v36 = vld [vmem:[#allocation19 + $0x40] sm:$0xff]  }
 0x5e7   :  { %4275 = vmatprep.mubr.bf16.mxu0 %v3411_v33  ;;  %4357 = vmatprep.mubr.bf16.mxu1 %v3411_v33  ;;  %v6191_v33 = vld [vmem:[#allocation18 + $0x3e4] ss:$16 sps:$4 sm:$0xff]   ;;  %v6199_v45 = vld [vmem:[#allocation19 + $0x48] sm:$0xff]  }
 0x5e9   :  { %4246 = vmatpush1.bf16.msra.mxu0 %v6105_v58  ;;  %4328 = vmatpush1.bf16.msra.mxu1 %v6108_v59  ;;  %v6194_v58 = vld [vmem:[#allocation18 + $0x3ec] ss:$16 sps:$4 sm:$0xff]   ;;  %v6189_v59 = vld [vmem:[#allocation18 + $0x3e0] ss:$16 sps:$4 sm:$0xff]  }
 0x5ea   :  { %4247 = vmatprep.subr.bf16.mxu0 %v6113_v60  ;;  %4329 = vmatprep.subr.bf16.mxu1 %v6116_v61  ;;  %v6192_v60 = vld [vmem:[#allocation18 + $0x3e8] ss:$16 sps:$4 sm:$0xff]   ;;  %v3406_v61 = vmax.f32 %v3398_v57, 0.0 }
 0x5ed   :  { %4248 = vmatpush1.bf16.msra.mxu0 %v6111_v62  ;;  %4330 = vmatpush1.bf16.msra.mxu1 %v6114_v63  ;;  %v6196_v62 = vld [vmem:[#allocation19 + $0xc0] sm:$0xff]  }
 0x5ee   :  { %4249 = vmatprep.subr.bf16.mxu0 %v6119_v0  ;;  %4331 = vmatprep.subr.bf16.mxu1 %v6122_v1  ;;  %v6197_v63 = vld [vmem:[#allocation19] sm:$0xff]   ;;  %v3410_v1 = vpack.c.bf16 %v3406_v61, %v3406_v61 }
 0x5ef   :  { %v6198_v0 = vld [vmem:[#allocation19 + $0x80] sm:$0xff]  }
 0x5f1   :  { %4250 = vmatpush1.bf16.msra.mxu0 %v6117_v3  ;;  %4332 = vmatpush1.bf16.msra.mxu1 %v6120_v2  ;;  %v6200_v3 = vld [vmem:[#allocation19 + $0xc8] sm:$0xff]  }
 0x5f2   :  { %4251 = vmatprep.subr.bf16.mxu0 %v6125_v4  ;;  %4333 = vmatprep.subr.bf16.mxu1 %v6128_v5  ;;  %v6201_v2 = vld [vmem:[#allocation19 + $0x8] sm:$0xff]   ;;  %v6203_v5 = vld [vmem:[#allocation19 + $0x50] sm:$0xff]  }
 0x5f3   :  { %v6202_v4 = vld [vmem:[#allocation19 + $0x88] sm:$0xff]  }
 0x5f5   :  { %4252 = vmatpush1.bf16.msra.mxu0 %v6123_v6  ;;  %4334 = vmatpush1.bf16.msra.mxu1 %v6126_v7  ;;  %v6204_v6 = vld [vmem:[#allocation19 + $0xd0] sm:$0xff]  }
 0x5f6   :  { %4253 = vmatprep.subr.bf16.mxu0 %v6131_v8  ;;  %4335 = vmatprep.subr.bf16.mxu1 %v6134_v9  ;;  %v6205_v7 = vld [vmem:[#allocation19 + $0x10] sm:$0xff]   ;;  %v6207_v9 = vld [vmem:[#allocation19 + $0x58] sm:$0xff]  }
 0x5f7   :  { %v6206_v8 = vld [vmem:[#allocation19 + $0x90] sm:$0xff]  }
 0x5f9   :  { %4254 = vmatpush1.bf16.msra.mxu0 %v6129_v10  ;;  %4336 = vmatpush1.bf16.msra.mxu1 %v6132_v11  ;;  %v6208_v10 = vld [vmem:[#allocation19 + $0xd8] sm:$0xff]  }
 0x5fa   :  { %4255 = vmatprep.subr.bf16.mxu0 %v6137_v12  ;;  %4337 = vmatprep.subr.bf16.mxu1 %v6140_v18  ;;  %v6209_v11 = vld [vmem:[#allocation19 + $0x18] sm:$0xff]   ;;  %v6211_v18 = vld [vmem:[#allocation19 + $0x60] sm:$0xff]  }
 0x5fb   :  { %v6210_v12 = vld [vmem:[#allocation19 + $0x98] sm:$0xff]  }
 0x5fd   :  { %4256 = vmatpush1.bf16.msra.mxu0 %v6135_v21  ;;  %4338 = vmatpush1.bf16.msra.mxu1 %v6138_v22  ;;  %v6212_v21 = vld [vmem:[#allocation19 + $0xe0] sm:$0xff]  }
 0x5fe   :  { %4257 = vmatprep.subr.bf16.mxu0 %v6143_v23  ;;  %4339 = vmatprep.subr.bf16.mxu1 %v6146_v24  ;;  %v6213_v22 = vld [vmem:[#allocation19 + $0x20] sm:$0xff]   ;;  %v6215_v24 = vld [vmem:[#allocation19 + $0x68] sm:$0xff]  }
 0x5ff   :  { %v6214_v23 = vld [vmem:[#allocation19 + $0xa0] sm:$0xff]  }
 0x601   :  { %4258 = vmatpush1.bf16.msra.mxu0 %v6141_v25  ;;  %4340 = vmatpush1.bf16.msra.mxu1 %v6144_v26  ;;  %v6216_v25 = vld [vmem:[#allocation19 + $0xe8] sm:$0xff]  }
 0x602   :  { %4259 = vmatprep.subr.bf16.mxu0 %v6149_v27  ;;  %4341 = vmatprep.subr.bf16.mxu1 %v6152_v28  ;;  %v6217_v26 = vld [vmem:[#allocation19 + $0x28] sm:$0xff]   ;;  %v6219_v28 = vld [vmem:[#allocation19 + $0x70] sm:$0xff]  }
 0x603   :  { %v6218_v27 = vld [vmem:[#allocation19 + $0xa8] sm:$0xff]  }
 0x605   :  { %4260 = vmatpush1.bf16.msra.mxu0 %v6147_v30  ;;  %4342 = vmatpush1.bf16.msra.mxu1 %v6150_v31  ;;  %v6220_v30 = vld [vmem:[#allocation19 + $0xf0] sm:$0xff]  }
 0x606   :  { %4261 = vmatprep.subr.bf16.mxu0 %v6155_v34  ;;  %4343 = vmatprep.subr.bf16.mxu1 %v6158_v35  ;;  %v6221_v31 = vld [vmem:[#allocation19 + $0x30] sm:$0xff]   ;;  %v6223_v35 = vld [vmem:[#allocation19 + $0x78] sm:$0xff]  }
 0x607   :  { %v6222_v34 = vld [vmem:[#allocation19 + $0xb0] sm:$0xff]  }
 0x609   :  { %4262 = vmatpush1.bf16.msra.mxu0 %v6153_v37  ;;  %4344 = vmatpush1.bf16.msra.mxu1 %v6156_v38  ;;  %v6224_v37 = vld [vmem:[#allocation19 + $0xf8] sm:$0xff]  }
 0x60a   :  { %4263 = vmatprep.subr.bf16.mxu0 %v6161_v40  ;;  %4345 = vmatprep.subr.bf16.mxu1 %v6164_v41  ;;  %v6225_v38 = vld [vmem:[#allocation19 + $0x38] sm:$0xff]  }
 0x60b   :  { %v6226_v40 = vld [vmem:[#allocation19 + $0xb8] sm:$0xff]  }
 0x60c   :  { %v3540_v41 = vld [vmem:[%s7056_s19] sm:$0xf]  ;;  %s6581_s19 = smov [#allocation22]  }
 0x60d   :  { %4264 = vmatpush1.bf16.msra.mxu0 %v6159_v14  ;;  %4346 = vmatpush1.bf16.msra.mxu1 %v6162_v42  ;;  %v3545_v14 = vrot.slane %v3540_v41, %v6891_v16  ;;  %v3553_v42 = vrot.slane %v3540_v41, %v6908_v32  ;;  %s4740_s26 = sshll.u32 %s6581_s19, 4  ;;  %s4741_s26 = int_to_ptr.vmem [resolvable:$true] %s4740_s26 }
 0x60e   :  { %4265 = vmatprep.subr.bf16.mxu0 %v6167_v43  ;;  %4347 = vmatprep.subr.bf16.mxu1 %v6170_v44  ;;  %v3549_v43 = vrot.slane %v3540_v41, %v6894_v17  ;;  %v3557_v44 = vrot.slane %v3540_v41, %v6899_v19  ;;  %s6457_s9 = scalar_lea.vmem %s4741_s26, 128  ;;  %p6462_p0 = scmp.lt.s32.totalorder %s4741_s26, %s4741_s26 }
 0x60f   :  { %p6458_p13 = scmp.ne.s32.totalorder %s4741_s26, %s6457_s9  ;;  %p6463_p1 = scmp.lt.s32.totalorder %s6457_s9, %s6457_s9 }
 0x611   :  { %4266 = vmatpush1.bf16.msra.mxu0 %v6165_v46  ;;  %4348 = vmatpush1.bf16.msra.mxu1 %v6168_v15  ;;  %p6464_p2 = por %p6463_p1, %p6462_p0 }
 0x612   :  { %4267 = vmatprep.subr.bf16.mxu0 %v6173_v13  ;;  %4349 = vmatprep.subr.bf16.mxu1 %v6176_v20 }
 0x613   :  { %p6465_p3 = pnand %p6464_p2, %p6458_p13 }
 0x615   :  { %4268 = vmatpush1.bf16.msra.mxu0 %v6171_v47  ;;  %4350 = vmatpush1.bf16.msra.mxu1 %v6174_v48 }
 0x616   :  { %4269 = vmatprep.subr.bf16.mxu0 %v6179_v49  ;;  %4351 = vmatprep.subr.bf16.mxu1 %v6182_v50 }
 0x619   :  { %4270 = vmatpush1.bf16.msra.mxu0 %v6177_v29  ;;  %4352 = vmatpush1.bf16.msra.mxu1 %v6180_v51 }
 0x61a   :  { %4271 = vmatprep.subr.bf16.mxu0 %v6185_v53  ;;  %4353 = vmatprep.subr.bf16.mxu1 %v6188_v54 }
 0x61d   :  { %4272 = vmatpush1.bf16.msra.mxu0 %v6183_v55  ;;  %4354 = vmatpush1.bf16.msra.mxu1 %v6186_v56 }
 0x61e   :  { %4273 = vmatprep.subr.bf16.mxu0 %v6191_v33  ;;  %4355 = vmatprep.subr.bf16.mxu1 %v6194_v58 }
 0x621   :  { %4274 = vmatpush1.bf16.msra.mxu0 %v6189_v59  ;;  %4356 = vmatpush1.bf16.msra.mxu1 %v6192_v60 }
 0x622   :  { %5401 = vmatprep.subr.bf16.mxu0 %v6195_v36  ;;  %5423 = vmatprep.subr.bf16.mxu1 %v6196_v62 }
 0x624   :  { %4276 = vmatmul.mubr.bf16.vlgmr.msra.gmra.mrb[28].mxu0 %v3410_v1  ;;  %4358 = vmatmul.mubr.bf16.vlgmr.msra.gmra.mrb[28].mxu1 %v3410_v1 }
 0x625   :  { %5402 = vmatpush3.bf16.msra.mxu0 %v6197_v63  ;;  %5424 = vmatpush3.bf16.msra.mxu1 %v6198_v0 }
 0x626   :  { %5403 = vmatprep.subr.bf16.mxu0 %v6199_v45  ;;  %5425 = vmatprep.subr.bf16.mxu1 %v6200_v3 }
 0x629   :  { %5404 = vmatpush3.bf16.msra.mxu0 %v6201_v2  ;;  %5426 = vmatpush3.bf16.msra.mxu1 %v6202_v4 }
 0x62a   :  { %5405 = vmatprep.subr.bf16.mxu0 %v6203_v5  ;;  %5427 = vmatprep.subr.bf16.mxu1 %v6204_v6 }
 0x62d   :  { %5406 = vmatpush3.bf16.msra.mxu0 %v6205_v7  ;;  %5428 = vmatpush3.bf16.msra.mxu1 %v6206_v8 }
 0x62e   :  { %5407 = vmatprep.subr.bf16.mxu0 %v6207_v9  ;;  %5429 = vmatprep.subr.bf16.mxu1 %v6208_v10 }
 0x631   :  { %5408 = vmatpush3.bf16.msra.mxu0 %v6209_v11  ;;  %5430 = vmatpush3.bf16.msra.mxu1 %v6210_v12 }
 0x632   :  { %5409 = vmatprep.subr.bf16.mxu0 %v6211_v18  ;;  %5431 = vmatprep.subr.bf16.mxu1 %v6212_v21 }
 0x635   :  { %5410 = vmatpush3.bf16.msra.mxu0 %v6213_v22  ;;  %5432 = vmatpush3.bf16.msra.mxu1 %v6214_v23 }
 0x636   :  { %5411 = vmatprep.subr.bf16.mxu0 %v6215_v24  ;;  %5433 = vmatprep.subr.bf16.mxu1 %v6216_v25 }
 0x639   :  { %5412 = vmatpush3.bf16.msra.mxu0 %v6217_v26  ;;  %5434 = vmatpush3.bf16.msra.mxu1 %v6218_v27 }
 0x63a   :  { %5413 = vmatprep.subr.bf16.mxu0 %v6219_v28  ;;  %5435 = vmatprep.subr.bf16.mxu1 %v6220_v30 }
 0x63d   :  { %5414 = vmatpush3.bf16.msra.mxu0 %v6221_v31  ;;  %5436 = vmatpush3.bf16.msra.mxu1 %v6222_v34 }
 0x63e   :  { %5415 = vmatprep.subr.bf16.mxu0 %v6223_v35  ;;  %5437 = vmatprep.subr.bf16.mxu1 %v6224_v37 }
 0x641   :  { %5416 = vmatpush3.bf16.msra.mxu0 %v6225_v38  ;;  %5438 = vmatpush3.bf16.msra.mxu1 %v6226_v40 }
 0x6f7   :  { %v4277_v46 = vpop.f32.mrb[28].mxu0  ;;  %v4359_v15 = vpop.f32.mrb[28].mxu1 }
 0x6f8   :  { %v5453_v13 = vadd.f32 %v4277_v46, %v3545_v14  ;;  %v5455_v20 = vadd.f32 %v4359_v15, %v3553_v42  ;;  %v4279_v47 = vpop.f32.mrb[29].mxu0  ;;  %v4361_v48 = vpop.f32.mrb[29].mxu1 }
 0x6f9   :  { %v5454_v49 = vadd.f32 %v4279_v47, %v3549_v43  ;;  %v5456_v50 = vadd.f32 %v4361_v48, %v3557_v44  ;;  %v4281_v29 = vpop.f32.mrb[30].mxu0  ;;  %v4363_v51 = vpop.f32.mrb[30].mxu1 }
 0x6fa   :  { %v4366_v52 = vmax.f32 %v5453_v13, 0.0  ;;  %v4368_v53 = vmax.f32 %v5455_v20, 0.0  ;;  %v4282_v54 = vpop.f32.mrb[31].mxu0  ;;  %v4364_v16 = vpop.f32.mrb[31].mxu1 }
 0x6fb   :  { %v4367_v55 = vmax.f32 %v5454_v49, 0.0  ;;  %v4369_v32 = vmax.f32 %v5456_v50, 0.0 }
 0x6fc   :  { %v4370_v57 = vpack.c.bf16 %v4366_v52, %v4366_v52  ;;  %v4372_v19 = vpack.c.bf16 %v4368_v53, %v4368_v53 }
 0x6fd   :  { %v4371_v56 = vpack.c.bf16 %v4367_v55, %v4367_v55  ;;  %v4373_v17 = vpack.c.bf16 %v4369_v32, %v4369_v32 }
 0x6ff   :  { %4669 = vmatprep.mubr.bf16.mxu0 %v4371_v56  ;;  %4709 = vmatprep.mubr.bf16.mxu1 %v4373_v17 }
 0x700   :  { %4670 = vmatmul.mubr.bf16.vlgmr.msra.gmra.mrb[32].mxu0 %v4370_v57  ;;  %4710 = vmatmul.mubr.bf16.vlgmr.msra.gmra.mrb[32].mxu1 %v4372_v19 }
 0x701   :  { %6468 = shalt.err (!%p6465_p3)
}
 0x702   :  { %s6469_s28 = scalar_lea.hbm %s7060_s23, 128 }
 0x703   :  { %p6470_p4 = scmp.ne.s32.totalorder %s7060_s23, %s6469_s28  ;;  %p6473_p5 = scmp.lt.u32.totalorder %s6469_s28, %s7060_s23 }
 0x705   :  { %p6475_p6 = pnand %p6473_p5, %p6470_p4 }
 0x707   :  { %6478 = shalt.err (!%p6475_p6)
}
 0x708   :  { %4743 = dma.vmem_to_hbm [thread:$0]  %s4741_s26, 128, %s7060_s23, [#allocation23]  }
 0x709   :  { %s6479_s11 = scalar_lea.vmem %s4731_s5, 128  ;;  %p6484_p8 = scmp.lt.s32.totalorder %s4731_s5, %s4731_s5 }
 0x70a   :  { %p6480_p7 = scmp.ne.s32.totalorder %s4731_s5, %s6479_s11  ;;  %p6485_p9 = scmp.lt.s32.totalorder %s6479_s11, %s6479_s11 }
 0x70c   :  { %p6486_p10 = por %p6485_p9, %p6484_p8 }
 0x70e   :  { %p6487_p11 = pnand %p6486_p10, %p6480_p7 }
 0x710   :  { %6490 = shalt.err (!%p6487_p11)
}
 0x711   :  { %s6491_s0 = scalar_lea.hbm %s7059_s22, 128 }
 0x712   :  { %p6492_p12 = scmp.ne.s32.totalorder %s7059_s22, %s6491_s0  ;;  %p6495_p13 = scmp.lt.u32.totalorder %s6491_s0, %s7059_s22 }
 0x714   :  { %p6497_p0 = pnand %p6495_p13, %p6492_p12 }
 0x716   :  { %6500 = shalt.err (!%p6497_p0)
}
 0x717   :  { %4733 = dma.vmem_to_hbm [thread:$0]  %s4731_s5, 128, %s7059_s22, [#allocation4]   ;;  %v5279_v59 = vld [vmem:[%s7058_s21] ss:$0 sm:$0xff] }
 0x718   :  { %s5312_s30 = sld [smem:[#allocation2 + $0x2]]  ;;  %s6583_s14 = smov [#allocation24]  }
 0x719   :  { %s4750_s17 = sshll.u32 %s6583_s14, 4  ;;  %s6584_s22 = smov [#allocation25]   ;;  %s4751_s17 = int_to_ptr.vmem [resolvable:$true] %s4750_s17 }
 0x71a   :  { %s4760_s19 = sshll.u32 %s6584_s22, 4  ;;  %s6501_s21 = scalar_lea.vmem %s4751_s17, 128  ;;  %s4761_s19 = int_to_ptr.vmem [resolvable:$true] %s4760_s19 }
 0x71b   :  { %p6502_p1 = scmp.ne.s32.totalorder %s4751_s17, %s6501_s21  ;;  %p6506_p2 = scmp.lt.s32.totalorder %s4751_s17, %s4751_s17 }
 0x71c   :  { %p6507_p3 = scmp.lt.s32.totalorder %s6501_s21, %s6501_s21 }
 0x71e   :  { %v4720_v4 = vstv %s5312_s30  ;;  %p6508_p4 = por %p6507_p3, %p6506_p2 }
 0x720   :  { %p6509_p5 = pnand %p6508_p4, %p6502_p1 }
 0x7d3   :  { %v5417_v33 = vpop.f32.mrb[32].mxu0  ;;  %v5439_v58 = vpop.f32.mrb[32].mxu1 }
 0x7d4   :  { %v5418_v60 = vpop.f32.mrb[33].mxu0  ;;  %v5440_v61 = vpop.f32.mrb[33].mxu1 }
 0x7d5   :  { %v5419_v36 = vadd.f32 %v5418_v60, %v5417_v33  ;;  %v5441_v62 = vadd.f32 %v5440_v61, %v5439_v58  ;;  %v5420_v63 = vpop.f32.mrb[34].mxu0  ;;  %v5442_v0 = vpop.f32.mrb[34].mxu1 }
 0x7d6   :  { %v5421_v1 = vpop.f32.mrb[35].mxu0  ;;  %v5443_v45 = vpop.f32.mrb[35].mxu1 }
 0x7d7   :  { %v4672_v3 = vadd.f32 %v5419_v36, %v5279_v59 }
 0x7d9   :  { %v4712_v2 = vadd.f32 %v5441_v62, %v4672_v3 }
 0x7db   :  { %v4717_v5 = vmax.f32 %v4712_v2, 0.0 }
 0x7dd   :  { %4718 = vst [vmem:[#allocation24] sm:$0xff] %v4717_v5  ;;  %v4721_v6 = vmul.f32 %v4720_v4, %v4717_v5 }
 0x7de   :  { %6512 = shalt.err (!%p6509_p5)
}
 0x7df   :  { %s7105_s5 = sld [smem:[#allocation47_spill]] }
 0x7e5   :  { %s6513_s9 = scalar_lea.hbm %s7105_s5, 128 }
 0x7e6   :  { %p6514_p6 = scmp.ne.s32.totalorder %s7105_s5, %s6513_s9  ;;  %p6517_p7 = scmp.lt.u32.totalorder %s6513_s9, %s7105_s5 }
 0x7e8   :  { %p6519_p8 = pnand %p6517_p7, %p6514_p6 }
 0x7ea   :  { %6522 = shalt.err (!%p6519_p8)
}
 0x7eb   :  { %4753 = dma.vmem_to_hbm [thread:$0]  %s4751_s17, 128, %s7105_s5, [#allocation23]   ;;  %v4722_v7 = vadd.f32 %v4721_v6, %v6965_v39 }
 0x7ec   :  { %s6523_s13 = scalar_lea.vmem %s4761_s19, 128  ;;  %p6528_p10 = scmp.lt.s32.totalorder %s4761_s19, %s4761_s19 }
 0x7ed   :  { %4723 = vst [vmem:[#allocation25] sm:$0xff] %v4722_v7  ;;  %p6524_p9 = scmp.ne.s32.totalorder %s4761_s19, %s6523_s13  ;;  %p6529_p11 = scmp.lt.s32.totalorder %s6523_s13, %s6523_s13 }
 0x7ef   :  { %p6530_p12 = por %p6529_p11, %p6528_p10 }
 0x7f1   :  { %p6531_p13 = pnand %p6530_p12, %p6524_p9 }
 0x7f3   :  { %6534 = shalt.err (!%p6531_p13)
}
 0x7f4   :  { %s7106_s11 = sld [smem:[#allocation48_spill]] }
 0x7fa   :  { %s6535_s6 = scalar_lea.hbm %s7106_s11, 128 }
 0x7fb   :  { %p6536_p0 = scmp.ne.s32.totalorder %s7106_s11, %s6535_s6  ;;  %p6539_p1 = scmp.lt.u32.totalorder %s6535_s6, %s7106_s11 }
 0x7fd   :  { %p6541_p2 = pnand %p6539_p1, %p6536_p0 }
 0x7ff   :  { %6544 = shalt.err (!%p6541_p2)
}
 0x800   :  { %4763 = dma.vmem_to_hbm [thread:$0]  %s4761_s19, 128, %s7106_s11, [#allocation26]  }
 0x801   :  { %6559 = dma.done.wait [#allocation4], 128  }
 0x802   :  { %6560 = vsyncadd [#allocation4], 4294967168 }
 0x803   :  { %6561 = dma.done.wait [#allocation23], 256  }
 0x804   :  { %6562 = vsyncadd [#allocation23], 4294967040 }
 0x805   :  { %6563 = dma.done.wait [#allocation26], 128  }
 0x806   :  { %6564 = vsyncadd [#allocation26], 4294967168 }
 0x807   :  { %4776 = vsyncpa [#allocation3], 1 }
 0x808   :  { %4777 = vsyncpa [#allocation8], 1 }
 0x809   :  { %4778 = vsyncpa [#allocation11], 1 }
 0x80a   :  { %4779 = vsyncpa [#allocation14], 1 }
 0x80b   :  { %4780 = vsyncpa [#allocation17], 1 }
 0x80c   :  { %4781 = vsyncpa [#allocation20], 1 }
 0x80d   :  { %4782 = vsyncpa [#allocation4], 1 }
 0x80e   :  { %4783 = vsyncpa [#allocation23], 1 }
 0x80f   :  { %4784 = vsyncpa [#allocation26], 1 }
 0x810   :  { %4785 = vsyncpa [#allocation5], 1 }

</bundles_post_ra>
